<compile_context>
chip_gen: v5e
topology: v5e:2x2
jax: 0.10.0
libtpu: 0.0.40
codegen_flags: <defaults>
</compile_context>

<pallas_src>
import numpy as np
import jax
import jax.numpy as jnp
from jax.experimental import pallas as pl
from jax.experimental.pallas import tpu as pltpu

HIDDEN = 784                 # GRU hidden / preference dim
GP = 896                     # per-gate padded width (7 * 128, lane-aligned)
G3 = 3 * GP                  # 2688 = concatenated (r, z, n) padded width
FOV_IN = 528
MOTION_IN = 90
MOTION_EMB = 128
VIDEO_C_IN = 528
VIDEO_C_OUT = 4
SPATIAL = 14
PIX = SPATIAL * SPATIAL      # 196
BN_EPS = 1e-5
VMEM_LIMIT = 32 * 1024 * 1024


def _largest_divisor_leq(n, cap):
    for t in range(min(n, cap), 0, -1):
        if n % t == 0:
            return t
    return 1


# --------------------------------------------------------------------------
# Batched matmul + bias (used for the hoisted GRU input projection).
# x: (R, K) f32, w: (K, N) bf16, b: (1, N) f32 -> (R, N) f32
# --------------------------------------------------------------------------
def matmul_bias_kernel(x_ref, w_ref, b_ref, o_ref):
    o_ref[...] = (
        jnp.dot(x_ref[...].astype(jnp.bfloat16), w_ref[...],
                preferred_element_type=jnp.float32)
        + b_ref[...]
    )


def matmul_bias(x, w_bf16, b):
    R, K = x.shape
    N = w_bf16.shape[1]
    # Tall M tiles when the row count allows; full array otherwise (small demo shapes).
    tm = R if (R <= 512 or R % 256 != 0) else 256
    return pl.pallas_call(
        matmul_bias_kernel,
        out_shape=jax.ShapeDtypeStruct((R, N), jnp.float32),
        grid=(R // tm,),
        in_specs=[
            pl.BlockSpec((tm, K), lambda i: (i, 0)),
            pl.BlockSpec((K, N), lambda i: (0, 0)),
            pl.BlockSpec((1, N), lambda i: (0, 0)),
        ],
        out_specs=pl.BlockSpec((tm, N), lambda i: (i, 0)),
        compiler_params=pltpu.CompilerParams(
            dimension_semantics=("parallel",),
            vmem_limit_bytes=VMEM_LIMIT,
        ),
    )(x, w_bf16, b)


# --------------------------------------------------------------------------
# GRU recurrence: only h @ W_hh_cat remains in the serial loop.
# gx_ref : (T, B, 3*GP) precomputed x-side gates (x @ W_ih + b_ih, padded gate layout)
# whh_ref: (GP, 3*GP) bf16  (rows/cols beyond 784 per gate are zero)
# bhh_ref: (1, 3*GP) f32
# out    : (T, B, 784)  -> ReLU(preference)   (ReLU commutes with the later expand)
# h_ref  : (B, GP) f32 scratch, persists across grid steps (pad columns stay 0)
# --------------------------------------------------------------------------
def gru_kernel(gx_ref, whh_ref, bhh_ref, out_ref, h_ref):
    c = pl.program_id(0)

    @pl.when(c == 0)
    def _():
        h_ref[...] = jnp.zeros_like(h_ref)          # h0 = zeros

    t_chunk = gx_ref.shape[0]

    def step(t, h):
        hh = jnp.dot(h.astype(jnp.bfloat16), whh_ref[...],
                     preferred_element_type=jnp.float32) + bhh_ref[...]   # (B, 3*GP)
        gx = gx_ref[t]                                                    # (B, 3*GP)
        # lane-aligned gate slices at multiples of 896
        r = jax.nn.sigmoid(gx[:, 0:GP] + hh[:, 0:GP])
        z = jax.nn.sigmoid(gx[:, GP:2 * GP] + hh[:, GP:2 * GP])
        n = jnp.tanh(gx[:, 2 * GP:3 * GP] + r * hh[:, 2 * GP:3 * GP])
        h_new = (1.0 - z) * n + z * h
        out_ref[t] = jnp.maximum(h_new[:, :HIDDEN], 0.0)
        return h_new

    h_ref[...] = jax.lax.fori_loop(0, t_chunk, step, h_ref[...], unroll=True)


def gru_forward(gx_tm, whh_cat_bf16, bhh_cat, B, S):
    t_chunk = _largest_divisor_leq(S, 8)             # amortize per-grid-step overhead
    return pl.pallas_call(
        gru_kernel,
        out_shape=jax.ShapeDtypeStruct((S, B, HIDDEN), jnp.float32),
        grid_spec=pltpu.PrefetchScalarGridSpec(
            num_scalar_prefetch=0,
            grid=(S // t_chunk,),
            in_specs=[
                pl.BlockSpec((t_chunk, B, G3), lambda c: (c, 0, 0)),
                pl.BlockSpec((GP, G3), lambda c: (0, 0)),
                pl.BlockSpec((1, G3), lambda c: (0, 0)),
            ],
            out_specs=pl.BlockSpec((t_chunk, B, HIDDEN), lambda c: (c, 0, 0)),
            scratch_shapes=[pltpu.VMEM((B, GP), jnp.float32)],
        ),
        compiler_params=pltpu.CompilerParams(
            dimension_semantics=("arbitrary",),      # sequential carry across chunks
            vmem_limit_bytes=VMEM_LIMIT,
        ),
    )(gx_tm, whh_cat_bf16, bhh_cat)                  # (S, B, 784), ReLU already applied


# --------------------------------------------------------------------------
# Fused Linear + BatchNorm1d (training batch stats) + ReLU (motion path).
# x: (R, K) f32, w: (K, N) bf16, b/gamma/beta: (1, N) f32 -> (R, N) f32
# --------------------------------------------------------------------------
def linear_bn_relu_kernel(x_ref, w_ref, b_ref, gamma_ref, beta_ref, o_ref):
    y = jnp.dot(x_ref[...].astype(jnp.bfloat16), w_ref[...],
                preferred_element_type=jnp.float32) + b_ref[...]
    mean = jnp.mean(y, axis=0, keepdims=True)
    var = jnp.mean(jnp.square(y - mean), axis=0, keepdims=True)   # biased var (torch BN fwd)
    y_hat = (y - mean) * jax.lax.rsqrt(var + BN_EPS)
    o_ref[...] = jnp.maximum(y_hat * gamma_ref[...] + beta_ref[...], 0.0)


def linear_bn_relu(x, w_bf16, b, gamma, beta):
    R, K = x.shape
    N = w_bf16.shape[1]
    # TODO(synk): for production-sized R, tile rows with a grid + two-pass BN stats.
    return pl.pallas_call(
        linear_bn_relu_kernel,
        out_shape=jax.ShapeDtypeStruct((R, N), jnp.float32),
        grid=(1,),
        in_specs=[
            pl.BlockSpec((R, K), lambda i: (0, 0)),
            pl.BlockSpec((K, N), lambda i: (0, 0)),
            pl.BlockSpec((1, N), lambda i: (0, 0)),
            pl.BlockSpec((1, N), lambda i: (0, 0)),
            pl.BlockSpec((1, N), lambda i: (0, 0)),
        ],
        out_specs=pl.BlockSpec((R, N), lambda i: (0, 0)),
        compiler_params=pltpu.CompilerParams(vmem_limit_bytes=VMEM_LIMIT),
    )(x, w_bf16, b, gamma, beta)


# --------------------------------------------------------------------------
# Video 1x1 conv (528 -> 4), gridded over samples, channel contraction in-kernel.
# x: (tot, 528, 196) f32, w: (4, 528) bf16, b: (4, 1) f32 -> y: (tot, 4, 196) f32 (NCHW order)
# --------------------------------------------------------------------------
def video_conv_kernel(x_ref, w_ref, b_ref, y_ref):
    tv = x_ref.shape[0]

    def body(t, carry):
        y = jnp.dot(w_ref[...], x_ref[t].astype(jnp.bfloat16),
                    preferred_element_type=jnp.float32)          # (4, 196), lane-dense
        y_ref[t] = y + b_ref[...]
        return carry

    jax.lax.fori_loop(0, tv, body, 0, unroll=True)


def video_conv(x, w_bf16, b):
    tot = x.shape[0]
    tv = _largest_divisor_leq(tot, 8)
    return pl.pallas_call(
        video_conv_kernel,
        out_shape=jax.ShapeDtypeStruct((tot, VIDEO_C_OUT, PIX), jnp.float32),
        grid=(tot // tv,),
        in_specs=[
            pl.BlockSpec((tv, VIDEO_C_IN, PIX), lambda i: (i, 0, 0)),
            pl.BlockSpec((VIDEO_C_OUT, VIDEO_C_IN), lambda i: (0, 0)),
            pl.BlockSpec((VIDEO_C_OUT, 1), lambda i: (0, 0)),
        ],
        out_specs=pl.BlockSpec((tv, VIDEO_C_OUT, PIX), lambda i: (i, 0, 0)),
        compiler_params=pltpu.CompilerParams(
            dimension_semantics=("parallel",),
            vmem_limit_bytes=VMEM_LIMIT,
        ),
    )(x, w_bf16, b)


# --------------------------------------------------------------------------
# BatchNorm2d (training batch stats, per-channel over N*H*W) + ReLU on (tot, 4, 196).
# --------------------------------------------------------------------------
def bn2d_relu_kernel(y_ref, gamma_ref, beta_ref, o_ref):
    y = y_ref[...]                                          # (tot, 4, 196)
    n = y.shape[0] * y.shape[2]
    mean = jnp.sum(jnp.sum(y, axis=2, keepdims=True), axis=0, keepdims=True) / n   # (1,4,1)
    d = y - mean
    var = jnp.sum(jnp.sum(d * d, axis=2, keepdims=True), axis=0, keepdims=True) / n
    y_hat = d * jax.lax.rsqrt(var + BN_EPS)
    o_ref[...] = jnp.maximum(y_hat * gamma_ref[...] + beta_ref[...], 0.0)


def bn2d_relu(y, gamma, beta):
    # TODO(synk): for production-sized tot, tile this pass (two-pass stats) to bound VMEM on v7x.
    return pl.pallas_call(
        bn2d_relu_kernel,
        out_shape=jax.ShapeDtypeStruct(y.shape, jnp.float32),
        grid=(1,),
        in_specs=[
            pl.BlockSpec(y.shape, lambda i: (0, 0, 0)),
            pl.BlockSpec((1, VIDEO_C_OUT, 1), lambda i: (0, 0, 0)),
            pl.BlockSpec((1, VIDEO_C_OUT, 1), lambda i: (0, 0, 0)),
        ],
        out_specs=pl.BlockSpec(y.shape, lambda i: (0, 0, 0)),
        compiler_params=pltpu.CompilerParams(vmem_limit_bytes=VMEM_LIMIT),
    )(y, gamma, beta)


# --------------------------------------------------------------------------
# Full forward, mirroring basic_preference_fov_prediction.forward
# --------------------------------------------------------------------------
def forward(fov, motion, video, params, pred_time_window):
    B, S, _ = fov.shape
    P = len(pred_time_window)                        # constant.NUM_FOV_PREDICTION
    tot = B * S * P

    # preference = ReLU(GRU(fov)) expanded across predictions
    fov_tm = jnp.transpose(fov, (1, 0, 2)).reshape(S * B, FOV_IN)        # time-major rows
    gx = matmul_bias(fov_tm, params["wih_cat"], params["bih_cat"])       # (S*B, 3*GP)
    pref = gru_forward(gx.reshape(S, B, G3), params["whh_cat"],
                       params["bhh_cat"], B, S)                          # (S, B, 784)
    pref = jnp.transpose(pref, (1, 0, 2))                                # (B, S, 784)
    pref = jnp.broadcast_to(pref[:, :, None, :], (B, S, P, HIDDEN)).reshape(tot, HIDDEN)

    # motion: Linear(90->128) + BatchNorm1d + ReLU
    # (torch expands across P before the linear/BN; duplicated rows leave batch stats unchanged,
    #  so compute on the unique B*S rows and expand afterwards — numerically identical)
    m = motion.reshape(B * S, MOTION_IN)
    m = linear_bn_relu(m, params["wm_t"], params["bm"], params["gm"], params["betam"])
    m = jnp.broadcast_to(m.reshape(B, S, 1, MOTION_EMB),
                         (B, S, P, MOTION_EMB)).reshape(tot, MOTION_EMB)

    # video: Conv2d(528->4, k=1) + BatchNorm2d + ReLU; output already NCHW per sample
    v = video.reshape(tot, VIDEO_C_IN, PIX)          # pure reshape, no HBM transpose
    v = video_conv(v, params["wv"], params["bv"])    # (tot, 4, 196)
    v = bn2d_relu(v, params["gv"], params["betav"])  # (tot, 4, 196)
    v = v.reshape(tot, VIDEO_C_OUT * PIX)            # (tot, 784) NCHW flatten

    # time window column
    tw = jnp.asarray(pred_time_window, jnp.float32)[None, :]
    tw = jnp.broadcast_to(tw, (B * S, P)).reshape(tot, 1)

    return jnp.concatenate([tw, pref, m, v], axis=1)  # (tot, 1697)


# --------------------------------------------------------------------------
if __name__ == "__main__":
    B, S, P = 2, 3, 2                                # batch, sequence, NUM_FOV_PREDICTION
    PRED_TIME_WINDOW = (0.5, 1.0)                    # len == P

    key = jax.random.PRNGKey(0)
    ks = jax.random.split(key, 12)

    # deterministic parameter init (PyTorch-style uniform ranges); gate order (r, z, n)
    kg = 1.0 / np.sqrt(HIDDEN)
    wih = jax.random.uniform(ks[0], (3, HIDDEN, FOV_IN), jnp.float32, -kg, kg)
    whh = jax.random.uniform(ks[1], (3, HIDDEN, HIDDEN), jnp.float32, -kg, kg)
    bih = jax.random.uniform(ks[2], (3, HIDDEN), jnp.float32, -kg, kg)
    bhh = jax.random.uniform(ks[3], (3, HIDDEN), jnp.float32, -kg, kg)

    # padded gate-concatenated layouts: gate g occupies cols [g*GP, g*GP+784); padding is zero
    wih_cat = np.zeros((FOV_IN, G3), np.float32)
    whh_cat = np.zeros((GP, G3), np.float32)
    bih_cat = np.zeros((1, G3), np.float32)
    bhh_cat = np.zeros((1, G3), np.float32)
    wih_np, whh_np = np.asarray(wih), np.asarray(whh)
    bih_np, bhh_np = np.asarray(bih), np.asarray(bhh)
    for g in range(3):
        wih_cat[:, g * GP:g * GP + HIDDEN] = wih_np[g].T
        whh_cat[:HIDDEN, g * GP:g * GP + HIDDEN] = whh_np[g].T
        bih_cat[0, g * GP:g * GP + HIDDEN] = bih_np[g]
        bhh_cat[0, g * GP:g * GP + HIDDEN] = bhh_np[g]

    km = 1.0 / np.sqrt(MOTION_IN)
    wm = jax.random.uniform(ks[4], (MOTION_EMB, MOTION_IN), jnp.float32, -km, km)
    bm = jax.random.uniform(ks[5], (1, MOTION_EMB), jnp.float32, -km, km)

    kv = 1.0 / np.sqrt(VIDEO_C_IN)
    wv = jax.random.uniform(ks[6], (VIDEO_C_OUT, VIDEO_C_IN), jnp.float32, -kv, kv)
    bv = jax.random.uniform(ks[7], (VIDEO_C_OUT, 1), jnp.float32, -kv, kv)

    params = dict(
        # bf16 weights (f32 accumulation inside the kernels), f32 biases / BN params
        wih_cat=jnp.asarray(wih_cat, jnp.bfloat16),      # (528, 2688)
        whh_cat=jnp.asarray(whh_cat, jnp.bfloat16),      # (896, 2688)
        bih_cat=jnp.asarray(bih_cat),                    # (1, 2688)
        bhh_cat=jnp.asarray(bhh_cat),                    # (1, 2688)
        wm_t=jnp.transpose(wm).astype(jnp.bfloat16),     # (90, 128)
        bm=bm,
        gm=jnp.ones((1, MOTION_EMB), jnp.float32),
        betam=jnp.zeros((1, MOTION_EMB), jnp.float32),
        wv=wv.astype(jnp.bfloat16),                      # (4, 528)
        bv=bv,                                           # (4, 1)
        gv=jnp.ones((1, VIDEO_C_OUT, 1), jnp.float32),
        betav=jnp.zeros((1, VIDEO_C_OUT, 1), jnp.float32),
    )

    fov = jax.random.normal(ks[8], (B, S, FOV_IN), jnp.float32)
    motion = jax.random.normal(ks[9], (B, S, 1, MOTION_IN), jnp.float32)
    video = jax.random.normal(ks[10], (B, S, P, VIDEO_C_IN, SPATIAL, SPATIAL), jnp.float32)

    out = forward(fov, motion, video, params, PRED_TIME_WINDOW)
    out = jax.block_until_ready(out)

    assert out.shape == (B * S * P, 2 * HIDDEN + MOTION_EMB + 1), out.shape   # (12, 1697)
    assert bool(jnp.all(jnp.isfinite(out)))
    print("KERNEL_OK")
</pallas_src>

<mosaic_0001>
module attributes {stable_mosaic.version = 11 : i64} {
  func.func @matmul_bias_kernel(%arg0: i32, %arg1: memref<6x528xf32, #tpu.memory_space<vmem>>, %arg2: memref<528x2688xbf16, #tpu.memory_space<vmem>>, %arg3: memref<1x2688xf32, #tpu.memory_space<vmem>>, %arg4: memref<6x2688xf32, #tpu.memory_space<vmem>>) attributes {dimension_semantics = [#tpu.dimension_semantics<parallel>], iteration_bounds = array<i64: 1>, scalar_prefetch = 0 : i64, scratch_operands = 0 : i64, tpu.core_type = #tpu.core_type<tc>, window_params = [{transform_indices = @transform_0, window_bounds = array<i64: 6, 528>}, {pipeline_mode = #tpu.pipeline_mode<synchronous>, transform_indices = @transform_1, window_bounds = array<i64: 528, 2688>}, {pipeline_mode = #tpu.pipeline_mode<synchronous>, transform_indices = @transform_2, window_bounds = array<i64: 1, 2688>}, {transform_indices = @transform_3, window_bounds = array<i64: 6, 2688>}]} {
    %c0 = arith.constant 0 : index
    %c0_0 = arith.constant 0 : index
    %0 = vector.load %arg1[%c0, %c0_0] : memref<6x528xf32, #tpu.memory_space<vmem>>, vector<6x528xf32>
    %1 = arith.truncf %0 : vector<6x528xf32> to vector<6x528xbf16>
    %c0_1 = arith.constant 0 : index
    %c0_2 = arith.constant 0 : index
    %2 = vector.load %arg2[%c0_1, %c0_2] : memref<528x2688xbf16, #tpu.memory_space<vmem>>, vector<528x2688xbf16>
    %cst = arith.constant dense<0.000000e+00> : vector<6x2688xf32>
    %3 = tpu.matmul %1, %2, %cst {dimension_numbers = #tpu.dot_dimension_numbers<[1], [0], [0], [1], [0, 0, 1, 1], [], []>} : vector<6x528xbf16>, vector<528x2688xbf16>, vector<6x2688xf32> -> vector<6x2688xf32>
    %c0_3 = arith.constant 0 : index
    %c0_4 = arith.constant 0 : index
    %4 = vector.load %arg3[%c0_3, %c0_4] : memref<1x2688xf32, #tpu.memory_space<vmem>>, vector<1x2688xf32>
    %5 = vector.broadcast %4 : vector<1x2688xf32> to vector<6x2688xf32>
    %6 = arith.addf %3, %5 : vector<6x2688xf32>
    %c0_5 = arith.constant 0 : index
    %c0_6 = arith.constant 0 : index
    %7 = vector.load %arg4[%c0_5, %c0_6] : memref<6x2688xf32, #tpu.memory_space<vmem>>, vector<6x2688xf32>
    tpu.vector_store %arg4[%c0_5, %c0_6], %6 {strides = array<i32>} : memref<6x2688xf32, #tpu.memory_space<vmem>>, vector<6x2688xf32>,
    return
  }
  func.func @transform_0(%arg0: i32) -> (i32, i32) {
    %c0_i32 = arith.constant 0 : i32
    %c0_i32_0 = arith.constant 0 : i32
    return %arg0, %c0_i32 : i32, i32
  }
  func.func @transform_1(%arg0: i32) -> (i32, i32) {
    %c0_i32 = arith.constant 0 : i32
    %c0_i32_0 = arith.constant 0 : i32
    %c0_i32_1 = arith.constant 0 : i32
    return %c0_i32, %c0_i32_0 : i32, i32
  }
  func.func @transform_2(%arg0: i32) -> (i32, i32) {
    %c0_i32 = arith.constant 0 : i32
    %c0_i32_0 = arith.constant 0 : i32
    %c0_i32_1 = arith.constant 0 : i32
    return %c0_i32, %c0_i32_0 : i32, i32
  }
  func.func @transform_3(%arg0: i32) -> (i32, i32) {
    %c0_i32 = arith.constant 0 : i32
    %c0_i32_0 = arith.constant 0 : i32
    return %arg0, %c0_i32 : i32, i32
  }
}

</mosaic_0001>

<bundles_post_ra>
// kernel: tpu_custom_call.1
= control target key start
LH: loop header
LB: loop body
LE: loop exit
PB: predicated region body
PF: predicated region fallthrough
CT: control target
= control target key end

     0   :  { %8 = vsyncpa [#allocation3], 0  ;;  %s9562_s0 = inlined_call_operand.hbm [shape: f32[6,528], index: 0, kind: input, shape index: {}]   ;;  %s9563_s1 = inlined_call_operand.hbm [shape: bf16[528,2688], index: 1, kind: input, shape index: {}]   ;;  %s9564_s2 = inlined_call_operand.hbm [shape: f32[1,2688], index: 2, kind: input, shape index: {}]   ;;  %s9565_s3 = inlined_call_operand.hbm [shape: f32[6,2688], index: 3, kind: output, shape index: {}]  }
   0x1   :  { %9 = vsyncpa [#allocation6], 0  ;;  %s26_s14 = sshll.u32 %s9563_s1, 4  ;;  %s27_s14 = int_to_ptr.hbm [resolvable:$true] %s26_s14 }
   0x2   :  { %10 = vsyncpa [#allocation4], 0  ;;  %s9345_s15 = smov [#allocation5]   ;;  %s16_s19 = sshll.u32 %s9562_s0, 4  ;;  %s17_s19 = int_to_ptr.hbm [resolvable:$true] %s16_s19 }
   0x3   :  { %s28_s16 = sshll.u32 %s9345_s15, 4  ;;  %s9346_s20 = smov 1344   ;;  %s29_s16 = int_to_ptr.vmem [resolvable:$true] %s28_s16 }
   0x4   :  { %s9347_s21 = smov 84   ;;  %s9348_s22 = smov [#allocation2]  }
   0x5   :  { %34 = dma.hbm_to_vmem [thread:$0]  %s27_s14, 88704, %s29_s16, [#allocation6], %s9346_s20, %s9346_s20, %s9347_s21  }
   0x6   :  { %s18_s23 = sshll.u32 %s9348_s22, 4  ;;  %s40_s26 = sshll.u32 %s9564_s2, 4  ;;  %s19_s23 = int_to_ptr.vmem [resolvable:$true] %s18_s23  ;;  %s41_s26 = int_to_ptr.hbm [resolvable:$true] %s40_s26 }
   0x7   :  { %21 = dma.hbm_to_vmem [thread:$0]  %s17_s19, 640, %s19_s23, [#allocation3]  }
   0x8   :  { %s9349_s1 = smov [#allocation7]  }
   0x9   :  { %s42_s27 = sshll.u32 %s9349_s1, 4  ;;  %s43_s27 = int_to_ptr.vmem [resolvable:$true] %s42_s27 }
   0xa   :  { %45 = dma.hbm_to_vmem [thread:$0]  %s41_s26, 336, %s43_s27, [#allocation6]  }
   0xb   :  { %9339 = dma.done.wait [#allocation3], 640  }
   0xc   :  { %9340 = vsyncadd [#allocation3], 4294966656 }
   0xd   :  { %9341 = dma.done.wait [#allocation6], 89040  }
   0xe   :  { %9342 = vsyncadd [#allocation6], 4294878256  ;;  %v6339_v0 = vld [vmem:[#allocation5 + $0x498] sm:$0xf]  ;;  %v8699_v1 = vld [vmem:[#allocation5 + $0x4e8] sm:$0xf0] }
   0xf   :  { %v7683_v2 = vld [vmem:[#allocation5 + $0xf18] sm:$0xf]  ;;  %v6340_v3 = vor.u32 %v8699_v1, %v6339_v0  ;;  %v9035_v4 = vld [vmem:[#allocation5 + $0xf68] sm:$0xf0]  ;;  %v6255_v11 = vld [vmem:[#allocation5 + $0x3f0] sm:$0xf] }
  0x10   :  { %v8355_v5 = vld [vmem:[#allocation5 + $0x1458] sm:$0xf]  ;;  %v9203_v6 = vld [vmem:[#allocation5 + $0x14a8] sm:$0xf0]  ;;  %v7684_v7 = vor.u32 %v9035_v4, %v7683_v2  ;;  %v8678_v13 = vld [vmem:[#allocation5 + $0x440] sm:$0xf0] }
  0x11   :  { %v8356_v8 = vor.u32 %v9203_v6, %v8355_v5  ;;  %v7011_v9 = vld [vmem:[#allocation5 + $0x9d8] sm:$0xf]  ;;  %v8867_v10 = vld [vmem:[#allocation5 + $0xa28] sm:$0xf0]  ;;  %4345 = vmatpush.bf16.msra.mxu0 %v6340_v3  ;;  %v7599_v14 = vld [vmem:[#allocation5 + $0xe70] sm:$0xf]  ;;  %v6256_v16 = vor.u32 %v8678_v13, %v6255_v11 }
  0x12   :  { %v7012_v12 = vor.u32 %v8867_v10, %v7011_v9  ;;  %v9014_v15 = vld [vmem:[#allocation5 + $0xec0] sm:$0xf0]  ;;  %4371 = vmatpush.bf16.msra.mxu2 %v7684_v7  ;;  %v8271_v18 = vld [vmem:[#allocation5 + $0x13b0] sm:$0xf]  ;;  %v6171_v23 = vld [vmem:[#allocation5 + $0x348] sm:$0xf] }
  0x13   :  { %4384 = vmatpush.bf16.msra.mxu3 %v8356_v8  ;;  %v7600_v17 = vor.u32 %v9014_v15, %v7599_v14  ;;  %v9182_v19 = vld [vmem:[#allocation5 + $0x1400] sm:$0xf0]  ;;  %v6927_v20 = vld [vmem:[#allocation5 + $0x930] sm:$0xf]  ;;  %v8657_v24 = vld [vmem:[#allocation5 + $0x398] sm:$0xf0] }
  0x14   :  { %4358 = vmatpush.bf16.msra.mxu1 %v7012_v12  ;;  %v8272_v21 = vor.u32 %v9182_v19, %v8271_v18  ;;  %v8846_v22 = vld [vmem:[#allocation5 + $0x980] sm:$0xf0]  ;;  %v7515_v26 = vld [vmem:[#allocation5 + $0xdc8] sm:$0xf]  ;;  %v8993_v27 = vld [vmem:[#allocation5 + $0xe18] sm:$0xf0]  ;;  %v6172_v29 = vor.u32 %v8657_v24, %v6171_v23 }
  0x15   :  { %v6928_v25 = vor.u32 %v8846_v22, %v6927_v20  ;;  %v8187_v28 = vld [vmem:[#allocation5 + $0x1308] sm:$0xf]  ;;  %4346 = vmatpush.bf16.msra.mxu0 %v6256_v16  ;;  %v9161_v30 = vld [vmem:[#allocation5 + $0x1358] sm:$0xf0]  ;;  %v7516_v33 = vor.u32 %v8993_v27, %v7515_v26  ;;  %v6087_v35 = vld [vmem:[#allocation5 + $0x2a0] sm:$0xf] }
  0x16   :  { %v6843_v31 = vld [vmem:[#allocation5 + $0x888] sm:$0xf]  ;;  %v8825_v32 = vld [vmem:[#allocation5 + $0x8d8] sm:$0xf0]  ;;  %4372 = vmatpush.bf16.msra.mxu2 %v7600_v17  ;;  %v8188_v34 = vor.u32 %v9161_v30, %v8187_v28  ;;  %v8636_v36 = vld [vmem:[#allocation5 + $0x2f0] sm:$0xf0] }
  0x17   :  { %4385 = vmatpush.bf16.msra.mxu3 %v8272_v21  ;;  %v7431_v37 = vld [vmem:[#allocation5 + $0xd20] sm:$0xf]  ;;  %v6844_v38 = vor.u32 %v8825_v32, %v6843_v31  ;;  %v8972_v39 = vld [vmem:[#allocation5 + $0xd70] sm:$0xf0]  ;;  %v6088_v44 = vor.u32 %v8636_v36, %v6087_v35  ;;  %v6003_v47 = vld [vmem:[#allocation5 + $0x1f8] sm:$0xf] }
  0x18   :  { %4359 = vmatpush.bf16.msra.mxu1 %v6928_v25  ;;  %v8103_v40 = vld [vmem:[#allocation5 + $0x1260] sm:$0xf]  ;;  %v9140_v41 = vld [vmem:[#allocation5 + $0x12b0] sm:$0xf0]  ;;  %v7432_v45 = vor.u32 %v8972_v39, %v7431_v37  ;;  %v8615_v48 = vld [vmem:[#allocation5 + $0x248] sm:$0xf0] }
  0x19   :  { %v6759_v42 = vld [vmem:[#allocation5 + $0x7e0] sm:$0xf]  ;;  %v8804_v43 = vld [vmem:[#allocation5 + $0x830] sm:$0xf0]  ;;  %4347 = vmatpush.bf16.msra.mxu0 %v6172_v29  ;;  %v8104_v46 = vor.u32 %v9140_v41, %v8103_v40  ;;  %v7347_v49 = vld [vmem:[#allocation5 + $0xc78] sm:$0xf]  ;;  %v6004_v56 = vor.u32 %v8615_v48, %v6003_v47 }
  0x1a   :  { %4373 = vmatpush.bf16.msra.mxu2 %v7516_v33  ;;  %v6760_v50 = vor.u32 %v8804_v43, %v6759_v42  ;;  %v8951_v51 = vld [vmem:[#allocation5 + $0xcc8] sm:$0xf0]  ;;  %v8019_v52 = vld [vmem:[#allocation5 + $0x11b8] sm:$0xf]  ;;  %v5919_v59 = vld [vmem:[#allocation5 + $0x150] sm:$0xf] }
  0x1b   :  { %4386 = vmatpush.bf16.msra.mxu3 %v8188_v34  ;;  %v9119_v53 = vld [vmem:[#allocation5 + $0x1208] sm:$0xf0]  ;;  %v6675_v54 = vld [vmem:[#allocation5 + $0x738] sm:$0xf]  ;;  %v7348_v57 = vor.u32 %v8951_v51, %v7347_v49  ;;  %v8594_v60 = vld [vmem:[#allocation5 + $0x1a0] sm:$0xf0] }
  0x1c   :  { %4360 = vmatpush.bf16.msra.mxu1 %v6844_v38  ;;  %v8783_v55 = vld [vmem:[#allocation5 + $0x788] sm:$0xf0]  ;;  %v8020_v58 = vor.u32 %v9119_v53, %v8019_v52  ;;  %v7263_v61 = vld [vmem:[#allocation5 + $0xbd0] sm:$0xf]  ;;  %v8930_v63 = vld [vmem:[#allocation5 + $0xc20] sm:$0xf0]  ;;  %v5920_v4 = vor.u32 %v8594_v60, %v5919_v59 }
  0x1d   :  { %4348 = vmatpush.bf16.msra.mxu0 %v6088_v44  ;;  %v6676_v62 = vor.u32 %v8783_v55, %v6675_v54  ;;  %v7935_v0 = vld [vmem:[#allocation5 + $0x1110] sm:$0xf]  ;;  %v9098_v1 = vld [vmem:[#allocation5 + $0x1160] sm:$0xf0]  ;;  %v7264_v5 = vor.u32 %v8930_v63, %v7263_v61  ;;  %v5835_v7 = vld [vmem:[#allocation5 + $0xa8] sm:$0xf] }
  0x1e   :  { %4374 = vmatpush.bf16.msra.mxu2 %v7432_v45  ;;  %v6591_v2 = vld [vmem:[#allocation5 + $0x690] sm:$0xf]  ;;  %v8762_v3 = vld [vmem:[#allocation5 + $0x6e0] sm:$0xf0]  ;;  %v7936_v6 = vor.u32 %v9098_v1, %v7935_v0  ;;  %v8573_v8 = vld [vmem:[#allocation5 + $0xf8] sm:$0xf0] }
  0x1f   :  { %4387 = vmatpush.bf16.msra.mxu3 %v8104_v46  ;;  %v7179_v9 = vld [vmem:[#allocation5 + $0xb28] sm:$0xf]  ;;  %v6592_v10 = vor.u32 %v8762_v3, %v6591_v2  ;;  %v8909_v11 = vld [vmem:[#allocation5 + $0xb78] sm:$0xf0]  ;;  %v5836_v16 = vor.u32 %v8573_v8, %v5835_v7  ;;  %v5751_v17 = vld [vmem:[#allocation5] sm:$0xf] }
  0x20   :  { %4361 = vmatpush.bf16.msra.mxu1 %v6760_v50  ;;  %v7851_v12 = vld [vmem:[#allocation5 + $0x1068] sm:$0xf]  ;;  %v9077_v13 = vld [vmem:[#allocation5 + $0x10b8] sm:$0xf0]  ;;  %v8552_v18 = vld [vmem:[#allocation5 + $0x50] sm:$0xf0]  ;;  %v7180_v19 = vor.u32 %v8909_v11, %v7179_v9 }
  0x21   :  { %4349 = vmatpush.bf16.msra.mxu0 %v6004_v56  ;;  %v6507_v14 = vld [vmem:[#allocation5 + $0x5e8] sm:$0xf]  ;;  %v8741_v15 = vld [vmem:[#allocation5 + $0x638] sm:$0xf0]  ;;  %v7852_v20 = vor.u32 %v9077_v13, %v7851_v12  ;;  %v7095_v21 = vld [vmem:[#allocation5 + $0xa80] sm:$0xf]  ;;  %v5752_v31 = vor.u32 %v8552_v18, %v5751_v17 }
  0x22   :  { %4375 = vmatpush.bf16.msra.mxu2 %v7348_v57  ;;  %v8888_v22 = vld [vmem:[#allocation5 + $0xad0] sm:$0xf0]  ;;  %v7767_v23 = vld [vmem:[#allocation5 + $0xfc0] sm:$0xf]  ;;  %v6508_v24 = vor.u32 %v8741_v15, %v6507_v14  ;;  %v8857_v26 = vld [vmem:[#allocation5 + $0x9dc] sm:$0xf] }
  0x23   :  { %4388 = vmatpush.bf16.msra.mxu3 %v8020_v58  ;;  %v9056_v25 = vld [vmem:[#allocation5 + $0x1010] sm:$0xf0]  ;;  %v7013_v27 = vld [vmem:[#allocation5 + $0xa2c] sm:$0xf0]  ;;  %v9025_v28 = vld [vmem:[#allocation5 + $0xf1c] sm:$0xf]  ;;  %v7096_v35 = vor.u32 %v8888_v22, %v7095_v21 }
  0x24   :  { %4362 = vmatpush.bf16.msra.mxu1 %v6676_v62  ;;  %v7685_v29 = vld [vmem:[#allocation5 + $0xf6c] sm:$0xf0]  ;;  %v6423_v30 = vld [vmem:[#allocation5 + $0x540] sm:$0xf]  ;;  %v8720_v32 = vld [vmem:[#allocation5 + $0x590] sm:$0xf0]  ;;  %v7768_v36 = vor.u32 %v9056_v25, %v7767_v23  ;;  %v7016_v40 = vor.u32 %v8857_v26, %v7013_v27 }
  0x25   :  { %4350 = vmatpush.bf16.msra.mxu0 %v5920_v4  ;;  %v59_v33 = vld [vmem:[#allocation2] sm:$0x3f]  ;;  %v61_v34 = vld [vmem:[#allocation2 + $0x10] sm:$0x3f]  ;;  %v8439_v37 = vld [vmem:[#allocation5 + $0x1500] sm:$0xf]  ;;  %v7688_v41 = vor.u32 %v9025_v28, %v7685_v29  ;;  %v6424_v45 = vor.u32 %v8720_v32, %v6423_v30 }
  0x26   :  { %4376 = vmatpush.bf16.msra.mxu2 %v7264_v5  ;;  %v9224_v38 = vld [vmem:[#allocation5 + $0x1550] sm:$0xf0]  ;;  %v8689_v39 = vld [vmem:[#allocation5 + $0x49c] sm:$0xf]  ;;  %v6341_v42 = vld [vmem:[#allocation5 + $0x4ec] sm:$0xf0]  ;;  %v9380_v46 = vpack.c.bf16 %v59_v33, %v59_v33  ;;  %v9382_v50 = vpack.c.bf16 %v61_v34, %v61_v34 }
  0x27   :  { %4389 = vmatpush.bf16.msra.mxu3 %v7936_v6  ;;  %v9193_v43 = vld [vmem:[#allocation5 + $0x145c] sm:$0xf]  ;;  %v8357_v44 = vld [vmem:[#allocation5 + $0x14ac] sm:$0xf0]  ;;  %v8836_v48 = vld [vmem:[#allocation5 + $0x934] sm:$0xf]  ;;  %v8440_v51 = vor.u32 %v9224_v38, %v8439_v37  ;;  %v6344_v55 = vor.u32 %v8689_v39, %v6341_v42 }
  0x28   :  { %4363 = vmatpush.bf16.msra.mxu1 %v6592_v10  ;;  %v62_v47 = vld [vmem:[#allocation2 + $0x18] sm:$0x3f]  ;;  %v6929_v49 = vld [vmem:[#allocation5 + $0x984] sm:$0xf0]  ;;  %v60_v54 = vld [vmem:[#allocation2 + $0x8] sm:$0x3f]  ;;  %v8360_v56 = vor.u32 %v9193_v43, %v8357_v44 }
  0x29   :  { %4351 = vmatpush.bf16.msra.mxu0 %v5836_v16  ;;  %v9004_v52 = vld [vmem:[#allocation5 + $0xe74] sm:$0xf]  ;;  %v7601_v53 = vld [vmem:[#allocation5 + $0xec4] sm:$0xf0]  ;;  %v9384_v58 = vpack.c.bf16 %v62_v47, %v62_v47  ;;  %v6932_v59 = vor.u32 %v8836_v48, %v6929_v49  ;;  %v9387_v0 = vpack.c.bf16 %v60_v54, %v60_v54  ;;  %v8815_v1 = vld [vmem:[#allocation5 + $0x88c] sm:$0xf] }
  0x2a   :  { %4377 = vmatpush.bf16.msra.mxu2 %v7180_v19  ;;  %v8668_v57 = vld [vmem:[#allocation5 + $0x3f4] sm:$0xf]  ;;  %v6257_v60 = vld [vmem:[#allocation5 + $0x444] sm:$0xf0]  ;;  %v7604_v63 = vor.u32 %v9004_v52, %v7601_v53  ;;  %v6845_v2 = vld [vmem:[#allocation5 + $0x8dc] sm:$0xf0] }
  0x2b   :  { %4390 = vmatpush.bf16.msra.mxu3 %v7852_v20  ;;  %v9172_v61 = vld [vmem:[#allocation5 + $0x13b4] sm:$0xf]  ;;  %v8273_v62 = vld [vmem:[#allocation5 + $0x1404] sm:$0xf0]  ;;  %v8983_v3 = vld [vmem:[#allocation5 + $0xdcc] sm:$0xf]  ;;  %v6260_v5 = vor.u32 %v8668_v57, %v6257_v60  ;;  %v6848_v8 = vor.u32 %v8815_v1, %v6845_v2 }
  0x2c   :  { %4364 = vmatpush.bf16.msra.mxu1 %v6508_v24  ;;  %v7517_v4 = vld [vmem:[#allocation5 + $0xe1c] sm:$0xf0]  ;;  %v8276_v6 = vor.u32 %v9172_v61, %v8273_v62  ;;  %v8647_v7 = vld [vmem:[#allocation5 + $0x34c] sm:$0xf]  ;;  %v8794_v13 = vld [vmem:[#allocation5 + $0x7e4] sm:$0xf] }
  0x2d   :  { %4352 = vmatpush.bf16.msra.mxu0 %v5752_v31  ;;  %v6173_v9 = vld [vmem:[#allocation5 + $0x39c] sm:$0xf0]  ;;  %v9151_v10 = vld [vmem:[#allocation5 + $0x130c] sm:$0xf]  ;;  %v7520_v12 = vor.u32 %v8983_v3, %v7517_v4  ;;  %v6761_v14 = vld [vmem:[#allocation5 + $0x834] sm:$0xf0] }
  0x2e   :  { %4378 = vmatpush.bf16.msra.mxu2 %v7096_v35  ;;  %v8189_v11 = vld [vmem:[#allocation5 + $0x135c] sm:$0xf0]  ;;  %v8962_v15 = vld [vmem:[#allocation5 + $0xd24] sm:$0xf]  ;;  %v7433_v16 = vld [vmem:[#allocation5 + $0xd74] sm:$0xf0]  ;;  %v6176_v17 = vor.u32 %v8647_v7, %v6173_v9  ;;  %v6764_v20 = vor.u32 %v8794_v13, %v6761_v14 }
  0x2f   :  { %4391 = vmatpush.bf16.msra.mxu3 %v7768_v36  ;;  %v8192_v18 = vor.u32 %v9151_v10, %v8189_v11  ;;  %v8626_v19 = vld [vmem:[#allocation5 + $0x2a4] sm:$0xf]  ;;  %v6089_v21 = vld [vmem:[#allocation5 + $0x2f4] sm:$0xf0]  ;;  %v7436_v24 = vor.u32 %v8962_v15, %v7433_v16  ;;  %v8773_v25 = vld [vmem:[#allocation5 + $0x73c] sm:$0xf] }
  0x30   :  { %4365 = vmatpush.bf16.msra.mxu1 %v6424_v45  ;;  %4353 = vmatmul.bf16.vlgmr.msra.gmra.mxu0 %v9380_v46  ;;  %v9130_v22 = vld [vmem:[#allocation5 + $0x1264] sm:$0xf]  ;;  %v8105_v23 = vld [vmem:[#allocation5 + $0x12b4] sm:$0xf0]  ;;  %v6677_v26 = vld [vmem:[#allocation5 + $0x78c] sm:$0xf0]  ;;  %v6092_v30 = vor.u32 %v8626_v19, %v6089_v21 }
  0x31   :  { %4379 = vmatmul.bf16.vlgmr.msra.gmra.mxu2 %v9382_v50  ;;  %4404 = vmatpush.bf16.msrb.mxu0 %v8440_v51  ;;  %v8941_v27 = vld [vmem:[#allocation5 + $0xc7c] sm:$0xf]  ;;  %v7349_v28 = vld [vmem:[#allocation5 + $0xccc] sm:$0xf0]  ;;  %v8108_v31 = vor.u32 %v9130_v22, %v8105_v23  ;;  %v6680_v33 = vor.u32 %v8773_v25, %v6677_v26  ;;  %v8752_v39 = vld [vmem:[#allocation5 + $0x694] sm:$0xf] }
  0x32   :  { %4423 = vmatpush.bf16.msrb.mxu2 %v7016_v40  ;;  %4392 = vmatmul.bf16.vlgmr.msra.gmra.mxu3 %v9384_v58  ;;  %v63_v29 = vld [vmem:[#allocation2 + $0x20] sm:$0x3f]  ;;  %v6005_v34 = vld [vmem:[#allocation5 + $0x24c] sm:$0xf0]  ;;  %v7352_v37 = vor.u32 %v8941_v27, %v7349_v28  ;;  %v6593_v40 = vld [vmem:[#allocation5 + $0x6e4] sm:$0xf0] }
  0x33   :  { %4436 = vmatpush.bf16.msrb.mxu3 %v7688_v41  ;;  %4366 = vmatmul.bf16.vlgmr.msra.gmra.mxu1 %v9387_v0  ;;  %v8605_v32 = vld [vmem:[#allocation5 + $0x1fc] sm:$0xf]  ;;  %v8021_v36 = vld [vmem:[#allocation5 + $0x120c] sm:$0xf0]  ;;  %v9392_v38 = vpack.c.bf16 %v63_v29, %v63_v29  ;;  %vm4341_vm0 = vcmask 130048   ;;  %v6596_v47 = vor.u32 %v8752_v39, %v6593_v40  ;;  %s9350_s0 = smov [#allocation8]  }
  0x34   :  { %4410 = vmatpush.bf16.msrb.mxu1 %v6344_v55  ;;  %v9109_v35 = vld [vmem:[#allocation5 + $0x11bc] sm:$0xf]  ;;  %v8920_v41 = vld [vmem:[#allocation5 + $0xbd4] sm:$0xf]  ;;  %v7265_v42 = vld [vmem:[#allocation5 + $0xc24] sm:$0xf0]  ;;  %v6008_v43 = vor.u32 %v8605_v32, %v6005_v34 }
  0x35   :  { %4449 = vmatpush.bf16.msra.mxu0 %v8360_v56  ;;  %v8024_v44 = vor.u32 %v9109_v35, %v8021_v36  ;;  %v8584_v45 = vld [vmem:[#allocation5 + $0x154] sm:$0xf]  ;;  %v5921_v48 = vld [vmem:[#allocation5 + $0x1a4] sm:$0xf0]  ;;  %v7268_v52 = vor.u32 %v8920_v41, %v7265_v42  ;;  %v8731_v53 = vld [vmem:[#allocation5 + $0x5ec] sm:$0xf] }
  0x36   :  { %4424 = vmatpush.bf16.msrb.mxu2 %v6932_v59  ;;  %v9088_v49 = vld [vmem:[#allocation5 + $0x1114] sm:$0xf]  ;;  %v7937_v51 = vld [vmem:[#allocation5 + $0x1164] sm:$0xf0]  ;;  %v6509_v54 = vld [vmem:[#allocation5 + $0x63c] sm:$0xf0]  ;;  %v5924_v57 = vor.u32 %v8584_v45, %v5921_v48 }
  0x37   :  { %4437 = vmatpush.bf16.msrb.mxu3 %v7604_v63  ;;  %v8899_v55 = vld [vmem:[#allocation5 + $0xb2c] sm:$0xf]  ;;  %v7181_v56 = vld [vmem:[#allocation5 + $0xb7c] sm:$0xf0]  ;;  %v7940_v59 = vor.u32 %v9088_v49, %v7937_v51  ;;  %v6512_v62 = vor.u32 %v8731_v53, %v6509_v54  ;;  %v8710_v2 = vld [vmem:[#allocation5 + $0x544] sm:$0xf] }
  0x38   :  { %4411 = vmatpush.bf16.msrb.mxu1 %v6260_v5  ;;  %v8563_v60 = vld [vmem:[#allocation5 + $0xac] sm:$0xf]  ;;  %v5837_v61 = vld [vmem:[#allocation5 + $0xfc] sm:$0xf0]  ;;  %v7184_v3 = vor.u32 %v8899_v55, %v7181_v56  ;;  %v6425_v4 = vld [vmem:[#allocation5 + $0x594] sm:$0xf0] }
  0x39   :  { %4450 = vmatpush.bf16.msra.mxu0 %v8276_v6  ;;  %v9067_v63 = vld [vmem:[#allocation5 + $0x106c] sm:$0xf]  ;;  %v7853_v1 = vld [vmem:[#allocation5 + $0x10bc] sm:$0xf0]  ;;  %v8878_v5 = vld [vmem:[#allocation5 + $0xa84] sm:$0xf]  ;;  %v5840_v10 = vor.u32 %v8563_v60, %v5837_v61  ;;  %v6428_v15 = vor.u32 %v8710_v2, %v6425_v4 }
  0x3a   :  { %4425 = vmatpush.bf16.msrb.mxu2 %v6848_v8  ;;  %v7097_v6 = vld [vmem:[#allocation5 + $0xad4] sm:$0xf0]  ;;  %v6347_v7 = vld [vmem:[#allocation5 + $0x4a0] sm:$0xf]  ;;  %v8700_v8 = vld [vmem:[#allocation5 + $0x4f0] sm:$0xf0]  ;;  %v7856_v11 = vor.u32 %v9067_v63, %v7853_v1 }
  0x3b   :  { %4438 = vmatpush.bf16.msrb.mxu3 %v7520_v12  ;;  %v7019_v9 = vld [vmem:[#allocation5 + $0x9e0] sm:$0xf]  ;;  %v8868_v12 = vld [vmem:[#allocation5 + $0xa30] sm:$0xf0]  ;;  %v8542_v13 = vld [vmem:[#allocation5 + $0x4] sm:$0xf]  ;;  %v7100_v19 = vor.u32 %v8878_v5, %v7097_v6 }
  0x3c   :  { %4412 = vmatpush.bf16.msrb.mxu1 %v6176_v17  ;;  %v5753_v14 = vld [vmem:[#allocation5 + $0x54] sm:$0xf0]  ;;  %v9046_v16 = vld [vmem:[#allocation5 + $0xfc4] sm:$0xf]  ;;  %v9036_v21 = vld [vmem:[#allocation5 + $0xf70] sm:$0xf0] }
  0x3d   :  { %4451 = vmatpush.bf16.msra.mxu0 %v8192_v18  ;;  %v7769_v17 = vld [vmem:[#allocation5 + $0x1014] sm:$0xf0]  ;;  %v7691_v18 = vld [vmem:[#allocation5 + $0xf20] sm:$0xf]  ;;  %v9214_v22 = vld [vmem:[#allocation5 + $0x1504] sm:$0xf]  ;;  %v5756_v27 = vor.u32 %v8542_v13, %v5753_v14 }
  0x3e   :  { %4426 = vmatpush.bf16.msrb.mxu2 %v6764_v20  ;;  %v6348_v20 = vor.u32 %v8700_v8, %v6347_v7  ;;  %v8441_v23 = vld [vmem:[#allocation5 + $0x1554] sm:$0xf0]  ;;  %v8679_v26 = vld [vmem:[#allocation5 + $0x448] sm:$0xf0]  ;;  %v7772_v28 = vor.u32 %v9046_v16, %v7769_v17  ;;  %v9204_v34 = vld [vmem:[#allocation5 + $0x14b0] sm:$0xf0] }
  0x3f   :  { %4439 = vmatpush.bf16.msrb.mxu3 %v7436_v24  ;;  %v7020_v24 = vor.u32 %v8868_v12, %v7019_v9  ;;  %v6263_v25 = vld [vmem:[#allocation5 + $0x3f8] sm:$0xf]  ;;  %v8444_v32 = vor.u32 %v9214_v22, %v8441_v23  ;;  %v6179_v40 = vld [vmem:[#allocation5 + $0x350] sm:$0xf]  ;;  %v8658_v41 = vld [vmem:[#allocation5 + $0x3a0] sm:$0xf0] }
  0x40   :  { %4413 = vmatpush.bf16.msrb.mxu1 %v6092_v30  ;;  %8521 = vmatmul.msk.bf16.vlgmr.msrb.gmra.mxu0 %vm4341_vm0, %v9392_v38  ;;  %v6935_v29 = vld [vmem:[#allocation5 + $0x938] sm:$0xf]  ;;  %v8847_v30 = vld [vmem:[#allocation5 + $0x988] sm:$0xf0]  ;;  %v6264_v35 = vor.u32 %v8679_v26, %v6263_v25  ;;  %v6180_v49 = vor.u32 %v8658_v41, %v6179_v40  ;;  %v7523_v51 = vld [vmem:[#allocation5 + $0xdd0] sm:$0xf] }
  0x41   :  { %4452 = vmatpush.bf16.msra.mxu0 %v8108_v31  ;;  %v7692_v31 = vor.u32 %v9036_v21, %v7691_v18  ;;  %v7607_v36 = vld [vmem:[#allocation5 + $0xe78] sm:$0xf]  ;;  %v6936_v39 = vor.u32 %v8847_v30, %v6935_v29  ;;  %v9183_v48 = vld [vmem:[#allocation5 + $0x1408] sm:$0xf0]  ;;  %v6095_v54 = vld [vmem:[#allocation5 + $0x2a8] sm:$0xf] }
  0x42   :  { %4427 = vmatpush.bf16.msrb.mxu2 %v6680_v33  ;;  %v8363_v33 = vld [vmem:[#allocation5 + $0x1460] sm:$0xf]  ;;  %v8637_v55 = vld [vmem:[#allocation5 + $0x2f8] sm:$0xf0]  ;;  %v8195_v61 = vld [vmem:[#allocation5 + $0x1310] sm:$0xf] }
  0x43   :  { %4440 = vmatpush.bf16.msrb.mxu3 %v7352_v37  ;;  %v9015_v37 = vld [vmem:[#allocation5 + $0xec8] sm:$0xf0]  ;;  %v8364_v42 = vor.u32 %v9204_v34, %v8363_v33  ;;  %v6096_v63 = vor.u32 %v8637_v55, %v6095_v54  ;;  %v7439_v1 = vld [vmem:[#allocation5 + $0xd28] sm:$0xf]  ;;  %v8973_v2 = vld [vmem:[#allocation5 + $0xd78] sm:$0xf0] }
  0x44   :  { %4414 = vmatpush.bf16.msrb.mxu1 %v6008_v43  ;;  %v6851_v43 = vld [vmem:[#allocation5 + $0x890] sm:$0xf]  ;;  %v7608_v45 = vor.u32 %v9015_v37, %v7607_v36  ;;  %v6011_v4 = vld [vmem:[#allocation5 + $0x200] sm:$0xf]  ;;  %v8616_v5 = vld [vmem:[#allocation5 + $0x250] sm:$0xf0]  ;;  %v7440_v9 = vor.u32 %v8973_v2, %v7439_v1 }
  0x45   :  { %4453 = vmatpush.bf16.msra.mxu0 %v8024_v44  ;;  %v8826_v44 = vld [vmem:[#allocation5 + $0x8e0] sm:$0xf0]  ;;  %v6683_v7 = vld [vmem:[#allocation5 + $0x740] sm:$0xf]  ;;  %v8784_v8 = vld [vmem:[#allocation5 + $0x790] sm:$0xf0]  ;;  %v6012_v12 = vor.u32 %v8616_v5, %v6011_v4 }
  0x46   :  { %4428 = vmatpush.bf16.msrb.mxu2 %v6596_v47  ;;  %v8279_v47 = vld [vmem:[#allocation5 + $0x13b8] sm:$0xf]  ;;  %v6852_v53 = vor.u32 %v8826_v44, %v6851_v43  ;;  %v7355_v13 = vld [vmem:[#allocation5 + $0xc80] sm:$0xf]  ;;  %v8952_v14 = vld [vmem:[#allocation5 + $0xcd0] sm:$0xf0] }
  0x47   :  { %4441 = vmatpush.bf16.msrb.mxu3 %v7268_v52  ;;  %v8994_v52 = vld [vmem:[#allocation5 + $0xe20] sm:$0xf0]  ;;  %v8280_v56 = vor.u32 %v9183_v48, %v8279_v47  ;;  %v5927_v16 = vld [vmem:[#allocation5 + $0x158] sm:$0xf]  ;;  %v8595_v17 = vld [vmem:[#allocation5 + $0x1a8] sm:$0xf0]  ;;  %v7356_v21 = vor.u32 %v8952_v14, %v7355_v13 }
  0x48   :  { %4415 = vmatpush.bf16.msrb.mxu1 %v5924_v57  ;;  %v6767_v57 = vld [vmem:[#allocation5 + $0x7e8] sm:$0xf]  ;;  %v7524_v60 = vor.u32 %v8994_v52, %v7523_v51  ;;  %v8027_v22 = vld [vmem:[#allocation5 + $0x11c0] sm:$0xf]  ;;  %v9120_v23 = vld [vmem:[#allocation5 + $0x1210] sm:$0xf0] }
  0x49   :  { %4454 = vmatpush.bf16.msra.mxu0 %v7940_v59  ;;  %v8805_v59 = vld [vmem:[#allocation5 + $0x838] sm:$0xf0]  ;;  %v7271_v25 = vld [vmem:[#allocation5 + $0xbd8] sm:$0xf]  ;;  %v8931_v26 = vld [vmem:[#allocation5 + $0xc28] sm:$0xf0]  ;;  %v8028_v30 = vor.u32 %v9120_v23, %v8027_v22 }
  0x4a   :  { %4429 = vmatpush.bf16.msrb.mxu2 %v6512_v62  ;;  %v9162_v62 = vld [vmem:[#allocation5 + $0x1360] sm:$0xf0]  ;;  %v7272_v33 = vor.u32 %v8931_v26, %v7271_v25  ;;  %v7943_v34 = vld [vmem:[#allocation5 + $0x1118] sm:$0xf]  ;;  %v7187_v37 = vld [vmem:[#allocation5 + $0xb30] sm:$0xf] }
  0x4b   :  { %4442 = vmatpush.bf16.msrb.mxu3 %v7184_v3  ;;  %v6768_v3 = vor.u32 %v8805_v59, %v6767_v57  ;;  %v8196_v6 = vor.u32 %v9162_v62, %v8195_v61  ;;  %v8574_v29 = vld [vmem:[#allocation5 + $0x100] sm:$0xf0]  ;;  %v5759_v40 = vld [vmem:[#allocation5 + $0x8] sm:$0xf]  ;;  %v8721_v44 = vld [vmem:[#allocation5 + $0x598] sm:$0xf0] }
  0x4c   :  { %4416 = vmatpush.bf16.msrb.mxu1 %v5840_v10  ;;  %v8111_v10 = vld [vmem:[#allocation5 + $0x1268] sm:$0xf]  ;;  %v7859_v47 = vld [vmem:[#allocation5 + $0x1070] sm:$0xf]  ;;  %v9078_v52 = vld [vmem:[#allocation5 + $0x10c0] sm:$0xf0] }
  0x4d   :  { %4455 = vmatpush.bf16.msra.mxu0 %v7856_v11  ;;  %v9141_v11 = vld [vmem:[#allocation5 + $0x12b8] sm:$0xf0]  ;;  %v6431_v43 = vld [vmem:[#allocation5 + $0x548] sm:$0xf]  ;;  %v6349_v54 = vld [vmem:[#allocation5 + $0x4f4] sm:$0xf0]  ;;  %v7860_v2 = vor.u32 %v9078_v52, %v7859_v47 }
  0x4e   :  { %4430 = vmatpush.bf16.msrb.mxu2 %v6428_v15  ;;  %v6684_v15 = vor.u32 %v8784_v8, %v6683_v7  ;;  %v8112_v18 = vor.u32 %v9141_v11, %v8111_v10  ;;  %v8447_v48 = vld [vmem:[#allocation5 + $0x1508] sm:$0xf]  ;;  %v8889_v57 = vld [vmem:[#allocation5 + $0xad8] sm:$0xf0]  ;;  %v8858_v59 = vld [vmem:[#allocation5 + $0x9e4] sm:$0xf] }
  0x4f   :  { %4443 = vmatpush.bf16.msrb.mxu3 %v7100_v19  ;;  %v6599_v19 = vld [vmem:[#allocation5 + $0x698] sm:$0xf]  ;;  %v7775_v4 = vld [vmem:[#allocation5 + $0xfc8] sm:$0xf]  ;;  %v8669_v7 = vld [vmem:[#allocation5 + $0x3fc] sm:$0xf] }
  0x50   :  { %4417 = vmatpush.bf16.msrb.mxu1 %v5756_v27  ;;  %v7021_v62 = vld [vmem:[#allocation5 + $0xa34] sm:$0xf0]  ;;  %v6265_v8 = vld [vmem:[#allocation5 + $0x44c] sm:$0xf0]  ;;  %v9026_v11 = vld [vmem:[#allocation5 + $0xf24] sm:$0xf] }
  0x51   :  { %4456 = vmatpush.bf16.msra.mxu0 %v7772_v28  ;;  %4431 = vmatmul.bf16.vlgmr.msrb.gmra.mxu2 %v9387_v0  ;;  %v5843_v28 = vld [vmem:[#allocation5 + $0xb0] sm:$0xf]  ;;  %v8365_v1 = vld [vmem:[#allocation5 + $0x14b4] sm:$0xf0]  ;;  %v8837_v13 = vld [vmem:[#allocation5 + $0x93c] sm:$0xf] }
  0x52   :  { %4475 = vmatpush.bf16.msra.mxu2 %v6348_v20  ;;  %4444 = vmatmul.bf16.vlgmr.msrb.gmra.mxu3 %v9382_v50  ;;  %v8763_v20 = vld [vmem:[#allocation5 + $0x6e8] sm:$0xf0]  ;;  %v5844_v36 = vor.u32 %v8574_v29, %v5843_v28  ;;  %v6937_v14 = vld [vmem:[#allocation5 + $0x98c] sm:$0xf0]  ;;  %v8816_v26 = vld [vmem:[#allocation5 + $0x894] sm:$0xf] }
  0x53   :  { %4488 = vmatpush.bf16.msra.mxu3 %v7020_v24  ;;  %4418 = vmatmul.bf16.vlgmr.msrb.gmra.mxu1 %v9380_v46  ;;  %v5928_v24 = vor.u32 %v8595_v17, %v5927_v16  ;;  %v6600_v27 = vor.u32 %v8763_v20, %v6599_v19  ;;  %v8281_v16 = vld [vmem:[#allocation5 + $0x140c] sm:$0xf0]  ;;  %v8648_v20 = vld [vmem:[#allocation5 + $0x354] sm:$0xf]  ;;  %v6940_v22 = vor.u32 %v8837_v13, %v6937_v14  ;;  %v8197_v29 = vld [vmem:[#allocation5 + $0x1364] sm:$0xf0] }
  0x54   :  { %4469 = vmatpush.bf16.msra.mxu1 %v8444_v32  ;;  %4457 = vmatmul.bf16.vlgmr.msra.gmra.mxu0 %v9384_v58  ;;  %v8742_v32 = vld [vmem:[#allocation5 + $0x640] sm:$0xf0]  ;;  %v7609_v25 = vld [vmem:[#allocation5 + $0xecc] sm:$0xf0]  ;;  %v9152_v28 = vld [vmem:[#allocation5 + $0x1314] sm:$0xf] }
  0x55   :  { %4501 = vmatpush.bf16.msrb.mxu0 %v7692_v31  ;;  %v6515_v31 = vld [vmem:[#allocation5 + $0x5f0] sm:$0xf]  ;;  %v6013_v47 = vld [vmem:[#allocation5 + $0x254] sm:$0xf0]  ;;  %v7441_v52 = vld [vmem:[#allocation5 + $0xd7c] sm:$0xf0] }
  0x56   :  { %4476 = vmatpush.bf16.msra.mxu2 %v6264_v35  ;;  %v9099_v35 = vld [vmem:[#allocation5 + $0x1168] sm:$0xf0]  ;;  %v6516_v41 = vor.u32 %v8742_v32, %v6515_v31  ;;  %v8921_v13 = vld [vmem:[#allocation5 + $0xbdc] sm:$0xf]  ;;  %v7273_v14 = vld [vmem:[#allocation5 + $0xc2c] sm:$0xf0] }
  0x57   :  { %4489 = vmatpush.bf16.msra.mxu3 %v6936_v39  ;;  %v8910_v39 = vld [vmem:[#allocation5 + $0xb80] sm:$0xf0]  ;;  %v8627_v32 = vld [vmem:[#allocation5 + $0x2ac] sm:$0xf]  ;;  %s5736_s2 = sshll.u32 %s9350_s0, 4  ;;  %s5738_s30 = sshll.u32 %s9565_s3, 4  ;;  %s5737_s2 = int_to_ptr.vmem [resolvable:$true] %s5736_s2  ;;  %s5739_s30 = int_to_ptr.hbm [resolvable:$true] %s5738_s30 }
  0x58   :  { %4514 = vmatpush.bf16.msrb.mxu1 %v8364_v42  ;;  %v8553_v42 = vld [vmem:[#allocation5 + $0x58] sm:$0xf0]  ;;  %v7188_v51 = vor.u32 %v8910_v39, %v7187_v37  ;;  %v7525_v37 = vld [vmem:[#allocation5 + $0xe24] sm:$0xf0]  ;;  %v8795_v39 = vld [vmem:[#allocation5 + $0x7ec] sm:$0xf] }
  0x59   :  { %4502 = vmatpush.bf16.msrb.mxu0 %v7608_v45  ;;  %v7944_v45 = vor.u32 %v9099_v35, %v7943_v34  ;;  %v5760_v55 = vor.u32 %v8553_v42, %v5759_v40  ;;  %v8200_v35 = vor.u32 %v9152_v28, %v8197_v29  ;;  %v6769_v40 = vld [vmem:[#allocation5 + $0x83c] sm:$0xf0]  ;;  %v9215_v28 = vld [vmem:[#allocation5 + $0x150c] sm:$0xf] }
  0x5a   :  { %4477 = vmatpush.bf16.msra.mxu2 %v6180_v49  ;;  %v9225_v49 = vld [vmem:[#allocation5 + $0x1558] sm:$0xf0]  ;;  %v8113_v42 = vld [vmem:[#allocation5 + $0x12bc] sm:$0xf0] }
  0x5b   :  { %4490 = vmatpush.bf16.msra.mxu3 %v6852_v53  ;;  %v8690_v53 = vld [vmem:[#allocation5 + $0x4a4] sm:$0xf]  ;;  %v8448_v61 = vor.u32 %v9225_v49, %v8447_v48  ;;  %v6772_v48 = vor.u32 %v8795_v39, %v6769_v40  ;;  %v8449_v29 = vld [vmem:[#allocation5 + $0x155c] sm:$0xf0]  ;;  %v9037_v40 = vld [vmem:[#allocation5 + $0xf78] sm:$0xf0] }
  0x5c   :  { %4515 = vmatpush.bf16.msrb.mxu1 %v8280_v56  ;;  %v7103_v56 = vld [vmem:[#allocation5 + $0xa88] sm:$0xf]  ;;  %v8452_v39 = vor.u32 %v9215_v28, %v8449_v29 }
  0x5d   :  { %4503 = vmatpush.bf16.msrb.mxu0 %v7524_v60  ;;  %v6432_v60 = vor.u32 %v8721_v44, %v6431_v43  ;;  %v7104_v5 = vor.u32 %v8889_v57, %v7103_v56  ;;  %v8029_v56 = vld [vmem:[#allocation5 + $0x1214] sm:$0xf0]  ;;  %v6019_v29 = vld [vmem:[#allocation5 + $0x208] sm:$0xf] }
  0x5e   :  { %4478 = vmatpush.bf16.msra.mxu2 %v6096_v63  ;;  %v9194_v63 = vld [vmem:[#allocation5 + $0x1464] sm:$0xf] }
  0x5f   :  { %4491 = vmatpush.bf16.msra.mxu3 %v6768_v3  ;;  %v6352_v3 = vor.u32 %v8690_v53, %v6349_v54  ;;  %v8368_v10 = vor.u32 %v9194_v63, %v8365_v1  ;;  %v8774_v53 = vld [vmem:[#allocation5 + $0x744] sm:$0xf]  ;;  %v6685_v54 = vld [vmem:[#allocation5 + $0x794] sm:$0xf0] }
  0x60   :  { %4516 = vmatpush.bf16.msrb.mxu1 %v8196_v6  ;;  %v9057_v6 = vld [vmem:[#allocation5 + $0x1018] sm:$0xf0]  ;;  %v8942_v1 = vld [vmem:[#allocation5 + $0xc84] sm:$0xf] }
  0x61   :  { %4504 = vmatpush.bf16.msrb.mxu0 %v7440_v9  ;;  %v7024_v9 = vor.u32 %v8858_v59, %v7021_v62  ;;  %v7776_v17 = vor.u32 %v9057_v6, %v7775_v4  ;;  %v6688_v62 = vor.u32 %v8774_v53, %v6685_v54  ;;  %v6601_v4 = vld [vmem:[#allocation5 + $0x6ec] sm:$0xf0]  ;;  %v6271_v54 = vld [vmem:[#allocation5 + $0x400] sm:$0xf] }
  0x62   :  { %4479 = vmatpush.bf16.msra.mxu2 %v6012_v12  ;;  %v7693_v12 = vld [vmem:[#allocation5 + $0xf74] sm:$0xf0]  ;;  %v7945_v6 = vld [vmem:[#allocation5 + $0x116c] sm:$0xf0] }
  0x63   :  { %4492 = vmatpush.bf16.msra.mxu3 %v6684_v15  ;;  %8522 = vmatmul.msk.bf16.vlgmr.msra.gmra.mxu1 %vm4341_vm0, %v9392_v38  ;;  %v9173_v15 = vld [vmem:[#allocation5 + $0x13bc] sm:$0xf]  ;;  %v7696_v19 = vor.u32 %v9026_v11, %v7693_v12 }
  0x64   :  { %4517 = vmatpush.bf16.msrb.mxu1 %v8112_v18  ;;  %v6268_v18 = vor.u32 %v8669_v7, %v6265_v8  ;;  %v8284_v23 = vor.u32 %v9173_v15, %v8281_v16  ;;  %v8732_v15 = vld [vmem:[#allocation5 + $0x5f4] sm:$0xf]  ;;  %v6517_v16 = vld [vmem:[#allocation5 + $0x644] sm:$0xf0] }
  0x65   :  { %4505 = vmatpush.bf16.msrb.mxu0 %v7356_v21  ;;  %v6181_v21 = vld [vmem:[#allocation5 + $0x3a4] sm:$0xf0] }
  0x66   :  { %4480 = vmatpush.bf16.msra.mxu2 %v5928_v24  ;;  %v9005_v24 = vld [vmem:[#allocation5 + $0xe7c] sm:$0xf] }
  0x67   :  { %4493 = vmatpush.bf16.msra.mxu3 %v6600_v27  ;;  %v6853_v27 = vld [vmem:[#allocation5 + $0x8e4] sm:$0xf0]  ;;  %v7612_v31 = vor.u32 %v9005_v24, %v7609_v25  ;;  %v6520_v25 = vor.u32 %v8732_v15, %v6517_v16 }
  0x68   :  { %4518 = vmatpush.bf16.msrb.mxu1 %v8028_v30  ;;  %v6184_v30 = vor.u32 %v8648_v20, %v6181_v21  ;;  %v6856_v34 = vor.u32 %v8816_v26, %v6853_v27  ;;  %v8543_v20 = vld [vmem:[#allocation5 + $0xc] sm:$0xf]  ;;  %v7276_v21 = vor.u32 %v8921_v13, %v7273_v14  ;;  %v7189_v24 = vld [vmem:[#allocation5 + $0xb84] sm:$0xf0]  ;;  %v6859_v13 = vld [vmem:[#allocation5 + $0x898] sm:$0xf] }
  0x69   :  { %4506 = vmatpush.bf16.msrb.mxu0 %v7272_v33  ;;  %v6097_v33 = vld [vmem:[#allocation5 + $0x2fc] sm:$0xf0]  ;;  %v8711_v27 = vld [vmem:[#allocation5 + $0x54c] sm:$0xf] }
  0x6a   :  { %4481 = vmatpush.bf16.msra.mxu2 %v5844_v36  ;;  %v8984_v36 = vld [vmem:[#allocation5 + $0xdd4] sm:$0xf]  ;;  %v6100_v43 = vor.u32 %v8627_v32, %v6097_v33  ;;  %v7777_v32 = vld [vmem:[#allocation5 + $0x101c] sm:$0xf0]  ;;  %v8827_v14 = vld [vmem:[#allocation5 + $0x8e8] sm:$0xf0] }
  0x6b   :  { %4494 = vmatpush.bf16.msra.mxu3 %v6516_v41  ;;  %v9131_v41 = vld [vmem:[#allocation5 + $0x126c] sm:$0xf]  ;;  %v7528_v44 = vor.u32 %v8984_v36, %v7525_v37  ;;  %v7699_v36 = vld [vmem:[#allocation5 + $0xf28] sm:$0xf] }
  0x6c   :  { %4519 = vmatpush.bf16.msrb.mxu1 %v7944_v45  ;;  %v8606_v45 = vld [vmem:[#allocation5 + $0x204] sm:$0xf]  ;;  %v8116_v49 = vor.u32 %v9131_v41, %v8113_v42  ;;  %v8371_v41 = vld [vmem:[#allocation5 + $0x1468] sm:$0xf]  ;;  %v9205_v42 = vld [vmem:[#allocation5 + $0x14b8] sm:$0xf0] }
  0x6d   :  { %4507 = vmatpush.bf16.msrb.mxu0 %v7188_v51  ;;  %v8963_v51 = vld [vmem:[#allocation5 + $0xd2c] sm:$0xf]  ;;  %v6016_v57 = vor.u32 %v8606_v45, %v6013_v47  ;;  %v7105_v47 = vld [vmem:[#allocation5 + $0xadc] sm:$0xf0]  ;;  %v8372_v53 = vor.u32 %v9205_v42, %v8371_v41 }
  0x6e   :  { %4482 = vmatpush.bf16.msra.mxu2 %v5760_v55  ;;  %v9110_v55 = vld [vmem:[#allocation5 + $0x11c4] sm:$0xf]  ;;  %v7444_v59 = vor.u32 %v8963_v51, %v7441_v52  ;;  %v8879_v45 = vld [vmem:[#allocation5 + $0xa8c] sm:$0xf]  ;;  %v8869_v51 = vld [vmem:[#allocation5 + $0xa38] sm:$0xf0]  ;;  %v7700_v52 = vor.u32 %v9037_v40, %v7699_v36 }
  0x6f   :  { %4495 = vmatpush.bf16.msra.mxu3 %v6432_v60  ;;  %v8585_v60 = vld [vmem:[#allocation5 + $0x15c] sm:$0xf]  ;;  %v8032_v63 = vor.u32 %v9110_v55, %v8029_v56  ;;  %v8680_v55 = vld [vmem:[#allocation5 + $0x450] sm:$0xf0]  ;;  %v7615_v56 = vld [vmem:[#allocation5 + $0xe80] sm:$0xf] }
  0x70   :  { %4520 = vmatpush.bf16.msrb.mxu1 %v7860_v2  ;;  %v7357_v2 = vld [vmem:[#allocation5 + $0xcd4] sm:$0xf0]  ;;  %v5935_v42 = vld [vmem:[#allocation5 + $0x160] sm:$0xf] }
  0x71   :  { %4508 = vmatpush.bf16.msrb.mxu0 %v7104_v5  ;;  %4483 = vmatmul.bf16.vlgmr.msra.gmra.mxu2 %v9380_v46  ;;  %v9089_v5 = vld [vmem:[#allocation5 + $0x111c] sm:$0xf]  ;;  %v7360_v8 = vor.u32 %v8942_v1, %v7357_v2  ;;  %v6943_v1 = vld [vmem:[#allocation5 + $0x940] sm:$0xf]  ;;  %v8848_v2 = vld [vmem:[#allocation5 + $0x990] sm:$0xf0] }
  0x72   :  { %4534 = vmatpush.bf16.msrb.mxu2 %v8448_v61  ;;  %4496 = vmatmul.bf16.vlgmr.msra.gmra.mxu3 %v9387_v0  ;;  %v5929_v61 = vld [vmem:[#allocation5 + $0x1ac] sm:$0xf0]  ;;  %v7948_v12 = vor.u32 %v9089_v5, %v7945_v6  ;;  %v6187_v5 = vld [vmem:[#allocation5 + $0x358] sm:$0xf]  ;;  %v8659_v6 = vld [vmem:[#allocation5 + $0x3a8] sm:$0xf0] }
  0x73   :  { %4540 = vmatpush.bf16.msrb.mxu3 %v6352_v3  ;;  %v8753_v3 = vld [vmem:[#allocation5 + $0x69c] sm:$0xf]  ;;  %v5932_v7 = vor.u32 %v8585_v60, %v5929_v61  ;;  %v8287_v60 = vld [vmem:[#allocation5 + $0x13c0] sm:$0xf]  ;;  %v9184_v61 = vld [vmem:[#allocation5 + $0x1410] sm:$0xf0] }
  0x74   :  { %4521 = vmatpush.bf16.msrb.mxu1 %v7776_v17  ;;  %4509 = vmatmul.bf16.vlgmr.msrb.gmra.mxu0 %v9382_v50  ;;  %v6604_v11 = vor.u32 %v8753_v3, %v6601_v4  ;;  %v9068_v17 = vld [vmem:[#allocation5 + $0x1074] sm:$0xf]  ;;  %v8288_v4 = vor.u32 %v9184_v61, %v8287_v60  ;;  %v8911_v60 = vld [vmem:[#allocation5 + $0xb88] sm:$0xf0]  ;;  %v7867_v61 = vld [vmem:[#allocation5 + $0x1078] sm:$0xf] }
  0x75   :  { %4553 = vmatpush.bf16.msra.mxu0 %v7024_v9  ;;  %v8564_v9 = vld [vmem:[#allocation5 + $0xb4] sm:$0xf] }
  0x76   :  { %4579 = vmatpush.bf16.msra.mxu2 %v8368_v10  ;;  %v5845_v10 = vld [vmem:[#allocation5 + $0x104] sm:$0xf0] }
  0x77   :  { %4541 = vmatpush.bf16.msrb.mxu3 %v6268_v18  ;;  %4522 = vmatmul.bf16.vlgmr.msrb.gmra.mxu1 %v9384_v58  ;;  %v7861_v18 = vld [vmem:[#allocation5 + $0x10c4] sm:$0xf0] }
  0x78   :  { %4566 = vmatpush.bf16.msra.mxu1 %v7696_v19  ;;  %v5848_v19 = vor.u32 %v8564_v9, %v5845_v10  ;;  %v7864_v26 = vor.u32 %v9068_v17, %v7861_v18  ;;  %v8203_v9 = vld [vmem:[#allocation5 + $0x1318] sm:$0xf]  ;;  %v9163_v10 = vld [vmem:[#allocation5 + $0x1368] sm:$0xf0]  ;;  %v6103_v17 = vld [vmem:[#allocation5 + $0x2b0] sm:$0xf] }
  0x79   :  { %4554 = vmatpush.bf16.msra.mxu0 %v6940_v22  ;;  %v5761_v22 = vld [vmem:[#allocation5 + $0x5c] sm:$0xf0]  ;;  %v8204_v16 = vor.u32 %v9163_v10, %v8203_v9  ;;  %v8638_v18 = vld [vmem:[#allocation5 + $0x300] sm:$0xf0]  ;;  %v7783_v10 = vld [vmem:[#allocation5 + $0xfd0] sm:$0xf] }
  0x7a   :  { %4580 = vmatpush.bf16.msra.mxu2 %v8284_v23  ;;  %v8900_v23 = vld [vmem:[#allocation5 + $0xb34] sm:$0xf]  ;;  %v5764_v33 = vor.u32 %v8543_v20, %v5761_v22  ;;  %v8974_v20 = vld [vmem:[#allocation5 + $0xd80] sm:$0xf0] }
  0x7b   :  { %4542 = vmatpush.bf16.msrb.mxu3 %v6184_v30  ;;  %v6433_v30 = vld [vmem:[#allocation5 + $0x59c] sm:$0xf0]  ;;  %v7192_v37 = vor.u32 %v8900_v23, %v7189_v24  ;;  %v9142_v22 = vld [vmem:[#allocation5 + $0x12c0] sm:$0xf0]  ;;  %v6860_v23 = vor.u32 %v8827_v14, %v6859_v13  ;;  %v6104_v24 = vor.u32 %v8638_v18, %v6103_v17  ;;  %v6439_v18 = vld [vmem:[#allocation5 + $0x550] sm:$0xf] }
  0x7c   :  { %4567 = vmatpush.bf16.msra.mxu1 %v7612_v31  ;;  %v9047_v31 = vld [vmem:[#allocation5 + $0xfcc] sm:$0xf]  ;;  %v8890_v9 = vld [vmem:[#allocation5 + $0xae0] sm:$0xf0]  ;;  %v7029_v14 = vld [vmem:[#allocation5 + $0xa3c] sm:$0xf0] }
  0x7d   :  { %4555 = vmatpush.bf16.msra.mxu0 %v6856_v34  ;;  %v6355_v34 = vld [vmem:[#allocation5 + $0x4a8] sm:$0xf] }
  0x7e   :  { %4581 = vmatpush.bf16.msra.mxu2 %v8200_v35  ;;  %v8701_v35 = vld [vmem:[#allocation5 + $0x4f8] sm:$0xf0] }
  0x7f   :  { %4543 = vmatpush.bf16.msrb.mxu3 %v6100_v43  ;;  %v6436_v43 = vor.u32 %v8711_v27, %v6433_v30  ;;  %v8617_v30 = vld [vmem:[#allocation5 + $0x258] sm:$0xf0] }
  0x80   :  { %4568 = vmatpush.bf16.msra.mxu1 %v7528_v44  ;;  %v7780_v44 = vor.u32 %v9047_v31, %v7777_v32  ;;  %v7363_v31 = vld [vmem:[#allocation5 + $0xc88] sm:$0xf]  ;;  %v8953_v32 = vld [vmem:[#allocation5 + $0xcd8] sm:$0xf0]  ;;  %v6020_v36 = vor.u32 %v8617_v30, %v6019_v29  ;;  %v8373_v29 = vld [vmem:[#allocation5 + $0x14bc] sm:$0xf0] }
  0x81   :  { %4556 = vmatpush.bf16.msra.mxu0 %v6772_v48  ;;  %8523 = vmatmul.msk.bf16.vlgmr.msrb.gmra.mxu2 %vm4341_vm0, %v9392_v38  ;;  %v6356_v48 = vor.u32 %v8701_v35, %v6355_v34  ;;  %v9121_v34 = vld [vmem:[#allocation5 + $0x1218] sm:$0xf0]  ;;  %v7364_v40 = vor.u32 %v8953_v32, %v7363_v31  ;;  %v8838_v31 = vld [vmem:[#allocation5 + $0x944] sm:$0xf]  ;;  %v6945_v32 = vld [vmem:[#allocation5 + $0x994] sm:$0xf0] }
  0x82   :  { %4582 = vmatpush.bf16.msra.mxu2 %v8116_v49  ;;  %v7027_v49 = vld [vmem:[#allocation5 + $0x9e8] sm:$0xf] }
  0x83   :  { %4544 = vmatpush.bf16.msrb.mxu3 %v6016_v57  ;;  %v7108_v57 = vor.u32 %v8879_v45, %v7105_v47  ;;  %v8932_v45 = vld [vmem:[#allocation5 + $0xc30] sm:$0xf0]  ;;  %v7951_v47 = vld [vmem:[#allocation5 + $0x1120] sm:$0xf] }
  0x84   :  { %4569 = vmatpush.bf16.msra.mxu1 %v7444_v59  ;;  %v9016_v59 = vld [vmem:[#allocation5 + $0xed0] sm:$0xf0] }
  0x85   :  { %4557 = vmatpush.bf16.msra.mxu0 %v6688_v62  ;;  %v7028_v62 = vor.u32 %v8869_v51, %v7027_v49  ;;  %v7616_v3 = vor.u32 %v9016_v59, %v7615_v56  ;;  %v5851_v56 = vld [vmem:[#allocation5 + $0xb8] sm:$0xf] }
  0x86   :  { %4583 = vmatpush.bf16.msra.mxu2 %v8032_v63  ;;  %v6272_v63 = vor.u32 %v8680_v55, %v6271_v54  ;;  %v7195_v59 = vld [vmem:[#allocation5 + $0xb38] sm:$0xf] }
  0x87   :  { %4545 = vmatpush.bf16.msrb.mxu3 %v5932_v7  ;;  %v7531_v7 = vld [vmem:[#allocation5 + $0xdd8] sm:$0xf] }
  0x88   :  { %4570 = vmatpush.bf16.msra.mxu1 %v7360_v8  ;;  %v8995_v8 = vld [vmem:[#allocation5 + $0xe28] sm:$0xf0] }
  0x89   :  { %4558 = vmatpush.bf16.msra.mxu0 %v6604_v11  ;;  %v6944_v11 = vor.u32 %v8848_v2, %v6943_v1  ;;  %v7532_v15 = vor.u32 %v8995_v8, %v7531_v7  ;;  %v6523_v2 = vld [vmem:[#allocation5 + $0x5f8] sm:$0xf]  ;;  %v8554_v7 = vld [vmem:[#allocation5 + $0x60] sm:$0xf0]  ;;  %v7111_v8 = vld [vmem:[#allocation5 + $0xa90] sm:$0xf] }
  0x8a   :  { %4584 = vmatpush.bf16.msra.mxu2 %v7948_v12  ;;  %v6188_v12 = vor.u32 %v8659_v6, %v6187_v5  ;;  %v7196_v5 = vor.u32 %v8911_v60, %v7195_v59  ;;  %v8205_v59 = vld [vmem:[#allocation5 + $0x136c] sm:$0xf0] }
  0x8b   :  { %4546 = vmatpush.bf16.msrb.mxu3 %v5848_v19  ;;  %v7447_v19 = vld [vmem:[#allocation5 + $0xd30] sm:$0xf] }
  0x8c   :  { %4571 = vmatpush.bf16.msra.mxu1 %v7276_v21  ;;  %v8119_v21 = vld [vmem:[#allocation5 + $0x1270] sm:$0xf]  ;;  %v7448_v27 = vor.u32 %v8974_v20, %v7447_v19  ;;  %v8722_v19 = vld [vmem:[#allocation5 + $0x5a0] sm:$0xf0]  ;;  %v7112_v20 = vor.u32 %v8890_v9, %v7111_v8  ;;  %v6105_v8 = vld [vmem:[#allocation5 + $0x304] sm:$0xf0] }
  0x8d   :  { %4559 = vmatpush.bf16.msra.mxu0 %v6520_v25  ;;  %v6775_v25 = vld [vmem:[#allocation5 + $0x7f0] sm:$0xf]  ;;  %v8120_v28 = vor.u32 %v9142_v22, %v8119_v21  ;;  %v6440_v30 = vor.u32 %v8722_v19, %v6439_v18  ;;  %v9132_v9 = vld [vmem:[#allocation5 + $0x1274] sm:$0xf] }
  0x8e   :  { %4585 = vmatpush.bf16.msra.mxu2 %v7864_v26  ;;  %v8806_v26 = vld [vmem:[#allocation5 + $0x840] sm:$0xf0]  ;;  %v8455_v22 = vld [vmem:[#allocation5 + $0x1510] sm:$0xf] }
  0x8f   :  { %4547 = vmatpush.bf16.msrb.mxu3 %v5764_v33  ;;  %v8035_v33 = vld [vmem:[#allocation5 + $0x11c8] sm:$0xf]  ;;  %v6776_v35 = vor.u32 %v8806_v26, %v6775_v25 }
  0x90   :  { %4572 = vmatpush.bf16.msra.mxu1 %v7192_v37  ;;  %v6691_v37 = vld [vmem:[#allocation5 + $0x748] sm:$0xf]  ;;  %v8036_v41 = vor.u32 %v9121_v34, %v8035_v33  ;;  %v9006_v34 = vld [vmem:[#allocation5 + $0xe84] sm:$0xf] }
  0x91   :  { %4560 = vmatpush.bf16.msra.mxu0 %v6436_v43  ;;  %v8596_v43 = vld [vmem:[#allocation5 + $0x1b0] sm:$0xf0] }
  0x92   :  { %4586 = vmatpush.bf16.msra.mxu2 %v7780_v44  ;;  %4548 = vmatmul.bf16.vlgmr.msrb.gmra.mxu3 %v9380_v46  ;;  %v7279_v44 = vld [vmem:[#allocation5 + $0xbe0] sm:$0xf]  ;;  %v5936_v51 = vor.u32 %v8596_v43, %v5935_v42  ;;  %v9174_v42 = vld [vmem:[#allocation5 + $0x13c4] sm:$0xf]  ;;  %v8289_v43 = vld [vmem:[#allocation5 + $0x1414] sm:$0xf0] }
  0x93   :  { %4599 = vmatpush.bf16.msra.mxu3 %v8452_v39  ;;  %v8785_v39 = vld [vmem:[#allocation5 + $0x798] sm:$0xf0]  ;;  %v7280_v54 = vor.u32 %v8932_v45, %v7279_v44 }
  0x94   :  { %4573 = vmatpush.bf16.msra.mxu1 %v7108_v57  ;;  %4561 = vmatmul.bf16.vlgmr.msra.gmra.mxu0 %v9387_v0  ;;  %v6692_v49 = vor.u32 %v8785_v39, %v6691_v37  ;;  %v8575_v57 = vld [vmem:[#allocation5 + $0x108] sm:$0xf0]  ;;  %v8670_v39 = vld [vmem:[#allocation5 + $0x404] sm:$0xf]  ;;  %v8817_v45 = vld [vmem:[#allocation5 + $0x89c] sm:$0xf] }
  0x95   :  { %4605 = vmatpush.bf16.msrb.mxu0 %v6356_v48  ;;  %4587 = vmatmul.bf16.vlgmr.msra.gmra.mxu2 %v9384_v58  ;;  %v9100_v48 = vld [vmem:[#allocation5 + $0x1170] sm:$0xf0]  ;;  %v5852_v1 = vor.u32 %v8575_v57, %v5851_v56  ;;  %v6189_v56 = vld [vmem:[#allocation5 + $0x3ac] sm:$0xf0]  ;;  %v9153_v57 = vld [vmem:[#allocation5 + $0x131c] sm:$0xf] }
  0x96   :  { %4631 = vmatpush.bf16.msrb.mxu2 %v7700_v52  ;;  %v6607_v52 = vld [vmem:[#allocation5 + $0x6a0] sm:$0xf]  ;;  %v7952_v55 = vor.u32 %v9100_v48, %v7951_v47  ;;  %v6861_v47 = vld [vmem:[#allocation5 + $0x8ec] sm:$0xf0]  ;;  %v9416_v48 = vld [vmem:[#allocation7] sm:$0xff] }
  0x97   :  { %4644 = vmatpush.bf16.msrb.mxu3 %v8372_v53  ;;  %4574 = vmatmul.bf16.vlgmr.msra.gmra.mxu1 %v9382_v50  ;;  %v8764_v53 = vld [vmem:[#allocation5 + $0x6f0] sm:$0xf0]  ;;  %v801_v60 = vperm.slane %v9416_v48, 0 }
  0x98   :  { %4618 = vmatpush.bf16.msrb.mxu1 %v7028_v62  ;;  %v9079_v62 = vld [vmem:[#allocation5 + $0x10c8] sm:$0xf0] }
  0x99   :  { %4606 = vmatpush.bf16.msrb.mxu0 %v6272_v63  ;;  %v6608_v63 = vor.u32 %v8764_v53, %v6607_v52  ;;  %v7868_v6 = vor.u32 %v9079_v62, %v7867_v61  ;;  %v8292_v53 = vor.u32 %v9174_v42, %v8289_v43  ;;  %v8796_v62 = vld [vmem:[#allocation5 + $0x7f4] sm:$0xf] }
  0x9a   :  { %4632 = vmatpush.bf16.msrb.mxu2 %v7616_v3  ;;  %v8743_v3 = vld [vmem:[#allocation5 + $0x648] sm:$0xf0] }
  0x9b   :  { %4645 = vmatpush.bf16.msrb.mxu3 %v8288_v4  ;;  %v5767_v4 = vld [vmem:[#allocation5 + $0x10] sm:$0xf]  ;;  %v6524_v13 = vor.u32 %v8743_v3, %v6523_v2  ;;  %v8964_v2 = vld [vmem:[#allocation5 + $0xd34] sm:$0xf]  ;;  %v7449_v3 = vld [vmem:[#allocation5 + $0xd84] sm:$0xf0] }
  0x9c   :  { %4619 = vmatpush.bf16.msrb.mxu1 %v6944_v11  ;;  %v9058_v11 = vld [vmem:[#allocation5 + $0x1020] sm:$0xf0]  ;;  %v5768_v17 = vor.u32 %v8554_v7, %v5767_v4 }
  0x9d   :  { %4607 = vmatpush.bf16.msrb.mxu0 %v6188_v12  ;;  %v8859_v12 = vld [vmem:[#allocation5 + $0x9ec] sm:$0xf]  ;;  %v7784_v21 = vor.u32 %v9058_v11, %v7783_v10  ;;  %v8121_v10 = vld [vmem:[#allocation5 + $0x12c4] sm:$0xf0] }
  0x9e   :  { %4633 = vmatpush.bf16.msrb.mxu2 %v7532_v15  ;;  %v9027_v15 = vld [vmem:[#allocation5 + $0xf2c] sm:$0xf]  ;;  %v7032_v25 = vor.u32 %v8859_v12, %v7029_v14  ;;  %v7452_v12 = vor.u32 %v8964_v2, %v7449_v3  ;;  %v6693_v14 = vld [vmem:[#allocation5 + $0x79c] sm:$0xf0]  ;;  %v8124_v19 = vor.u32 %v9132_v9, %v8121_v10  ;;  %v7113_v2 = vld [vmem:[#allocation5 + $0xae4] sm:$0xf0] }
  0x9f   :  { %4646 = vmatpush.bf16.msrb.mxu3 %v8204_v16  ;;  %v7701_v16 = vld [vmem:[#allocation5 + $0xf7c] sm:$0xf0]  ;;  %v6363_v3 = vld [vmem:[#allocation5 + $0x4b0] sm:$0xf] }
  0xa0   :  { %4620 = vmatpush.bf16.msrb.mxu1 %v6860_v23  ;;  %v9226_v23 = vld [vmem:[#allocation5 + $0x1560] sm:$0xf0]  ;;  %v7704_v26 = vor.u32 %v9027_v15, %v7701_v16  ;;  %v8943_v16 = vld [vmem:[#allocation5 + $0xc8c] sm:$0xf] }
  0xa1   :  { %4608 = vmatpush.bf16.msrb.mxu0 %v6104_v24  ;;  %v8691_v24 = vld [vmem:[#allocation5 + $0x4ac] sm:$0xf]  ;;  %v8456_v33 = vor.u32 %v9226_v23, %v8455_v22  ;;  %v6021_v22 = vld [vmem:[#allocation5 + $0x25c] sm:$0xf0] }
  0xa2   :  { %4634 = vmatpush.bf16.msrb.mxu2 %v7448_v27  ;;  %8524 = vmatmul.msk.bf16.vlgmr.msra.gmra.mxu3 %vm4341_vm0, %v9392_v38  ;;  %v6357_v27 = vld [vmem:[#allocation5 + $0x4fc] sm:$0xf0]  ;;  %v9111_v23 = vld [vmem:[#allocation5 + $0x11cc] sm:$0xf] }
  0xa3   :  { %4647 = vmatpush.bf16.msrb.mxu3 %v8120_v28  ;;  %v9195_v28 = vld [vmem:[#allocation5 + $0x146c] sm:$0xf] }
  0xa4   :  { %4621 = vmatpush.bf16.msrb.mxu1 %v6776_v35  ;;  %v7617_v35 = vld [vmem:[#allocation5 + $0xed4] sm:$0xf0]  ;;  %v8376_v37 = vor.u32 %v9195_v28, %v8373_v29  ;;  %v8754_v28 = vld [vmem:[#allocation5 + $0x6a4] sm:$0xf] }
  0xa5   :  { %4609 = vmatpush.bf16.msrb.mxu0 %v6020_v36  ;;  %v6360_v36 = vor.u32 %v8691_v24, %v6357_v27  ;;  %v7620_v44 = vor.u32 %v9006_v34, %v7617_v35  ;;  %v8037_v24 = vld [vmem:[#allocation5 + $0x121c] sm:$0xf0]  ;;  %v6609_v29 = vld [vmem:[#allocation5 + $0x6f4] sm:$0xf0] }
  0xa6   :  { %4635 = vmatpush.bf16.msrb.mxu2 %v7364_v40  ;;  %v6948_v40 = vor.u32 %v8838_v31, %v6945_v32  ;;  %v8922_v31 = vld [vmem:[#allocation5 + $0xbe4] sm:$0xf]  ;;  %v7281_v32 = vld [vmem:[#allocation5 + $0xc34] sm:$0xf0]  ;;  %v8040_v35 = vor.u32 %v9111_v23, %v8037_v24  ;;  %v8457_v23 = vld [vmem:[#allocation5 + $0x1564] sm:$0xf0] }
  0xa7   :  { %4648 = vmatpush.bf16.msrb.mxu3 %v8036_v41  ;;  %v6273_v41 = vld [vmem:[#allocation5 + $0x454] sm:$0xf0]  ;;  %v7284_v43 = vor.u32 %v8922_v31, %v7281_v32 }
  0xa8   :  { %4622 = vmatpush.bf16.msrb.mxu1 %v6692_v49  ;;  %v8985_v49 = vld [vmem:[#allocation5 + $0xddc] sm:$0xf]  ;;  %v6276_v52 = vor.u32 %v8670_v39, %v6273_v41  ;;  %v5937_v39 = vld [vmem:[#allocation5 + $0x1b4] sm:$0xf0] }
  0xa9   :  { %4610 = vmatpush.bf16.msrb.mxu0 %v5936_v51  ;;  %v7533_v51 = vld [vmem:[#allocation5 + $0xe2c] sm:$0xf0]  ;;  %v7953_v41 = vld [vmem:[#allocation5 + $0x1174] sm:$0xf0] }
  0xaa   :  { %4636 = vmatpush.bf16.msrb.mxu2 %v7280_v54  ;;  %v8649_v54 = vld [vmem:[#allocation5 + $0x35c] sm:$0xf]  ;;  %v7536_v61 = vor.u32 %v8985_v49, %v7533_v51  ;;  %v7197_v49 = vld [vmem:[#allocation5 + $0xb8c] sm:$0xf0] }
  0xab   :  { %4649 = vmatpush.bf16.msrb.mxu3 %v7952_v55  ;;  %v6864_v55 = vor.u32 %v8817_v45, %v6861_v47  ;;  %v6192_v4 = vor.u32 %v8649_v54, %v6189_v56  ;;  %v6525_v45 = vld [vmem:[#allocation5 + $0x64c] sm:$0xf0]  ;;  %v8901_v47 = vld [vmem:[#allocation5 + $0xb3c] sm:$0xf] }
  0xac   :  { %4623 = vmatpush.bf16.msrb.mxu1 %v6608_v63  ;;  %v6777_v63 = vld [vmem:[#allocation5 + $0x844] sm:$0xf0]  ;;  %v8565_v54 = vld [vmem:[#allocation5 + $0xbc] sm:$0xf] }
  0xad   :  { %4611 = vmatpush.bf16.msrb.mxu0 %v5852_v1  ;;  %v4354_v1 = vpop.f32.mrf.mxu0  ;;  %v6780_v7 = vor.u32 %v8796_v62, %v6777_v63  ;;  %v9069_v56 = vld [vmem:[#allocation5 + $0x107c] sm:$0xf]  ;;  %v7200_v63 = vor.u32 %v8901_v47, %v7197_v49  ;;  %v8295_v49 = vld [vmem:[#allocation5 + $0x13c8] sm:$0xf] }
  0xae   :  { %4637 = vmatpush.bf16.msrb.mxu2 %v7196_v5  ;;  %v8208_v5 = vor.u32 %v9153_v57, %v8205_v59  ;;  %v4355_v11 = vadd.f32 %v4354_v1, %v801_v60  ;;  %v7869_v59 = vld [vmem:[#allocation5 + $0x10cc] sm:$0xf0]  ;;  %v8712_v60 = vld [vmem:[#allocation5 + $0x554] sm:$0xf] }
  0xaf   :  { %4650 = vmatpush.bf16.msrb.mxu3 %v7868_v6  ;;  %v8628_v6 = vld [vmem:[#allocation5 + $0x2b4] sm:$0xf] }
  0xb0   :  { %4624 = vmatpush.bf16.msrb.mxu1 %v6524_v13  ;;  %v8775_v13 = vld [vmem:[#allocation5 + $0x74c] sm:$0xf]  ;;  %v4367_v15 = vpop.f32.mrf.mxu1  ;;  %v6108_v18 = vor.u32 %v8628_v6, %v6105_v8  ;;  %v8880_v1 = vld [vmem:[#allocation5 + $0xa94] sm:$0xf]  ;;  %v8702_v6 = vld [vmem:[#allocation5 + $0x500] sm:$0xf0] }
  0xb1   :  { %4612 = vmatpush.bf16.msrb.mxu0 %v5768_v17  ;;  %v7365_v17 = vld [vmem:[#allocation5 + $0xcdc] sm:$0xf0]  ;;  %v8870_v8 = vld [vmem:[#allocation5 + $0xa40] sm:$0xf0] }
  0xb2   :  { %4638 = vmatpush.bf16.msrb.mxu2 %v7112_v20  ;;  %v8607_v20 = vld [vmem:[#allocation5 + $0x20c] sm:$0xf]  ;;  %v7368_v27 = vor.u32 %v8943_v16, %v7365_v17  ;;  %v7785_v17 = vld [vmem:[#allocation5 + $0x1024] sm:$0xf0] }
  0xb3   :  { %4651 = vmatpush.bf16.msrb.mxu3 %v7784_v21  ;;  %v6696_v21 = vor.u32 %v8775_v13, %v6693_v14  ;;  %v6024_v34 = vor.u32 %v8607_v20, %v6021_v22  ;;  %v5769_v13 = vld [vmem:[#allocation5 + $0x64] sm:$0xf0]  ;;  %v9048_v14 = vld [vmem:[#allocation5 + $0xfd4] sm:$0xf]  ;;  %v7116_v20 = vor.u32 %v8880_v1, %v7113_v2 }
  0xb4   :  { %4625 = vmatpush.bf16.msrb.mxu1 %v6440_v30  ;;  %4613 = vmatmul.bf16.vlgmr.msrb.gmra.mxu0 %v9380_v46  ;;  %v9216_v22 = vld [vmem:[#allocation5 + $0x1514] sm:$0xf] }
  0xb5   :  { %4639 = vmatmul.bf16.vlgmr.msrb.gmra.mxu2 %v9382_v50  ;;  %4664 = vmatpush.bf16.msra.mxu0 %v8456_v33  ;;  %v4356_v30 = vpop.f32.mrf.mxu0  ;;  %v4393_v33 = vpop.f32.mrf.mxu3  ;;  %v8460_v32 = vor.u32 %v9216_v22, %v8457_v23  ;;  %v9164_v1 = vld [vmem:[#allocation5 + $0x1370] sm:$0xf0] }
  0xb6   :  { %4683 = vmatpush.bf16.msra.mxu2 %v7032_v25  ;;  %4652 = vmatmul.bf16.vlgmr.msrb.gmra.mxu3 %v9384_v58  ;;  %v4368_v25 = vadd.f32 %v4367_v15, %v4355_v11  ;;  %v7872_v11 = vor.u32 %v9069_v56, %v7869_v59  ;;  %v8849_v30 = vld [vmem:[#allocation5 + $0x998] sm:$0xf0]  ;;  %v6111_v56 = vld [vmem:[#allocation5 + $0x2b8] sm:$0xf] }
  0xb7   :  { %4696 = vmatpush.bf16.msra.mxu3 %v7704_v26  ;;  %4626 = vmatmul.bf16.vlgmr.msrb.gmra.mxu1 %v9387_v0  ;;  %v4380_v26 = vpop.f32.mrf.mxu2 }
  0xb8   :  { %4670 = vmatpush.bf16.msra.mxu1 %v6360_v36  ;;  %v8586_v36 = vld [vmem:[#allocation5 + $0x164] sm:$0xf]  ;;  %v4381_v42 = vadd.f32 %v4380_v26, %v4368_v25  ;;  %v4369_v51 = vpop.f32.mrf.mxu1  ;;  %v6279_v25 = vld [vmem:[#allocation5 + $0x408] sm:$0xf]  ;;  %v8681_v26 = vld [vmem:[#allocation5 + $0x458] sm:$0xf0] }
  0xb9   :  { %4709 = vmatpush.bf16.msrb.mxu0 %v8376_v37  ;;  %v6612_v37 = vor.u32 %v8754_v28, %v6609_v29  ;;  %v7788_v28 = vor.u32 %v9048_v14, %v7785_v17  ;;  %v6951_v29 = vld [vmem:[#allocation5 + $0x948] sm:$0xf]  ;;  %v9185_v51 = vld [vmem:[#allocation5 + $0x1418] sm:$0xf0]  ;;  %v8127_v14 = vld [vmem:[#allocation5 + $0x1278] sm:$0xf] }
  0xba   :  { %4684 = vmatpush.bf16.msra.mxu2 %v6948_v40  ;;  %v9090_v40 = vld [vmem:[#allocation5 + $0x1124] sm:$0xf]  ;;  %v4394_v62 = vadd.f32 %v4393_v33, %v4381_v42  ;;  %v8379_v33 = vld [vmem:[#allocation5 + $0x1470] sm:$0xf]  ;;  %v8296_v59 = vor.u32 %v9185_v51, %v8295_v49 }
  0xbb   :  { %4697 = vmatpush.bf16.msra.mxu3 %v7620_v44  ;;  %v8733_v44 = vld [vmem:[#allocation5 + $0x5fc] sm:$0xf]  ;;  %v7371_v17 = vld [vmem:[#allocation5 + $0xc90] sm:$0xf] }
  0xbc   :  { %4671 = vmatpush.bf16.msra.mxu1 %v6276_v52  ;;  %v5940_v52 = vor.u32 %v8586_v36, %v5937_v39  ;;  %v6528_v57 = vor.u32 %v8733_v44, %v6525_v45  ;;  %v7623_v36 = vld [vmem:[#allocation5 + $0xe88] sm:$0xf]  ;;  %v6952_v39 = vor.u32 %v8849_v30, %v6951_v29  ;;  %v6867_v44 = vld [vmem:[#allocation5 + $0x8a0] sm:$0xf]  ;;  %v8828_v45 = vld [vmem:[#allocation5 + $0x8f0] sm:$0xf0] }
  0xbd   :  { %4710 = vmatpush.bf16.msrb.mxu0 %v8292_v53  ;;  %v7956_v53 = vor.u32 %v9090_v40, %v7953_v41  ;;  %v4395_v15 = vpop.f32.mrf.mxu3  ;;  %v6195_v40 = vld [vmem:[#allocation5 + $0x360] sm:$0xf]  ;;  %v8660_v41 = vld [vmem:[#allocation5 + $0x3b0] sm:$0xf0]  ;;  %v9122_v29 = vld [vmem:[#allocation5 + $0x1220] sm:$0xf0] }
  0xbe   :  { %4685 = vmatpush.bf16.msra.mxu2 %v6864_v55  ;;  %v5853_v55 = vld [vmem:[#allocation5 + $0x10c] sm:$0xf0]  ;;  %v9143_v15 = vld [vmem:[#allocation5 + $0x12c8] sm:$0xf0] }
  0xbf   :  { %4698 = vmatpush.bf16.msra.mxu3 %v7536_v61  ;;  %v6441_v61 = vld [vmem:[#allocation5 + $0x5a4] sm:$0xf0]  ;;  %v5856_v10 = vor.u32 %v8565_v54, %v5853_v55  ;;  %v8996_v54 = vld [vmem:[#allocation5 + $0xe30] sm:$0xf0]  ;;  %v6868_v55 = vor.u32 %v8828_v45, %v6867_v44 }
  0xc0   :  { %4672 = vmatpush.bf16.msra.mxu1 %v6192_v4  ;;  %v4382_v4 = vpop.f32.mrf.mxu2  ;;  %v6444_v16 = vor.u32 %v8712_v60, %v6441_v61  ;;  %v6783_v60 = vld [vmem:[#allocation5 + $0x7f8] sm:$0xf]  ;;  %v8807_v61 = vld [vmem:[#allocation5 + $0x848] sm:$0xf0]  ;;  %v7959_v45 = vld [vmem:[#allocation5 + $0x1128] sm:$0xf] }
  0xc1   :  { %4711 = vmatpush.bf16.msrb.mxu0 %v8208_v5  ;;  %v4406_v5 = vpop.f32.mrf.mxu0  ;;  %v8975_v4 = vld [vmem:[#allocation5 + $0xd88] sm:$0xf0] }
  0xc2   :  { %4686 = vmatpush.bf16.msra.mxu2 %v6780_v7  ;;  %v7035_v7 = vld [vmem:[#allocation5 + $0x9f0] sm:$0xf]  ;;  %v4407_v9 = vadd.f32 %v4406_v5, %v4394_v62  ;;  %v6784_v5 = vor.u32 %v8807_v61, %v6783_v60 }
  0xc3   :  { %4699 = vmatpush.bf16.msra.mxu3 %v7452_v12  ;;  %v8544_v12 = vld [vmem:[#allocation5 + $0x14] sm:$0xf]  ;;  %v7036_v24 = vor.u32 %v8870_v8, %v7035_v7  ;;  %v8618_v7 = vld [vmem:[#allocation5 + $0x260] sm:$0xf0] }
  0xc4   :  { %4673 = vmatpush.bf16.msra.mxu1 %v6108_v18  ;;  %8525 = vmatmul.msk.bf16.vlgmr.msra.gmra.mxu0 %vm4341_vm0, %v9392_v38  ;;  %v7707_v18 = vld [vmem:[#allocation5 + $0xf30] sm:$0xf]  ;;  %5710 = vst [vmem:[#allocation8] sm:$0x3f] %v4407_v9  ;;  %v802_v9 = vperm.slane %v9416_v48, 1 }
  0xc5   :  { %4712 = vmatpush.bf16.msrb.mxu0 %v8124_v19  ;;  %v9038_v19 = vld [vmem:[#allocation5 + $0xf80] sm:$0xf0] }
  0xc6   :  { %4687 = vmatpush.bf16.msra.mxu2 %v6696_v21  ;;  %v6364_v21 = vor.u32 %v8702_v6, %v6363_v3  ;;  %v7708_v31 = vor.u32 %v9038_v19, %v7707_v18  ;;  %v7455_v3 = vld [vmem:[#allocation5 + $0xd38] sm:$0xf]  ;;  %v6027_v6 = vld [vmem:[#allocation5 + $0x210] sm:$0xf]  ;;  %v8954_v18 = vld [vmem:[#allocation5 + $0xce0] sm:$0xf0] }
  0xc7   :  { %4700 = vmatpush.bf16.msra.mxu3 %v7368_v27  ;;  %v5772_v27 = vor.u32 %v8544_v12, %v5769_v13  ;;  %v8786_v12 = vld [vmem:[#allocation5 + $0x7a0] sm:$0xf0]  ;;  %v7456_v13 = vor.u32 %v8975_v4, %v7455_v3  ;;  %v9080_v4 = vld [vmem:[#allocation5 + $0x10d0] sm:$0xf0] }
  0xc8   :  { %4674 = vmatpush.bf16.msra.mxu1 %v6024_v34  ;;  %v9206_v34 = vld [vmem:[#allocation5 + $0x14c0] sm:$0xf0] }
  0xc9   :  { %4713 = vmatpush.bf16.msrb.mxu0 %v8040_v35  ;;  %v6280_v35 = vor.u32 %v8681_v26, %v6279_v25  ;;  %v4408_v42 = vpop.f32.mrf.mxu0  ;;  %v6615_v25 = vld [vmem:[#allocation5 + $0x6a8] sm:$0xf]  ;;  %v8765_v26 = vld [vmem:[#allocation5 + $0x6f8] sm:$0xf0] }
  0xca   :  { %4688 = vmatpush.bf16.msra.mxu2 %v6612_v37  ;;  %v9017_v37 = vld [vmem:[#allocation5 + $0xed8] sm:$0xf0]  ;;  %v8744_v42 = vld [vmem:[#allocation5 + $0x650] sm:$0xf0] }
  0xcb   :  { %4701 = vmatpush.bf16.msra.mxu3 %v7284_v43  ;;  %v8380_v43 = vor.u32 %v9206_v34, %v8379_v33  ;;  %v7624_v47 = vor.u32 %v9017_v37, %v7623_v36  ;;  %v8933_v33 = vld [vmem:[#allocation5 + $0xc38] sm:$0xf0]  ;;  %v6616_v34 = vor.u32 %v8765_v26, %v6615_v25  ;;  %v8576_v36 = vld [vmem:[#allocation5 + $0x110] sm:$0xf0]  ;;  %v8671_v25 = vld [vmem:[#allocation5 + $0x40c] sm:$0xf] }
  0xcc   :  { %4675 = vmatpush.bf16.msra.mxu1 %v5940_v52  ;;  %v6196_v52 = vor.u32 %v8660_v41, %v6195_v40  ;;  %v6531_v41 = vld [vmem:[#allocation5 + $0x600] sm:$0xf] }
  0xcd   :  { %4714 = vmatpush.bf16.msrb.mxu0 %v7956_v53  ;;  %v7539_v53 = vld [vmem:[#allocation5 + $0xde0] sm:$0xf] }
  0xce   :  { %4689 = vmatpush.bf16.msra.mxu2 %v6528_v57  ;;  %v8639_v57 = vld [vmem:[#allocation5 + $0x308] sm:$0xf0]  ;;  %v7540_v62 = vor.u32 %v8996_v54, %v7539_v53  ;;  %v8912_v53 = vld [vmem:[#allocation5 + $0xb90] sm:$0xf0]  ;;  %v5775_v54 = vld [vmem:[#allocation5 + $0x18] sm:$0xf] }
  0xcf   :  { %4702 = vmatpush.bf16.msra.mxu3 %v7200_v63  ;;  %v8211_v63 = vld [vmem:[#allocation5 + $0x1320] sm:$0xf]  ;;  %v6112_v2 = vor.u32 %v8639_v57, %v6111_v56  ;;  %v8555_v56 = vld [vmem:[#allocation5 + $0x68] sm:$0xf0]  ;;  %v6447_v57 = vld [vmem:[#allocation5 + $0x558] sm:$0xf] }
  0xd0   :  { %4676 = vmatpush.bf16.msra.mxu1 %v5856_v10  ;;  %v8212_v8 = vor.u32 %v9164_v1, %v8211_v63  ;;  %v4419_v10 = vpop.f32.mrf.mxu1  ;;  %v8463_v63 = vld [vmem:[#allocation5 + $0x1518] sm:$0xf]  ;;  %v9227_v1 = vld [vmem:[#allocation5 + $0x1568] sm:$0xf0]  ;;  %v6281_v26 = vld [vmem:[#allocation5 + $0x45c] sm:$0xf0] }
  0xd1   :  { %4715 = vmatpush.bf16.msrb.mxu0 %v7872_v11  ;;  %v6699_v11 = vld [vmem:[#allocation5 + $0x750] sm:$0xf]  ;;  %v4458_v22 = vpop.f32.mrf.mxu0  ;;  %v4420_v23 = vadd.f32 %v4419_v10, %v802_v9  ;;  %v7119_v9 = vld [vmem:[#allocation5 + $0xa98] sm:$0xf]  ;;  %v8891_v10 = vld [vmem:[#allocation5 + $0xae8] sm:$0xf0] }
  0xd2   :  { %4690 = vmatpush.bf16.msra.mxu2 %v6444_v16  ;;  %v6028_v16 = vor.u32 %v8618_v7, %v6027_v6  ;;  %v6700_v19 = vor.u32 %v8786_v12, %v6699_v11  ;;  %v6365_v6 = vld [vmem:[#allocation5 + $0x504] sm:$0xf0]  ;;  %v8860_v11 = vld [vmem:[#allocation5 + $0x9f4] sm:$0xf] }
  0xd3   :  { %4703 = vmatpush.bf16.msra.mxu3 %v7116_v20  ;;  %v5943_v20 = vld [vmem:[#allocation5 + $0x168] sm:$0xf] }
  0xd4   :  { %4677 = vmatpush.bf16.msra.mxu1 %v5772_v27  ;;  %v7372_v27 = vor.u32 %v8954_v18, %v7371_v17  ;;  %v4432_v37 = vpop.f32.mrf.mxu2 }
  0xd5   :  { %4716 = vmatpush.bf16.msrb.mxu0 %v7788_v28  ;;  %4691 = vmatmul.bf16.vlgmr.msra.gmra.mxu2 %v9387_v0  ;;  %v8043_v28 = vld [vmem:[#allocation5 + $0x11d0] sm:$0xf]  ;;  %v4445_v30 = vpop.f32.mrf.mxu3 }
  0xd6   :  { %4735 = vmatpush.bf16.msrb.mxu2 %v6364_v21  ;;  %4704 = vmatmul.bf16.vlgmr.msra.gmra.mxu3 %v9382_v50  ;;  %v8597_v21 = vld [vmem:[#allocation5 + $0x1b8] sm:$0xf0] }
  0xd7   :  { %4748 = vmatpush.bf16.msrb.mxu3 %v7036_v24  ;;  %4678 = vmatmul.bf16.vlgmr.msra.gmra.mxu1 %v9380_v46  ;;  %v8128_v24 = vor.u32 %v9143_v15, %v8127_v14  ;;  %v7037_v14 = vld [vmem:[#allocation5 + $0xa44] sm:$0xf0]  ;;  %v9196_v15 = vld [vmem:[#allocation5 + $0x1474] sm:$0xf] }
  0xd8   :  { %4729 = vmatpush.bf16.msrb.mxu1 %v8460_v32  ;;  %4717 = vmatmul.bf16.vlgmr.msrb.gmra.mxu0 %v9384_v58  ;;  %v7287_v32 = vld [vmem:[#allocation5 + $0xbe8] sm:$0xf]  ;;  %v4421_v40 = vpop.f32.mrf.mxu1 }
  0xd9   :  { %4761 = vmatpush.bf16.msra.mxu0 %v7708_v31  ;;  %v5944_v31 = vor.u32 %v8597_v21, %v5943_v20  ;;  %v7288_v44 = vor.u32 %v8933_v33, %v7287_v32  ;;  %v4460_v60 = vpop.f32.mrf.mxu0  ;;  %v7791_v21 = vld [vmem:[#allocation5 + $0xfd8] sm:$0xf]  ;;  %v6953_v32 = vld [vmem:[#allocation5 + $0x99c] sm:$0xf0]  ;;  %v9175_v33 = vld [vmem:[#allocation5 + $0x13cc] sm:$0xf] }
  0xda   :  { %4736 = vmatpush.bf16.msrb.mxu2 %v6280_v35  ;;  %v5859_v35 = vld [vmem:[#allocation5 + $0xc0] sm:$0xf]  ;;  %v6197_v40 = vld [vmem:[#allocation5 + $0x3b4] sm:$0xf0]  ;;  %v8986_v60 = vld [vmem:[#allocation5 + $0xde4] sm:$0xf] }
  0xdb   :  { %4749 = vmatpush.bf16.msrb.mxu3 %v6952_v39  ;;  %v8044_v39 = vor.u32 %v9122_v29, %v8043_v28  ;;  %v5860_v49 = vor.u32 %v8576_v36, %v5859_v35  ;;  %v7040_v28 = vor.u32 %v8860_v11, %v7037_v14  ;;  %v6284_v36 = vor.u32 %v8671_v25, %v6281_v26  ;;  %v7457_v11 = vld [vmem:[#allocation5 + $0xd8c] sm:$0xf0]  ;;  %v6701_v14 = vld [vmem:[#allocation5 + $0x7a4] sm:$0xf0]  ;;  %v8944_v26 = vld [vmem:[#allocation5 + $0xc94] sm:$0xf] }
  0xdc   :  { %4774 = vmatpush.bf16.msra.mxu1 %v8380_v43  ;;  %v4433_v43 = vadd.f32 %v4432_v37, %v4420_v23  ;;  %v4434_v17 = vpop.f32.mrf.mxu2 }
  0xdd   :  { %4762 = vmatpush.bf16.msra.mxu0 %v7624_v47  ;;  %v9101_v47 = vld [vmem:[#allocation5 + $0x1178] sm:$0xf0]  ;;  %v4447_v7 = vpop.f32.mrf.mxu3 }
  0xde   :  { %4737 = vmatpush.bf16.msrb.mxu2 %v6196_v52  ;;  %v4446_v51 = vadd.f32 %v4445_v30, %v4433_v43  ;;  %v7203_v52 = vld [vmem:[#allocation5 + $0xb40] sm:$0xf]  ;;  %v7960_v61 = vor.u32 %v9101_v47, %v7959_v45  ;;  %v7709_v30 = vld [vmem:[#allocation5 + $0xf84] sm:$0xf0]  ;;  %v9007_v43 = vld [vmem:[#allocation5 + $0xe8c] sm:$0xf] }
  0xdf   :  { %4750 = vmatpush.bf16.msrb.mxu3 %v6868_v55  ;;  %v6532_v55 = vor.u32 %v8744_v42, %v6531_v41  ;;  %v8818_v45 = vld [vmem:[#allocation5 + $0x8a4] sm:$0xf]  ;;  %v6869_v47 = vld [vmem:[#allocation5 + $0x8f4] sm:$0xf0]  ;;  %v803_v7 = vperm.slane %v9416_v48, 2 }
  0xe0   :  { %4775 = vmatpush.bf16.msra.mxu1 %v8296_v59  ;;  %v8723_v59 = vld [vmem:[#allocation5 + $0x5a8] sm:$0xf0]  ;;  %v4459_v3 = vadd.f32 %v4458_v22, %v4446_v51  ;;  %v4471_v20 = vpop.f32.mrf.mxu1  ;;  %v8213_v51 = vld [vmem:[#allocation5 + $0x1374] sm:$0xf0] }
  0xe1   :  { %4763 = vmatpush.bf16.msra.mxu0 %v7540_v62  ;;  %v7875_v62 = vld [vmem:[#allocation5 + $0x1080] sm:$0xf]  ;;  %v6448_v12 = vor.u32 %v8723_v59, %v6447_v57  ;;  %v9059_v22 = vld [vmem:[#allocation5 + $0x1028] sm:$0xf0]  ;;  %v6872_v57 = vor.u32 %v8818_v45, %v6869_v47  ;;  %v6533_v45 = vld [vmem:[#allocation5 + $0x654] sm:$0xf0] }
  0xe2   :  { %4738 = vmatpush.bf16.msrb.mxu2 %v6112_v2  ;;  %v7204_v2 = vor.u32 %v8912_v53, %v7203_v52  ;;  %v7876_v18 = vor.u32 %v9080_v4, %v7875_v62  ;;  %v4472_v23 = vadd.f32 %v4471_v20, %v4459_v3  ;;  %v7792_v35 = vor.u32 %v9059_v22, %v7791_v21  ;;  %v8797_v62 = vld [vmem:[#allocation5 + $0x7fc] sm:$0xf]  ;;  %v8587_v22 = vld [vmem:[#allocation5 + $0x16c] sm:$0xf]  ;;  %v9070_v47 = vld [vmem:[#allocation5 + $0x1084] sm:$0xf] }
  0xe3   :  { %4751 = vmatpush.bf16.msrb.mxu3 %v6784_v5  ;;  %v8692_v5 = vld [vmem:[#allocation5 + $0x4b4] sm:$0xf] }
  0xe4   :  { %4776 = vmatpush.bf16.msra.mxu1 %v8212_v8  ;;  %v5776_v8 = vor.u32 %v8555_v56, %v5775_v54  ;;  %5711 = vst [vmem:[#allocation8 + $0x8] sm:$0x3f] %v4472_v23  ;;  %v6113_v56 = vld [vmem:[#allocation5 + $0x30c] sm:$0xf0]  ;;  %v5945_v23 = vld [vmem:[#allocation5 + $0x1bc] sm:$0xf0] }
  0xe5   :  { %4764 = vmatpush.bf16.msra.mxu0 %v7456_v13  ;;  %v8464_v13 = vor.u32 %v9227_v1, %v8463_v63  ;;  %v6785_v63 = vld [vmem:[#allocation5 + $0x84c] sm:$0xf0]  ;;  %v9133_v1 = vld [vmem:[#allocation5 + $0x127c] sm:$0xf] }
  0xe6   :  { %4739 = vmatpush.bf16.msrb.mxu2 %v6028_v16  ;;  %v8381_v16 = vld [vmem:[#allocation5 + $0x14c4] sm:$0xf0] }
  0xe7   :  { %4752 = vmatpush.bf16.msrb.mxu3 %v6700_v19  ;;  %8526 = vmatmul.msk.bf16.vlgmr.msrb.gmra.mxu1 %vm4341_vm0, %v9392_v38  ;;  %v6368_v19 = vor.u32 %v8692_v5, %v6365_v6  ;;  %v8384_v29 = vor.u32 %v9196_v15, %v8381_v16  ;;  %v8608_v5 = vld [vmem:[#allocation5 + $0x214] sm:$0xf]  ;;  %v6029_v6 = vld [vmem:[#allocation5 + $0x264] sm:$0xf0] }
  0xe8   :  { %4777 = vmatpush.bf16.msra.mxu1 %v8128_v24  ;;  %v7120_v24 = vor.u32 %v8891_v10, %v7119_v9  ;;  %v4473_v53 = vpop.f32.mrf.mxu1  ;;  %v8965_v10 = vld [vmem:[#allocation5 + $0xd3c] sm:$0xf]  ;;  %v9112_v15 = vld [vmem:[#allocation5 + $0x11d4] sm:$0xf]  ;;  %v8045_v16 = vld [vmem:[#allocation5 + $0x1224] sm:$0xf0]  ;;  %v6032_v17 = vor.u32 %v8608_v5, %v6029_v6 }
  0xe9   :  { %4765 = vmatpush.bf16.msra.mxu0 %v7372_v27  ;;  %v9028_v27 = vld [vmem:[#allocation5 + $0xf34] sm:$0xf]  ;;  %v7460_v21 = vor.u32 %v8965_v10, %v7457_v11  ;;  %v8048_v25 = vor.u32 %v9112_v15, %v8045_v16  ;;  %v8545_v53 = vld [vmem:[#allocation5 + $0x1c] sm:$0xf]  ;;  %v7793_v6 = vld [vmem:[#allocation5 + $0x102c] sm:$0xf0] }
  0xea   :  { %4740 = vmatpush.bf16.msrb.mxu2 %v5944_v31  ;;  %v8839_v31 = vld [vmem:[#allocation5 + $0x94c] sm:$0xf]  ;;  %v7712_v37 = vor.u32 %v9028_v27, %v7709_v30  ;;  %v7373_v27 = vld [vmem:[#allocation5 + $0xce4] sm:$0xf0]  ;;  %v6617_v30 = vld [vmem:[#allocation5 + $0x6fc] sm:$0xf0] }
  0xeb   :  { %4753 = vmatpush.bf16.msrb.mxu3 %v6616_v34  ;;  %v8297_v34 = vld [vmem:[#allocation5 + $0x141c] sm:$0xf0]  ;;  %v6956_v41 = vor.u32 %v8839_v31, %v6953_v32  ;;  %v9091_v31 = vld [vmem:[#allocation5 + $0x112c] sm:$0xf]  ;;  %v9049_v5 = vld [vmem:[#allocation5 + $0xfdc] sm:$0xf] }
  0xec   :  { %4778 = vmatpush.bf16.msra.mxu1 %v8044_v39  ;;  %v8650_v39 = vld [vmem:[#allocation5 + $0x364] sm:$0xf]  ;;  %v8300_v42 = vor.u32 %v9175_v33, %v8297_v34  ;;  %v7961_v32 = vld [vmem:[#allocation5 + $0x117c] sm:$0xf0]  ;;  %v5948_v33 = vor.u32 %v8587_v22, %v5945_v23  ;;  %v7376_v34 = vor.u32 %v8944_v26, %v7373_v27  ;;  %v7715_v10 = vld [vmem:[#allocation5 + $0xf38] sm:$0xf] }
  0xed   :  { %4766 = vmatpush.bf16.msra.mxu0 %v7288_v44  ;;  %v7625_v44 = vld [vmem:[#allocation5 + $0xedc] sm:$0xf0]  ;;  %v6200_v52 = vor.u32 %v8650_v39, %v6197_v40  ;;  %v7964_v40 = vor.u32 %v9091_v31, %v7961_v32  ;;  %v8387_v15 = vld [vmem:[#allocation5 + $0x1478] sm:$0xf]  ;;  %v9207_v16 = vld [vmem:[#allocation5 + $0x14c8] sm:$0xf0] }
  0xee   :  { %4741 = vmatpush.bf16.msrb.mxu2 %v5860_v49  ;;  %v9154_v49 = vld [vmem:[#allocation5 + $0x1324] sm:$0xf]  ;;  %v7628_v54 = vor.u32 %v9007_v43, %v7625_v44  ;;  %v7043_v23 = vld [vmem:[#allocation5 + $0x9f8] sm:$0xf]  ;;  %v8388_v26 = vor.u32 %v9207_v16, %v8387_v15  ;;  %v9123_v15 = vld [vmem:[#allocation5 + $0x1228] sm:$0xf0] }
  0xef   :  { %4754 = vmatpush.bf16.msrb.mxu3 %v6532_v55  ;;  %v8629_v55 = vld [vmem:[#allocation5 + $0x2bc] sm:$0xf]  ;;  %v8216_v59 = vor.u32 %v9154_v49, %v8213_v51  ;;  %v8734_v43 = vld [vmem:[#allocation5 + $0x604] sm:$0xf]  ;;  %v7877_v49 = vld [vmem:[#allocation5 + $0x10d4] sm:$0xf0] }
  0xf0   :  { %4779 = vmatpush.bf16.msra.mxu1 %v7960_v61  ;;  %v7541_v61 = vld [vmem:[#allocation5 + $0xe34] sm:$0xf0]  ;;  %v6116_v3 = vor.u32 %v8629_v55, %v6113_v56  ;;  %v5777_v56 = vld [vmem:[#allocation5 + $0x6c] sm:$0xf0]  ;;  %v9018_v32 = vld [vmem:[#allocation5 + $0xee0] sm:$0xf0] }
  0xf1   :  { %4767 = vmatpush.bf16.msra.mxu0 %v7204_v2  ;;  %v8129_v2 = vld [vmem:[#allocation5 + $0x12cc] sm:$0xf0]  ;;  %v7544_v4 = vor.u32 %v8986_v60, %v7541_v61  ;;  %v7205_v60 = vld [vmem:[#allocation5 + $0xb94] sm:$0xf0]  ;;  %v6536_v61 = vor.u32 %v8734_v43, %v6533_v45  ;;  %v8661_v43 = vld [vmem:[#allocation5 + $0x3b8] sm:$0xf0] }
  0xf2   :  { %4742 = vmatpush.bf16.msrb.mxu2 %v5776_v8  ;;  %v6788_v8 = vor.u32 %v8797_v62, %v6785_v63  ;;  %v8132_v9 = vor.u32 %v9133_v1, %v8129_v2  ;;  %v7880_v62 = vor.u32 %v9070_v47, %v7877_v49  ;;  %v8713_v63 = vld [vmem:[#allocation5 + $0x55c] sm:$0xf]  ;;  %v8465_v2 = vld [vmem:[#allocation5 + $0x156c] sm:$0xf0]  ;;  %v8219_v47 = vld [vmem:[#allocation5 + $0x1328] sm:$0xf] }
  0xf3   :  { %4755 = vmatpush.bf16.msrb.mxu3 %v6448_v12  ;;  %v8776_v12 = vld [vmem:[#allocation5 + $0x754] sm:$0xf]  ;;  %v9217_v1 = vld [vmem:[#allocation5 + $0x151c] sm:$0xf] }
  0xf4   :  { %4780 = vmatpush.bf16.msra.mxu1 %v7876_v18  ;;  %v4484_v18 = vpop.f32.mrf.mxu2  ;;  %v8997_v45 = vld [vmem:[#allocation5 + $0xe38] sm:$0xf0] }
  0xf5   :  { %4768 = vmatpush.bf16.msra.mxu0 %v7120_v24  ;;  %4743 = vmatmul.bf16.vlgmr.msrb.gmra.mxu2 %v9380_v46  ;;  %v4485_v20 = vadd.f32 %v4484_v18, %v803_v7  ;;  %v6704_v24 = vor.u32 %v8776_v12, %v6701_v14  ;;  %v5780_v7 = vor.u32 %v8545_v53, %v5777_v56  ;;  %v9039_v14 = vld [vmem:[#allocation5 + $0xf88] sm:$0xf0]  ;;  %v9165_v49 = vld [vmem:[#allocation5 + $0x1378] sm:$0xf0]  ;;  %v6875_v53 = vld [vmem:[#allocation5 + $0x8a8] sm:$0xf] }
  0xf6   :  { %4794 = vmatpush.bf16.msra.mxu2 %v8464_v13  ;;  %4756 = vmatmul.bf16.vlgmr.msrb.gmra.mxu3 %v9387_v0  ;;  %v4510_v13 = vpop.f32.mrf.mxu0  ;;  %v7796_v18 = vor.u32 %v9049_v5, %v7793_v6  ;;  %v8220_v56 = vor.u32 %v9165_v49, %v8219_v47  ;;  %v6791_v6 = vld [vmem:[#allocation5 + $0x800] sm:$0xf] }
  0xf7   :  { %4800 = vmatpush.bf16.msra.mxu3 %v6368_v19  ;;  %v9435_v19 = vpop.f32.mrf.mxu1 }
  0xf8   :  { %4781 = vmatpush.bf16.msra.mxu1 %v7792_v35  ;;  %4769 = vmatmul.bf16.vlgmr.msra.gmra.mxu0 %v9382_v50  ;;  %v8566_v35 = vld [vmem:[#allocation5 + $0xc4] sm:$0xf] }
  0xf9   :  { %4813 = vmatpush.bf16.msrb.mxu0 %v7040_v28  ;;  %v8755_v28 = vld [vmem:[#allocation5 + $0x6ac] sm:$0xf] }
  0xfa   :  { %4839 = vmatpush.bf16.msrb.mxu2 %v8384_v29  ;;  %v4497_v29 = vpop.f32.mrf.mxu3  ;;  %v6620_v39 = vor.u32 %v8755_v28, %v6617_v30  ;;  %v6287_v28 = vld [vmem:[#allocation5 + $0x410] sm:$0xf] }
  0xfb   :  { %4801 = vmatpush.bf16.msra.mxu3 %v6284_v36  ;;  %4782 = vmatmul.bf16.vlgmr.msra.gmra.mxu1 %v9384_v58  ;;  %v5861_v36 = vld [vmem:[#allocation5 + $0x114] sm:$0xf0] }
  0xfc   :  { %4826 = vmatpush.bf16.msrb.mxu1 %v7712_v37  ;;  %v4498_v37 = vadd.f32 %v4497_v29, %v4485_v20  ;;  %v5864_v51 = vor.u32 %v8566_v35, %v5861_v36  ;;  %v8881_v20 = vld [vmem:[#allocation5 + $0xa9c] sm:$0xf]  ;;  %v8682_v29 = vld [vmem:[#allocation5 + $0x460] sm:$0xf0] }
  0xfd   :  { %4814 = vmatpush.bf16.msrb.mxu0 %v6956_v41  ;;  %v8923_v41 = vld [vmem:[#allocation5 + $0xbec] sm:$0xf]  ;;  %v6288_v36 = vor.u32 %v8682_v29, %v6287_v28  ;;  %v8934_v28 = vld [vmem:[#allocation5 + $0xc40] sm:$0xf0]  ;;  %v7967_v29 = vld [vmem:[#allocation5 + $0x1130] sm:$0xf] }
  0xfe   :  { %4840 = vmatpush.bf16.msrb.mxu2 %v8300_v42  ;;  %v7289_v42 = vld [vmem:[#allocation5 + $0xc3c] sm:$0xf0]  ;;  %v4512_v44 = vpop.f32.mrf.mxu0 }
  0xff   :  { %4802 = vmatpush.bf16.msra.mxu3 %v6200_v52  ;;  %v4486_v52 = vpop.f32.mrf.mxu2  ;;  %v7292_v55 = vor.u32 %v8923_v41, %v7289_v42  ;;  %v6203_v42 = vld [vmem:[#allocation5 + $0x368] sm:$0xf] }
 0x100   :  { %4827 = vmatpush.bf16.msrb.mxu1 %v7628_v54  ;;  %v4525_v54 = vpop.f32.mrf.mxu1  ;;  %v7547_v44 = vld [vmem:[#allocation5 + $0xde8] sm:$0xf]  ;;  %v6204_v52 = vor.u32 %v8661_v43, %v6203_v42  ;;  %v8913_v43 = vld [vmem:[#allocation5 + $0xb98] sm:$0xf0] }
 0x101   :  { %4815 = vmatpush.bf16.msrb.mxu0 %v6872_v57  ;;  %v4511_v57 = vadd.f32 %v4510_v13, %v4498_v37  ;;  %v8468_v13 = vor.u32 %v9217_v1, %v8465_v2  ;;  %v6959_v37 = vld [vmem:[#allocation5 + $0x950] sm:$0xf]  ;;  %v8829_v54 = vld [vmem:[#allocation5 + $0x8f8] sm:$0xf0]  ;;  %v9144_v1 = vld [vmem:[#allocation5 + $0x12d0] sm:$0xf0] }
 0x102   :  { %4841 = vmatpush.bf16.msrb.mxu2 %v8216_v59  ;;  %v8902_v59 = vld [vmem:[#allocation5 + $0xb44] sm:$0xf]  ;;  %v6876_v2 = vor.u32 %v8829_v54, %v6875_v53  ;;  %v7211_v42 = vld [vmem:[#allocation5 + $0xb48] sm:$0xf] }
 0x103   :  { %4803 = vmatpush.bf16.msra.mxu3 %v6116_v3  ;;  %v4499_v3 = vpop.f32.mrf.mxu3  ;;  %v7208_v11 = vor.u32 %v8902_v59, %v7205_v60  ;;  %v4524_v12 = vadd.f32 %v9435_v19, %v4511_v57  ;;  %v7631_v19 = vld [vmem:[#allocation5 + $0xe90] sm:$0xf]  ;;  %v6119_v57 = vld [vmem:[#allocation5 + $0x2c0] sm:$0xf]  ;;  %v8640_v59 = vld [vmem:[#allocation5 + $0x310] sm:$0xf0] }
 0x104   :  { %4828 = vmatpush.bf16.msrb.mxu1 %v7544_v4  ;;  %v6449_v4 = vld [vmem:[#allocation5 + $0x5ac] sm:$0xf0]  ;;  %v7463_v60 = vld [vmem:[#allocation5 + $0xd40] sm:$0xf]  ;;  %v6120_v5 = vor.u32 %v8640_v59, %v6119_v57  ;;  %v6539_v54 = vld [vmem:[#allocation5 + $0x608] sm:$0xf]  ;;  %v7212_v57 = vor.u32 %v8913_v43, %v7211_v42 }
 0x105   :  { %4816 = vmatpush.bf16.msrb.mxu0 %v6788_v8  ;;  %8527 = vmatmul.msk.bf16.vlgmr.msra.gmra.mxu2 %vm4341_vm0, %v9392_v38  ;;  %v6371_v8 = vld [vmem:[#allocation5 + $0x4b8] sm:$0xf] }
 0x106   :  { %4842 = vmatpush.bf16.msrb.mxu2 %v8132_v9  ;;  %v8703_v9 = vld [vmem:[#allocation5 + $0x508] sm:$0xf0] }
 0x107   :  { %4804 = vmatpush.bf16.msra.mxu3 %v6032_v17  ;;  %v6452_v17 = vor.u32 %v8713_v63, %v6449_v4  ;;  %v6372_v22 = vor.u32 %v8703_v9, %v6371_v8  ;;  %v4536_v27 = vpop.f32.mrf.mxu2  ;;  %v8135_v63 = vld [vmem:[#allocation5 + $0x1280] sm:$0xf]  ;;  %v804_v4 = vperm.slane %v9416_v48, 3 }
 0x108   :  { %4829 = vmatpush.bf16.msrb.mxu1 %v7460_v21  ;;  %v7121_v21 = vld [vmem:[#allocation5 + $0xaec] sm:$0xf0]  ;;  %v4537_v30 = vadd.f32 %v4536_v27, %v4524_v12  ;;  %v8136_v9 = vor.u32 %v9144_v1, %v8135_v63  ;;  %v7379_v12 = vld [vmem:[#allocation5 + $0xc98] sm:$0xf]  ;;  %v7799_v63 = vld [vmem:[#allocation5 + $0xfe0] sm:$0xf] }
 0x109   :  { %4817 = vmatpush.bf16.msrb.mxu0 %v6704_v24  ;;  %v8871_v24 = vld [vmem:[#allocation5 + $0xa48] sm:$0xf0]  ;;  %v7124_v31 = vor.u32 %v8881_v20, %v7121_v21  ;;  %v6707_v21 = vld [vmem:[#allocation5 + $0x758] sm:$0xf]  ;;  %v7295_v27 = vld [vmem:[#allocation5 + $0xbf0] sm:$0xf] }
 0x10a   :  { %4843 = vmatpush.bf16.msrb.mxu2 %v8048_v25  ;;  %v7716_v25 = vor.u32 %v9039_v14, %v7715_v10  ;;  %v7044_v35 = vor.u32 %v8871_v24, %v7043_v23  ;;  %5712 = vst [vmem:[#allocation8 + $0x10] sm:$0x3f] %v4537_v30  ;;  %v6035_v10 = vld [vmem:[#allocation5 + $0x218] sm:$0xf]  ;;  %v9060_v1 = vld [vmem:[#allocation5 + $0x1030] sm:$0xf0] }
 0x10b   :  { %4805 = vmatpush.bf16.msra.mxu3 %v5948_v33  ;;  %v8303_v33 = vld [vmem:[#allocation5 + $0x13d0] sm:$0xf]  ;;  %v8051_v14 = vld [vmem:[#allocation5 + $0x11d8] sm:$0xf] }
 0x10c   :  { %4830 = vmatpush.bf16.msrb.mxu1 %v7376_v34  ;;  %v9186_v34 = vld [vmem:[#allocation5 + $0x1420] sm:$0xf0]  ;;  %v8052_v24 = vor.u32 %v9123_v15, %v8051_v14  ;;  %v8471_v14 = vld [vmem:[#allocation5 + $0x1520] sm:$0xf]  ;;  %v9228_v15 = vld [vmem:[#allocation5 + $0x1570] sm:$0xf0] }
 0x10d   :  { %4818 = vmatpush.bf16.msrb.mxu0 %v6620_v39  ;;  %v8850_v39 = vld [vmem:[#allocation5 + $0x9a0] sm:$0xf0]  ;;  %v8304_v41 = vor.u32 %v9186_v34, %v8303_v33 }
 0x10e   :  { %4844 = vmatpush.bf16.msrb.mxu2 %v7964_v40  ;;  %v7632_v40 = vor.u32 %v9018_v32, %v7631_v19  ;;  %v9102_v19 = vld [vmem:[#allocation5 + $0x1180] sm:$0xf0] }
 0x10f   :  { %4806 = vmatpush.bf16.msra.mxu3 %v5864_v51  ;;  %v6960_v51 = vor.u32 %v8850_v39, %v6959_v37  ;;  %v7296_v37 = vor.u32 %v8934_v28, %v7295_v27  ;;  %v7968_v39 = vor.u32 %v9102_v19, %v7967_v29  ;;  %v8472_v27 = vor.u32 %v9228_v15, %v8471_v14  ;;  %v9008_v28 = vld [vmem:[#allocation5 + $0xe94] sm:$0xf]  ;;  %v7633_v29 = vld [vmem:[#allocation5 + $0xee4] sm:$0xf0]  ;;  %v8609_v15 = vld [vmem:[#allocation5 + $0x21c] sm:$0xf] }
 0x110   :  { %4831 = vmatpush.bf16.msrb.mxu1 %v7292_v55  ;;  %v7548_v55 = vor.u32 %v8997_v45, %v7547_v44  ;;  %v7883_v44 = vld [vmem:[#allocation5 + $0x1088] sm:$0xf]  ;;  %v9081_v45 = vld [vmem:[#allocation5 + $0x10d8] sm:$0xf0] }
 0x111   :  { %4819 = vmatpush.bf16.msrb.mxu0 %v6536_v61  ;;  %v4538_v61 = vpop.f32.mrf.mxu2  ;;  %v4562_v3 = vpop.f32.mrf.mxu0  ;;  %v7884_v59 = vor.u32 %v9081_v45, %v7883_v44  ;;  %v8651_v44 = vld [vmem:[#allocation5 + $0x36c] sm:$0xf] }
 0x112   :  { %4845 = vmatpush.bf16.msrb.mxu2 %v7880_v62  ;;  %v8976_v62 = vld [vmem:[#allocation5 + $0xd90] sm:$0xf0]  ;;  %v7127_v61 = vld [vmem:[#allocation5 + $0xaa0] sm:$0xf] }
 0x113   :  { %4807 = vmatpush.bf16.msra.mxu3 %v5780_v7  ;;  %v8808_v7 = vld [vmem:[#allocation5 + $0x850] sm:$0xf0]  ;;  %v7464_v8 = vor.u32 %v8976_v62, %v7463_v60 }
 0x114   :  { %4832 = vmatpush.bf16.msrb.mxu1 %v7208_v11  ;;  %v8619_v11 = vld [vmem:[#allocation5 + $0x268] sm:$0xf0]  ;;  %v8556_v60 = vld [vmem:[#allocation5 + $0x70] sm:$0xf0] }
 0x115   :  { %4820 = vmatpush.bf16.msrb.mxu0 %v6452_v17  ;;  %v4549_v16 = vpop.f32.mrf.mxu3  ;;  %v6792_v17 = vor.u32 %v8808_v7, %v6791_v6  ;;  %v6036_v48 = vor.u32 %v8619_v11, %v6035_v10  ;;  %v8892_v62 = vld [vmem:[#allocation5 + $0xaf0] sm:$0xf0]  ;;  %v9029_v6 = vld [vmem:[#allocation5 + $0xf3c] sm:$0xf]  ;;  %v7717_v7 = vld [vmem:[#allocation5 + $0xf8c] sm:$0xf0] }
 0x116   :  { %4846 = vmatpush.bf16.msrb.mxu2 %v7796_v18  ;;  %4808 = vmatmul.bf16.vlgmr.msra.gmra.mxu3 %v9380_v46  ;;  %v4575_v18 = vpop.f32.mrf.mxu1  ;;  %v4550_v20 = vadd.f32 %v4549_v16, %v804_v4  ;;  %v6455_v10 = vld [vmem:[#allocation5 + $0x560] sm:$0xf]  ;;  %v8724_v11 = vld [vmem:[#allocation5 + $0x5b0] sm:$0xf0]  ;;  %v8693_v16 = vld [vmem:[#allocation5 + $0x4bc] sm:$0xf] }
 0x117   :  { %4859 = vmatpush.bf16.msrb.mxu3 %v8468_v13  ;;  %v8955_v13 = vld [vmem:[#allocation5 + $0xce8] sm:$0xf0] }
 0x118   :  { %4833 = vmatpush.bf16.msrb.mxu1 %v7124_v31  ;;  %4821 = vmatmul.bf16.vlgmr.msrb.gmra.mxu0 %v9387_v0  ;;  %v7380_v23 = vor.u32 %v8955_v13, %v7379_v12  ;;  %v4563_v33 = vadd.f32 %v4562_v3, %v4550_v20  ;;  %v7128_v12 = vor.u32 %v8892_v62, %v7127_v61  ;;  %v6373_v20 = vld [vmem:[#allocation5 + $0x50c] sm:$0xf0]  ;;  %v7465_v61 = vld [vmem:[#allocation5 + $0xd94] sm:$0xf0] }
 0x119   :  { %4865 = vmatpush.bf16.msra.mxu0 %v6372_v22  ;;  %4847 = vmatmul.bf16.vlgmr.msrb.gmra.mxu2 %v9384_v58  ;;  %v8787_v22 = vld [vmem:[#allocation5 + $0x7a8] sm:$0xf0]  ;;  %v4588_v30 = vpop.f32.mrf.mxu2  ;;  %v4564_v32 = vpop.f32.mrf.mxu0  ;;  %v7800_v13 = vor.u32 %v9060_v1, %v7799_v63  ;;  %v6376_v19 = vor.u32 %v8693_v16, %v6373_v20  ;;  %v8630_v1 = vld [vmem:[#allocation5 + $0x2c4] sm:$0xf]  ;;  %v8053_v20 = vld [vmem:[#allocation5 + $0x122c] sm:$0xf0] }
 0x11a   :  { %4891 = vmatpush.bf16.msra.mxu2 %v7716_v25  ;;  %v5951_v25 = vld [vmem:[#allocation5 + $0x170] sm:$0xf]  ;;  %v6708_v31 = vor.u32 %v8787_v22, %v6707_v21  ;;  %v6289_v32 = vld [vmem:[#allocation5 + $0x464] sm:$0xf0] }
 0x11b   :  { %4904 = vmatpush.bf16.msra.mxu3 %v8388_v26  ;;  %4834 = vmatmul.bf16.vlgmr.msrb.gmra.mxu1 %v9382_v50  ;;  %v8598_v26 = vld [vmem:[#allocation5 + $0x1c0] sm:$0xf0]  ;;  %v8389_v21 = vld [vmem:[#allocation5 + $0x14cc] sm:$0xf0] }
 0x11c   :  { %4878 = vmatpush.bf16.msra.mxu1 %v7044_v35  ;;  %v5952_v34 = vor.u32 %v8598_v26, %v5951_v25  ;;  %v6623_v35 = vld [vmem:[#allocation5 + $0x6b0] sm:$0xf]  ;;  %v6961_v25 = vld [vmem:[#allocation5 + $0x9a4] sm:$0xf0] }
 0x11d   :  { %4866 = vmatpush.bf16.msra.mxu0 %v6288_v36  ;;  %v8766_v36 = vld [vmem:[#allocation5 + $0x700] sm:$0xf0]  ;;  %v4551_v47 = vpop.f32.mrf.mxu3 }
 0x11e   :  { %4892 = vmatpush.bf16.msra.mxu2 %v7632_v40  ;;  %v5867_v40 = vld [vmem:[#allocation5 + $0xc8] sm:$0xf]  ;;  %v6624_v49 = vor.u32 %v8766_v36, %v6623_v35  ;;  %v7636_v36 = vor.u32 %v9008_v28, %v7633_v29  ;;  %v6205_v47 = vld [vmem:[#allocation5 + $0x3bc] sm:$0xf0] }
 0x11f   :  { %4905 = vmatpush.bf16.msra.mxu3 %v8304_v41  ;;  %v8577_v41 = vld [vmem:[#allocation5 + $0x118] sm:$0xf0]  ;;  %v8305_v35 = vld [vmem:[#allocation5 + $0x1424] sm:$0xf0]  ;;  %v6208_v62 = vor.u32 %v8651_v44, %v6205_v47  ;;  %v5869_v47 = vld [vmem:[#allocation5 + $0x11c] sm:$0xf0] }
 0x120   :  { %4879 = vmatpush.bf16.msra.mxu1 %v6960_v51  ;;  %v4577_v51 = vpop.f32.mrf.mxu1  ;;  %v5868_v53 = vor.u32 %v8577_v41, %v5867_v40  ;;  %v8987_v40 = vld [vmem:[#allocation5 + $0xdec] sm:$0xf]  ;;  %v7549_v41 = vld [vmem:[#allocation5 + $0xe3c] sm:$0xf0] }
 0x121   :  { %4867 = vmatpush.bf16.msra.mxu0 %v6204_v52  ;;  %v4576_v52 = vadd.f32 %v4575_v18, %v4563_v33  ;;  %v4590_v3 = vpop.f32.mrf.mxu2  ;;  %v7720_v18 = vor.u32 %v9029_v6, %v7717_v7  ;;  %v8221_v51 = vld [vmem:[#allocation5 + $0x137c] sm:$0xf0] }
 0x122   :  { %4893 = vmatpush.bf16.msra.mxu2 %v7548_v55  ;;  %v8745_v55 = vld [vmem:[#allocation5 + $0x658] sm:$0xf0]  ;;  %v6121_v3 = vld [vmem:[#allocation5 + $0x314] sm:$0xf0] }
 0x123   :  { %4906 = vmatpush.bf16.msra.mxu3 %v8220_v56  ;;  %v5783_v56 = vld [vmem:[#allocation5 + $0x20] sm:$0xf]  ;;  %v6540_v4 = vor.u32 %v8745_v55, %v6539_v54  ;;  %v7552_v55 = vor.u32 %v8987_v40, %v7549_v41  ;;  %v8903_v40 = vld [vmem:[#allocation5 + $0xb4c] sm:$0xf] }
 0x124   :  { %4880 = vmatpush.bf16.msra.mxu1 %v6876_v2  ;;  %v8861_v2 = vld [vmem:[#allocation5 + $0x9fc] sm:$0xf]  ;;  %v7213_v41 = vld [vmem:[#allocation5 + $0xb9c] sm:$0xf0] }
 0x125   :  { %4868 = vmatpush.bf16.msra.mxu0 %v6120_v5  ;;  %v7045_v5 = vld [vmem:[#allocation5 + $0xa4c] sm:$0xf0]  ;;  %v4601_v22 = vpop.f32.mrf.mxu3 }
 0x126   :  { %4894 = vmatpush.bf16.msra.mxu2 %v7464_v8  ;;  %8528 = vmatmul.msk.bf16.vlgmr.msrb.gmra.mxu3 %vm4341_vm0, %v9392_v38  ;;  %v4589_v8 = vadd.f32 %v4588_v30, %v4576_v52 }
 0x127   :  { %4907 = vmatpush.bf16.msra.mxu3 %v8136_v9  ;;  %v5784_v9 = vor.u32 %v8556_v60, %v5783_v56  ;;  %v8798_v56 = vld [vmem:[#allocation5 + $0x804] sm:$0xf] }
 0x128   :  { %4881 = vmatpush.bf16.msra.mxu1 %v6792_v17  ;;  %v7048_v17 = vor.u32 %v8861_v2, %v7045_v5  ;;  %v4602_v26 = vadd.f32 %v4601_v22, %v4589_v8  ;;  %v8966_v60 = vld [vmem:[#allocation5 + $0xd44] sm:$0xf]  ;;  %v8137_v5 = vld [vmem:[#allocation5 + $0x12d4] sm:$0xf0]  ;;  %v8777_v8 = vld [vmem:[#allocation5 + $0x75c] sm:$0xf] }
 0x129   :  { %4869 = vmatpush.bf16.msra.mxu0 %v6036_v48  ;;  %v9197_v48 = vld [vmem:[#allocation5 + $0x147c] sm:$0xf]  ;;  %v7468_v7 = vor.u32 %v8966_v60, %v7465_v61  ;;  %v7129_v60 = vld [vmem:[#allocation5 + $0xaf4] sm:$0xf0]  ;;  %v6379_v61 = vld [vmem:[#allocation5 + $0x4c0] sm:$0xf] }
 0x12a   :  { %4895 = vmatpush.bf16.msra.mxu2 %v7380_v23  ;;  %v6456_v23 = vor.u32 %v8724_v11, %v6455_v10  ;;  %v8392_v30 = vor.u32 %v9197_v48, %v8389_v21  ;;  %5713 = vst [vmem:[#allocation8 + $0x18] sm:$0x3f] %v4602_v26  ;;  %v8945_v11 = vld [vmem:[#allocation5 + $0xc9c] sm:$0xf]  ;;  %v8924_v26 = vld [vmem:[#allocation5 + $0xbf4] sm:$0xf] }
 0x12b   :  { %4908 = vmatpush.bf16.msra.mxu3 %v8052_v24  ;;  %v8840_v24 = vld [vmem:[#allocation5 + $0x954] sm:$0xf] }
 0x12c   :  { %4882 = vmatpush.bf16.msra.mxu1 %v6708_v31  ;;  %v8672_v31 = vld [vmem:[#allocation5 + $0x414] sm:$0xf]  ;;  %v6964_v33 = vor.u32 %v8840_v24, %v6961_v25  ;;  %v6625_v24 = vld [vmem:[#allocation5 + $0x704] sm:$0xf0] }
 0x12d   :  { %4870 = vmatpush.bf16.msra.mxu0 %v5952_v34  ;;  %v9176_v34 = vld [vmem:[#allocation5 + $0x13d4] sm:$0xf]  ;;  %v6292_v42 = vor.u32 %v8672_v31, %v6289_v32  ;;  %v4603_v52 = vpop.f32.mrf.mxu3  ;;  %v5953_v32 = vld [vmem:[#allocation5 + $0x1c4] sm:$0xf0] }
 0x12e   :  { %4896 = vmatpush.bf16.msra.mxu2 %v7296_v37  ;;  %v8819_v37 = vld [vmem:[#allocation5 + $0x8ac] sm:$0xf]  ;;  %v8308_v43 = vor.u32 %v9176_v34, %v8305_v35  ;;  %v7969_v34 = vld [vmem:[#allocation5 + $0x1184] sm:$0xf0]  ;;  %v7885_v52 = vld [vmem:[#allocation5 + $0x10dc] sm:$0xf0] }
 0x12f   :  { %4909 = vmatpush.bf16.msra.mxu3 %v7968_v39  ;;  %v6877_v39 = vld [vmem:[#allocation5 + $0x8fc] sm:$0xf0] }
 0x130   :  { %4883 = vmatpush.bf16.msra.mxu1 %v6624_v49  ;;  %v6880_v45 = vor.u32 %v8819_v37, %v6877_v39  ;;  %v9155_v49 = vld [vmem:[#allocation5 + $0x132c] sm:$0xf]  ;;  %v6541_v39 = vld [vmem:[#allocation5 + $0x65c] sm:$0xf0] }
 0x131   :  { %4871 = vmatpush.bf16.msra.mxu0 %v5868_v53  ;;  %v9451_v53 = vld [vmem:[#allocation7] sm:$0xff]  ;;  %v8224_v63 = vor.u32 %v9155_v49, %v8221_v51 }
 0x132   :  { %4897 = vmatpush.bf16.msra.mxu2 %v7212_v57  ;;  %v805_v54 = vperm.slane %v9451_v53, 4  ;;  %v6793_v57 = vld [vmem:[#allocation5 + $0x854] sm:$0xf0]  ;;  %v8735_v37 = vld [vmem:[#allocation5 + $0x60c] sm:$0xf] }
 0x133   :  { %4910 = vmatpush.bf16.msra.mxu3 %v7884_v59  ;;  %v4614_v59 = vpop.f32.mrf.mxu0  ;;  %v6796_v2 = vor.u32 %v8798_v56, %v6793_v57  ;;  %v9071_v49 = vld [vmem:[#allocation5 + $0x108c] sm:$0xf]  ;;  %v6544_v51 = vor.u32 %v8735_v37, %v6541_v39  ;;  %v7216_v57 = vor.u32 %v8903_v40, %v7213_v41  ;;  %v6883_v37 = vld [vmem:[#allocation5 + $0x8b0] sm:$0xf]  ;;  %v8830_v39 = vld [vmem:[#allocation5 + $0x900] sm:$0xf0] }
 0x134   :  { %4884 = vmatpush.bf16.msra.mxu1 %v6540_v4  ;;  %v9134_v4 = vld [vmem:[#allocation5 + $0x1284] sm:$0xf]  ;;  %v4615_v6 = vadd.f32 %v4614_v59, %v805_v54  ;;  %v4627_v10 = vpop.f32.mrf.mxu1  ;;  %v8311_v41 = vld [vmem:[#allocation5 + $0x13d8] sm:$0xf] }
 0x135   :  { %4872 = vmatpush.bf16.msra.mxu0 %v5784_v9  ;;  %v6709_v9 = vld [vmem:[#allocation5 + $0x7ac] sm:$0xf0]  ;;  %v8140_v14 = vor.u32 %v9134_v4, %v8137_v5  ;;  %v8714_v54 = vld [vmem:[#allocation5 + $0x564] sm:$0xf] }
 0x136   :  { %4898 = vmatpush.bf16.msra.mxu2 %v7128_v12  ;;  %v7381_v12 = vld [vmem:[#allocation5 + $0xcec] sm:$0xf0]  ;;  %v6712_v16 = vor.u32 %v8777_v8, %v6709_v9  ;;  %v4628_v48 = vadd.f32 %v4627_v10, %v4615_v6  ;;  %v8882_v59 = vld [vmem:[#allocation5 + $0xaa4] sm:$0xf]  ;;  %v7888_v6 = vor.u32 %v9071_v49, %v7885_v52  ;;  %v5785_v8 = vld [vmem:[#allocation5 + $0x74] sm:$0xf0] }
 0x137   :  { %4911 = vmatpush.bf16.msra.mxu3 %v7800_v13  ;;  %v6124_v13 = vor.u32 %v8630_v1, %v6121_v3  ;;  %v7384_v22 = vor.u32 %v8945_v11, %v7381_v12  ;;  %v8704_v1 = vld [vmem:[#allocation5 + $0x510] sm:$0xf0]  ;;  %v9050_v9 = vld [vmem:[#allocation5 + $0xfe4] sm:$0xf]  ;;  %v7801_v12 = vld [vmem:[#allocation5 + $0x1034] sm:$0xf0] }
 0x138   :  { %4885 = vmatpush.bf16.msra.mxu1 %v6456_v23  ;;  %4873 = vmatmul.bf16.vlgmr.msra.gmra.mxu0 %v9380_v46  ;;  %v4640_v21 = vpop.f32.mrf.mxu2  ;;  %v8756_v23 = vld [vmem:[#allocation5 + $0x6b4] sm:$0xf]  ;;  %v6127_v49 = vld [vmem:[#allocation5 + $0x2c8] sm:$0xf] }
 0x139   :  { %4899 = vmatmul.bf16.vlgmr.msra.gmra.mxu2 %v9382_v50  ;;  %4924 = vmatpush.bf16.msrb.mxu0 %v8472_v27  ;;  %v7297_v27 = vld [vmem:[#allocation5 + $0xc44] sm:$0xf0]  ;;  %v4653_v28 = vpop.f32.mrf.mxu3  ;;  %v6628_v31 = vor.u32 %v8756_v23, %v6625_v24  ;;  %v4641_v35 = vadd.f32 %v4640_v21, %v4628_v48  ;;  %v8872_v3 = vld [vmem:[#allocation5 + $0xa50] sm:$0xf0]  ;;  %v6295_v48 = vld [vmem:[#allocation5 + $0x418] sm:$0xf]  ;;  %v7804_v23 = vor.u32 %v9050_v9, %v7801_v12 }
 0x13a   :  { %4943 = vmatpush.bf16.msrb.mxu2 %v7048_v17  ;;  %4912 = vmatmul.bf16.vlgmr.msra.gmra.mxu3 %v9384_v58  ;;  %v6037_v17 = vld [vmem:[#allocation5 + $0x26c] sm:$0xf0]  ;;  %v8683_v21 = vld [vmem:[#allocation5 + $0x468] sm:$0xf0]  ;;  %v6967_v24 = vld [vmem:[#allocation5 + $0x958] sm:$0xf] }
 0x13b   :  { %4956 = vmatpush.bf16.msrb.mxu3 %v7720_v18  ;;  %4886 = vmatmul.bf16.vlgmr.msra.gmra.mxu1 %v9387_v0  ;;  %v9113_v18 = vld [vmem:[#allocation5 + $0x11dc] sm:$0xf]  ;;  %v4616_v25 = vpop.f32.mrf.mxu0  ;;  %v6040_v29 = vor.u32 %v8609_v15, %v6037_v17  ;;  %v4654_v56 = vadd.f32 %v4653_v28, %v4641_v35  ;;  %v7132_v15 = vor.u32 %v8882_v59, %v7129_v60  ;;  %v9218_v17 = vld [vmem:[#allocation5 + $0x1524] sm:$0xf]  ;;  %v8395_v28 = vld [vmem:[#allocation5 + $0x1480] sm:$0xf] }
 0x13c   :  { %4930 = vmatpush.bf16.msrb.mxu1 %v6376_v19  ;;  %v8056_v19 = vor.u32 %v9113_v18, %v8053_v20  ;;  %v8473_v18 = vld [vmem:[#allocation5 + $0x1574] sm:$0xf0]  ;;  %v8851_v25 = vld [vmem:[#allocation5 + $0x9a8] sm:$0xf0]  ;;  %v9166_v59 = vld [vmem:[#allocation5 + $0x1380] sm:$0xf0] }
 0x13d   :  { %4969 = vmatpush.bf16.msra.mxu0 %v8392_v30  ;;  %v8588_v30 = vld [vmem:[#allocation5 + $0x174] sm:$0xf]  ;;  %v8143_v9 = vld [vmem:[#allocation5 + $0x1288] sm:$0xf]  ;;  %v7387_v12 = vld [vmem:[#allocation5 + $0xca0] sm:$0xf] }
 0x13e   :  { %4944 = vmatpush.bf16.msrb.mxu2 %v6964_v33  ;;  %v9092_v33 = vld [vmem:[#allocation5 + $0x1134] sm:$0xf] }
 0x13f   :  { %4957 = vmatpush.bf16.msrb.mxu3 %v7636_v36  ;;  %v7300_v36 = vor.u32 %v8924_v26, %v7297_v27  ;;  %v7972_v44 = vor.u32 %v9092_v33, %v7969_v34  ;;  %v8476_v27 = vor.u32 %v9218_v17, %v8473_v18  ;;  %v6211_v33 = vld [vmem:[#allocation5 + $0x370] sm:$0xf]  ;;  %v8662_v34 = vld [vmem:[#allocation5 + $0x3c0] sm:$0xf0] }
 0x140   :  { %4931 = vmatpush.bf16.msrb.mxu1 %v6292_v42  ;;  %v4629_v42 = vpop.f32.mrf.mxu1 }
 0x141   :  { %4970 = vmatpush.bf16.msra.mxu0 %v8308_v43  ;;  %v5956_v43 = vor.u32 %v8588_v30, %v5953_v32  ;;  %v4655_v10 = vpop.f32.mrf.mxu3  ;;  %v7639_v30 = vld [vmem:[#allocation5 + $0xe98] sm:$0xf]  ;;  %v6968_v32 = vor.u32 %v8851_v25, %v6967_v24  ;;  %v9187_v42 = vld [vmem:[#allocation5 + $0x1428] sm:$0xf0]  ;;  %v9124_v24 = vld [vmem:[#allocation5 + $0x1230] sm:$0xf0] }
 0x142   :  { %4945 = vmatpush.bf16.msrb.mxu2 %v6880_v45  ;;  %v8567_v45 = vld [vmem:[#allocation5 + $0xcc] sm:$0xf]  ;;  %v8312_v52 = vor.u32 %v9187_v42, %v8311_v41  ;;  %v9145_v10 = vld [vmem:[#allocation5 + $0x12d8] sm:$0xf0] }
 0x143   :  { %4958 = vmatpush.bf16.msrb.mxu3 %v7552_v55  ;;  %v6457_v55 = vld [vmem:[#allocation5 + $0x5b4] sm:$0xf0]  ;;  %v5872_v5 = vor.u32 %v8567_v45, %v5869_v47  ;;  %v8998_v45 = vld [vmem:[#allocation5 + $0xe40] sm:$0xf0]  ;;  %v6884_v47 = vor.u32 %v8830_v39, %v6883_v37 }
 0x144   :  { %4932 = vmatpush.bf16.msrb.mxu1 %v6208_v62  ;;  %v4642_v62 = vpop.f32.mrf.mxu2  ;;  %v6460_v11 = vor.u32 %v8714_v54, %v6457_v55  ;;  %v6799_v54 = vld [vmem:[#allocation5 + $0x808] sm:$0xf]  ;;  %v8809_v55 = vld [vmem:[#allocation5 + $0x858] sm:$0xf0]  ;;  %v7975_v39 = vld [vmem:[#allocation5 + $0x1138] sm:$0xf] }
 0x145   :  { %4971 = vmatpush.bf16.msra.mxu0 %v8224_v63  ;;  %v4666_v63 = vpop.f32.mrf.mxu0  ;;  %v8977_v62 = vld [vmem:[#allocation5 + $0xd98] sm:$0xf0] }
 0x146   :  { %4946 = vmatpush.bf16.msrb.mxu2 %v6796_v2  ;;  %v7051_v2 = vld [vmem:[#allocation5 + $0xa00] sm:$0xf]  ;;  %v4667_v4 = vadd.f32 %v4666_v63, %v4654_v56  ;;  %v6800_v63 = vor.u32 %v8809_v55, %v6799_v54 }
 0x147   :  { %4959 = vmatpush.bf16.msrb.mxu3 %v7468_v7  ;;  %v8546_v7 = vld [vmem:[#allocation5 + $0x24] sm:$0xf]  ;;  %v7052_v20 = vor.u32 %v8872_v3, %v7051_v2  ;;  %v8620_v2 = vld [vmem:[#allocation5 + $0x270] sm:$0xf0] }
 0x148   :  { %4933 = vmatpush.bf16.msrb.mxu1 %v6124_v13  ;;  %8529 = vmatmul.msk.bf16.vlgmr.msrb.gmra.mxu0 %vm4341_vm0, %v9392_v38  ;;  %v7723_v13 = vld [vmem:[#allocation5 + $0xf40] sm:$0xf]  ;;  %5714 = vst [vmem:[#allocation8 + $0x20] sm:$0x3f] %v4667_v4  ;;  %v806_v4 = vperm.slane %v9451_v53, 5 }
 0x149   :  { %4972 = vmatpush.bf16.msra.mxu0 %v8140_v14  ;;  %v9040_v14 = vld [vmem:[#allocation5 + $0xf90] sm:$0xf0] }
 0x14a   :  { %4947 = vmatpush.bf16.msrb.mxu2 %v6712_v16  ;;  %v6380_v16 = vor.u32 %v8704_v1, %v6379_v61  ;;  %v7724_v26 = vor.u32 %v9040_v14, %v7723_v13  ;;  %v7471_v61 = vld [vmem:[#allocation5 + $0xd48] sm:$0xf]  ;;  %v6043_v1 = vld [vmem:[#allocation5 + $0x220] sm:$0xf]  ;;  %v8956_v13 = vld [vmem:[#allocation5 + $0xcf0] sm:$0xf0] }
 0x14b   :  { %4960 = vmatpush.bf16.msrb.mxu3 %v7384_v22  ;;  %v5788_v22 = vor.u32 %v8546_v7, %v5785_v8  ;;  %v8788_v7 = vld [vmem:[#allocation5 + $0x7b0] sm:$0xf0]  ;;  %v7472_v8 = vor.u32 %v8977_v62, %v7471_v61  ;;  %v9082_v62 = vld [vmem:[#allocation5 + $0x10e0] sm:$0xf0] }
 0x14c   :  { %4934 = vmatpush.bf16.msrb.mxu1 %v6040_v29  ;;  %v9208_v29 = vld [vmem:[#allocation5 + $0x14d0] sm:$0xf0] }
 0x14d   :  { %4973 = vmatpush.bf16.msra.mxu0 %v8056_v19  ;;  %v6296_v19 = vor.u32 %v8683_v21, %v6295_v48  ;;  %v4668_v35 = vpop.f32.mrf.mxu0  ;;  %v6631_v48 = vld [vmem:[#allocation5 + $0x6b8] sm:$0xf]  ;;  %v8767_v21 = vld [vmem:[#allocation5 + $0x708] sm:$0xf0] }
 0x14e   :  { %4948 = vmatpush.bf16.msrb.mxu2 %v6628_v31  ;;  %v9019_v31 = vld [vmem:[#allocation5 + $0xee8] sm:$0xf0]  ;;  %v8746_v35 = vld [vmem:[#allocation5 + $0x660] sm:$0xf0] }
 0x14f   :  { %4961 = vmatpush.bf16.msrb.mxu3 %v7300_v36  ;;  %v8396_v36 = vor.u32 %v9208_v29, %v8395_v28  ;;  %v7640_v40 = vor.u32 %v9019_v31, %v7639_v30  ;;  %v8935_v28 = vld [vmem:[#allocation5 + $0xc48] sm:$0xf0]  ;;  %v6632_v29 = vor.u32 %v8767_v21, %v6631_v48  ;;  %v8578_v30 = vld [vmem:[#allocation5 + $0x120] sm:$0xf0]  ;;  %v8673_v48 = vld [vmem:[#allocation5 + $0x41c] sm:$0xf] }
 0x150   :  { %4935 = vmatpush.bf16.msrb.mxu1 %v5956_v43  ;;  %v6212_v43 = vor.u32 %v8662_v34, %v6211_v33  ;;  %v6547_v34 = vld [vmem:[#allocation5 + $0x610] sm:$0xf] }
 0x151   :  { %4974 = vmatpush.bf16.msra.mxu0 %v7972_v44  ;;  %v7555_v44 = vld [vmem:[#allocation5 + $0xdf0] sm:$0xf] }
 0x152   :  { %4949 = vmatpush.bf16.msrb.mxu2 %v6544_v51  ;;  %v8641_v51 = vld [vmem:[#allocation5 + $0x318] sm:$0xf0]  ;;  %v7556_v56 = vor.u32 %v8998_v45, %v7555_v44  ;;  %v8914_v44 = vld [vmem:[#allocation5 + $0xba0] sm:$0xf0]  ;;  %v5791_v45 = vld [vmem:[#allocation5 + $0x28] sm:$0xf] }
 0x153   :  { %4962 = vmatpush.bf16.msrb.mxu3 %v7216_v57  ;;  %v8227_v57 = vld [vmem:[#allocation5 + $0x1330] sm:$0xf]  ;;  %v6128_v60 = vor.u32 %v8641_v51, %v6127_v49  ;;  %v8557_v49 = vld [vmem:[#allocation5 + $0x78] sm:$0xf0]  ;;  %v6463_v51 = vld [vmem:[#allocation5 + $0x568] sm:$0xf] }
 0x154   :  { %4936 = vmatpush.bf16.msrb.mxu1 %v5872_v5  ;;  %v8228_v3 = vor.u32 %v9166_v59, %v8227_v57  ;;  %v4679_v5 = vpop.f32.mrf.mxu1  ;;  %v8479_v57 = vld [vmem:[#allocation5 + $0x1528] sm:$0xf]  ;;  %v9229_v59 = vld [vmem:[#allocation5 + $0x1578] sm:$0xf0]  ;;  %v6297_v21 = vld [vmem:[#allocation5 + $0x46c] sm:$0xf0] }
 0x155   :  { %4975 = vmatpush.bf16.msra.mxu0 %v7888_v6  ;;  %v6715_v6 = vld [vmem:[#allocation5 + $0x760] sm:$0xf]  ;;  %v4718_v17 = vpop.f32.mrf.mxu0  ;;  %v4680_v18 = vadd.f32 %v4679_v5, %v806_v4  ;;  %v7135_v4 = vld [vmem:[#allocation5 + $0xaa8] sm:$0xf]  ;;  %v8893_v5 = vld [vmem:[#allocation5 + $0xaf8] sm:$0xf0] }
 0x156   :  { %4950 = vmatpush.bf16.msrb.mxu2 %v6460_v11  ;;  %v6044_v11 = vor.u32 %v8620_v2, %v6043_v1  ;;  %v6716_v14 = vor.u32 %v8788_v7, %v6715_v6  ;;  %v6381_v1 = vld [vmem:[#allocation5 + $0x514] sm:$0xf0]  ;;  %v8862_v6 = vld [vmem:[#allocation5 + $0xa04] sm:$0xf] }
 0x157   :  { %4963 = vmatpush.bf16.msrb.mxu3 %v7132_v15  ;;  %v5959_v15 = vld [vmem:[#allocation5 + $0x178] sm:$0xf] }
 0x158   :  { %4937 = vmatpush.bf16.msrb.mxu1 %v5788_v22  ;;  %v7388_v22 = vor.u32 %v8956_v13, %v7387_v12  ;;  %v4692_v31 = vpop.f32.mrf.mxu2 }
 0x159   :  { %4976 = vmatpush.bf16.msra.mxu0 %v7804_v23  ;;  %4951 = vmatmul.bf16.vlgmr.msrb.gmra.mxu2 %v9387_v0  ;;  %v8059_v23 = vld [vmem:[#allocation5 + $0x11e0] sm:$0xf]  ;;  %v4705_v25 = vpop.f32.mrf.mxu3 }
 0x15a   :  { %4995 = vmatpush.bf16.msra.mxu2 %v6380_v16  ;;  %4964 = vmatmul.bf16.vlgmr.msrb.gmra.mxu3 %v9382_v50  ;;  %v8599_v16 = vld [vmem:[#allocation5 + $0x1c8] sm:$0xf0] }
 0x15b   :  { %5008 = vmatpush.bf16.msra.mxu3 %v7052_v20  ;;  %4938 = vmatmul.bf16.vlgmr.msrb.gmra.mxu1 %v9380_v46  ;;  %v8144_v20 = vor.u32 %v9145_v10, %v8143_v9  ;;  %v7053_v9 = vld [vmem:[#allocation5 + $0xa54] sm:$0xf0]  ;;  %v9198_v10 = vld [vmem:[#allocation5 + $0x1484] sm:$0xf] }
 0x15c   :  { %4989 = vmatpush.bf16.msra.mxu1 %v8476_v27  ;;  %4977 = vmatmul.bf16.vlgmr.msra.gmra.mxu0 %v9384_v58  ;;  %v7303_v27 = vld [vmem:[#allocation5 + $0xbf8] sm:$0xf]  ;;  %v4681_v33 = vpop.f32.mrf.mxu1 }
 0x15d   :  { %5021 = vmatpush.bf16.msrb.mxu0 %v7724_v26  ;;  %v5960_v26 = vor.u32 %v8599_v16, %v5959_v15  ;;  %v7304_v37 = vor.u32 %v8935_v28, %v7303_v27  ;;  %v4720_v54 = vpop.f32.mrf.mxu0  ;;  %v7807_v16 = vld [vmem:[#allocation5 + $0xfe8] sm:$0xf]  ;;  %v6969_v27 = vld [vmem:[#allocation5 + $0x9ac] sm:$0xf0]  ;;  %v9177_v28 = vld [vmem:[#allocation5 + $0x13dc] sm:$0xf] }
 0x15e   :  { %4996 = vmatpush.bf16.msra.mxu2 %v6296_v19  ;;  %v5875_v19 = vld [vmem:[#allocation5 + $0xd0] sm:$0xf]  ;;  %v6213_v33 = vld [vmem:[#allocation5 + $0x3c4] sm:$0xf0]  ;;  %v8988_v54 = vld [vmem:[#allocation5 + $0xdf4] sm:$0xf] }
 0x15f   :  { %5009 = vmatpush.bf16.msra.mxu3 %v6968_v32  ;;  %v8060_v32 = vor.u32 %v9124_v24, %v8059_v23  ;;  %v5876_v41 = vor.u32 %v8578_v30, %v5875_v19  ;;  %v7056_v23 = vor.u32 %v8862_v6, %v7053_v9  ;;  %v6300_v30 = vor.u32 %v8673_v48, %v6297_v21  ;;  %v7473_v6 = vld [vmem:[#allocation5 + $0xd9c] sm:$0xf0]  ;;  %v6717_v9 = vld [vmem:[#allocation5 + $0x7b4] sm:$0xf0]  ;;  %v8946_v21 = vld [vmem:[#allocation5 + $0xca4] sm:$0xf] }
 0x160   :  { %5034 = vmatpush.bf16.msrb.mxu1 %v8396_v36  ;;  %v4693_v36 = vadd.f32 %v4692_v31, %v4680_v18  ;;  %v4694_v12 = vpop.f32.mrf.mxu2 }
 0x161   :  { %5022 = vmatpush.bf16.msrb.mxu0 %v7640_v40  ;;  %v9103_v40 = vld [vmem:[#allocation5 + $0x1188] sm:$0xf0]  ;;  %v4707_v2 = vpop.f32.mrf.mxu3 }
 0x162   :  { %4997 = vmatpush.bf16.msra.mxu2 %v6212_v43  ;;  %v4706_v42 = vadd.f32 %v4705_v25, %v4693_v36  ;;  %v7219_v43 = vld [vmem:[#allocation5 + $0xb50] sm:$0xf]  ;;  %v7976_v55 = vor.u32 %v9103_v40, %v7975_v39  ;;  %v7725_v25 = vld [vmem:[#allocation5 + $0xf94] sm:$0xf0]  ;;  %v9009_v36 = vld [vmem:[#allocation5 + $0xe9c] sm:$0xf] }
 0x163   :  { %5010 = vmatpush.bf16.msra.mxu3 %v6884_v47  ;;  %v6548_v47 = vor.u32 %v8746_v35, %v6547_v34  ;;  %v8820_v39 = vld [vmem:[#allocation5 + $0x8b4] sm:$0xf]  ;;  %v6885_v40 = vld [vmem:[#allocation5 + $0x904] sm:$0xf0]  ;;  %v807_v2 = vperm.slane %v9451_v53, 6 }
 0x164   :  { %5035 = vmatpush.bf16.msrb.mxu1 %v8312_v52  ;;  %v8725_v52 = vld [vmem:[#allocation5 + $0x5b8] sm:$0xf0]  ;;  %v4719_v61 = vadd.f32 %v4718_v17, %v4706_v42  ;;  %v4731_v15 = vpop.f32.mrf.mxu1  ;;  %v8229_v42 = vld [vmem:[#allocation5 + $0x1384] sm:$0xf0] }
 0x165   :  { %5023 = vmatpush.bf16.msrb.mxu0 %v7556_v56  ;;  %v7891_v56 = vld [vmem:[#allocation5 + $0x1090] sm:$0xf]  ;;  %v6464_v7 = vor.u32 %v8725_v52, %v6463_v51  ;;  %v9061_v17 = vld [vmem:[#allocation5 + $0x1038] sm:$0xf0]  ;;  %v6888_v51 = vor.u32 %v8820_v39, %v6885_v40  ;;  %v6549_v39 = vld [vmem:[#allocation5 + $0x664] sm:$0xf0] }
 0x166   :  { %4998 = vmatpush.bf16.msra.mxu2 %v6128_v60  ;;  %v7220_v60 = vor.u32 %v8914_v44, %v7219_v43  ;;  %v7892_v13 = vor.u32 %v9082_v62, %v7891_v56  ;;  %v4732_v18 = vadd.f32 %v4731_v15, %v4719_v61  ;;  %v7808_v19 = vor.u32 %v9061_v17, %v7807_v16  ;;  %v8799_v56 = vld [vmem:[#allocation5 + $0x80c] sm:$0xf]  ;;  %v8589_v17 = vld [vmem:[#allocation5 + $0x17c] sm:$0xf]  ;;  %v9072_v40 = vld [vmem:[#allocation5 + $0x1094] sm:$0xf] }
 0x167   :  { %5011 = vmatpush.bf16.msra.mxu3 %v6800_v63  ;;  %v8694_v63 = vld [vmem:[#allocation5 + $0x4c4] sm:$0xf] }
 0x168   :  { %5036 = vmatpush.bf16.msrb.mxu1 %v8228_v3  ;;  %v5792_v3 = vor.u32 %v8557_v49, %v5791_v45  ;;  %5715 = vst [vmem:[#allocation8 + $0x28] sm:$0x3f] %v4732_v18  ;;  %v6129_v49 = vld [vmem:[#allocation5 + $0x31c] sm:$0xf0]  ;;  %v5961_v18 = vld [vmem:[#allocation5 + $0x1cc] sm:$0xf0] }
 0x169   :  { %5024 = vmatpush.bf16.msrb.mxu0 %v7472_v8  ;;  %v8480_v8 = vor.u32 %v9229_v59, %v8479_v57  ;;  %v6801_v57 = vld [vmem:[#allocation5 + $0x85c] sm:$0xf0]  ;;  %v9135_v59 = vld [vmem:[#allocation5 + $0x128c] sm:$0xf] }
 0x16a   :  { %4999 = vmatpush.bf16.msra.mxu2 %v6044_v11  ;;  %v8397_v11 = vld [vmem:[#allocation5 + $0x14d4] sm:$0xf0] }
 0x16b   :  { %5012 = vmatpush.bf16.msra.mxu3 %v6716_v14  ;;  %8530 = vmatmul.msk.bf16.vlgmr.msra.gmra.mxu1 %vm4341_vm0, %v9392_v38  ;;  %v6384_v14 = vor.u32 %v8694_v63, %v6381_v1  ;;  %v8400_v24 = vor.u32 %v9198_v10, %v8397_v11  ;;  %v8610_v63 = vld [vmem:[#allocation5 + $0x224] sm:$0xf]  ;;  %v6045_v1 = vld [vmem:[#allocation5 + $0x274] sm:$0xf0] }
 0x16c   :  { %5037 = vmatpush.bf16.msrb.mxu1 %v8144_v20  ;;  %v7136_v20 = vor.u32 %v8893_v5, %v7135_v4  ;;  %v4733_v44 = vpop.f32.mrf.mxu1  ;;  %v8967_v5 = vld [vmem:[#allocation5 + $0xd4c] sm:$0xf]  ;;  %v9114_v10 = vld [vmem:[#allocation5 + $0x11e4] sm:$0xf]  ;;  %v8061_v11 = vld [vmem:[#allocation5 + $0x1234] sm:$0xf0]  ;;  %v6048_v12 = vor.u32 %v8610_v63, %v6045_v1 }
 0x16d   :  { %5025 = vmatpush.bf16.msrb.mxu0 %v7388_v22  ;;  %v9030_v22 = vld [vmem:[#allocation5 + $0xf44] sm:$0xf]  ;;  %v7476_v16 = vor.u32 %v8967_v5, %v7473_v6  ;;  %v8064_v48 = vor.u32 %v9114_v10, %v8061_v11  ;;  %v8547_v44 = vld [vmem:[#allocation5 + $0x2c] sm:$0xf]  ;;  %v7809_v1 = vld [vmem:[#allocation5 + $0x103c] sm:$0xf0] }
 0x16e   :  { %5000 = vmatpush.bf16.msra.mxu2 %v5960_v26  ;;  %v8841_v26 = vld [vmem:[#allocation5 + $0x95c] sm:$0xf]  ;;  %v7728_v31 = vor.u32 %v9030_v22, %v7725_v25  ;;  %v7389_v22 = vld [vmem:[#allocation5 + $0xcf4] sm:$0xf0]  ;;  %v6633_v25 = vld [vmem:[#allocation5 + $0x70c] sm:$0xf0] }
 0x16f   :  { %5013 = vmatpush.bf16.msra.mxu3 %v6632_v29  ;;  %v8313_v29 = vld [vmem:[#allocation5 + $0x142c] sm:$0xf0]  ;;  %v6972_v34 = vor.u32 %v8841_v26, %v6969_v27  ;;  %v9093_v26 = vld [vmem:[#allocation5 + $0x113c] sm:$0xf]  ;;  %v9051_v63 = vld [vmem:[#allocation5 + $0xfec] sm:$0xf] }
 0x170   :  { %5038 = vmatpush.bf16.msrb.mxu1 %v8060_v32  ;;  %v8652_v32 = vld [vmem:[#allocation5 + $0x374] sm:$0xf]  ;;  %v8316_v35 = vor.u32 %v9177_v28, %v8313_v29  ;;  %v7977_v27 = vld [vmem:[#allocation5 + $0x118c] sm:$0xf0]  ;;  %v5964_v28 = vor.u32 %v8589_v17, %v5961_v18  ;;  %v7392_v29 = vor.u32 %v8946_v21, %v7389_v22  ;;  %v7731_v5 = vld [vmem:[#allocation5 + $0xf48] sm:$0xf] }
 0x171   :  { %5026 = vmatpush.bf16.msrb.mxu0 %v7304_v37  ;;  %v7641_v37 = vld [vmem:[#allocation5 + $0xeec] sm:$0xf0]  ;;  %v6216_v43 = vor.u32 %v8652_v32, %v6213_v33  ;;  %v7980_v33 = vor.u32 %v9093_v26, %v7977_v27  ;;  %v8403_v10 = vld [vmem:[#allocation5 + $0x1488] sm:$0xf]  ;;  %v9209_v11 = vld [vmem:[#allocation5 + $0x14d8] sm:$0xf0] }
 0x172   :  { %5001 = vmatpush.bf16.msra.mxu2 %v5876_v41  ;;  %v9156_v41 = vld [vmem:[#allocation5 + $0x1334] sm:$0xf]  ;;  %v7644_v45 = vor.u32 %v9009_v36, %v7641_v37  ;;  %v7059_v18 = vld [vmem:[#allocation5 + $0xa08] sm:$0xf]  ;;  %v8404_v21 = vor.u32 %v9209_v11, %v8403_v10  ;;  %v9125_v10 = vld [vmem:[#allocation5 + $0x1238] sm:$0xf0] }
 0x173   :  { %5014 = vmatpush.bf16.msra.mxu3 %v6548_v47  ;;  %v8631_v47 = vld [vmem:[#allocation5 + $0x2cc] sm:$0xf]  ;;  %v8232_v52 = vor.u32 %v9156_v41, %v8229_v42  ;;  %v8736_v36 = vld [vmem:[#allocation5 + $0x614] sm:$0xf]  ;;  %v7893_v41 = vld [vmem:[#allocation5 + $0x10e4] sm:$0xf0] }
 0x174   :  { %5039 = vmatpush.bf16.msrb.mxu1 %v7976_v55  ;;  %v7557_v55 = vld [vmem:[#allocation5 + $0xe44] sm:$0xf0]  ;;  %v6132_v61 = vor.u32 %v8631_v47, %v6129_v49  ;;  %v5793_v49 = vld [vmem:[#allocation5 + $0x7c] sm:$0xf0]  ;;  %v9020_v27 = vld [vmem:[#allocation5 + $0xef0] sm:$0xf0] }
 0x175   :  { %5027 = vmatpush.bf16.msrb.mxu0 %v7220_v60  ;;  %v8145_v60 = vld [vmem:[#allocation5 + $0x12dc] sm:$0xf0]  ;;  %v7560_v62 = vor.u32 %v8988_v54, %v7557_v55  ;;  %v7221_v54 = vld [vmem:[#allocation5 + $0xba4] sm:$0xf0]  ;;  %v6552_v55 = vor.u32 %v8736_v36, %v6549_v39  ;;  %v8663_v36 = vld [vmem:[#allocation5 + $0x3c8] sm:$0xf0] }
 0x176   :  { %5002 = vmatpush.bf16.msra.mxu2 %v5792_v3  ;;  %v6804_v3 = vor.u32 %v8799_v56, %v6801_v57  ;;  %v8148_v4 = vor.u32 %v9135_v59, %v8145_v60  ;;  %v7896_v56 = vor.u32 %v9072_v40, %v7893_v41  ;;  %v8715_v57 = vld [vmem:[#allocation5 + $0x56c] sm:$0xf]  ;;  %v8481_v60 = vld [vmem:[#allocation5 + $0x157c] sm:$0xf0]  ;;  %v8235_v40 = vld [vmem:[#allocation5 + $0x1338] sm:$0xf] }
 0x177   :  { %5015 = vmatpush.bf16.msra.mxu3 %v6464_v7  ;;  %v8778_v7 = vld [vmem:[#allocation5 + $0x764] sm:$0xf]  ;;  %v9219_v59 = vld [vmem:[#allocation5 + $0x152c] sm:$0xf] }
 0x178   :  { %5040 = vmatpush.bf16.msrb.mxu1 %v7892_v13  ;;  %v4744_v13 = vpop.f32.mrf.mxu2  ;;  %v8999_v39 = vld [vmem:[#allocation5 + $0xe48] sm:$0xf0] }
 0x179   :  { %5028 = vmatpush.bf16.msrb.mxu0 %v7136_v20  ;;  %5003 = vmatmul.bf16.vlgmr.msra.gmra.mxu2 %v9380_v46  ;;  %v4745_v15 = vadd.f32 %v4744_v13, %v807_v2  ;;  %v6720_v20 = vor.u32 %v8778_v7, %v6717_v9  ;;  %v5796_v2 = vor.u32 %v8547_v44, %v5793_v49  ;;  %v9041_v9 = vld [vmem:[#allocation5 + $0xf98] sm:$0xf0]  ;;  %v9167_v41 = vld [vmem:[#allocation5 + $0x1388] sm:$0xf0]  ;;  %v6891_v44 = vld [vmem:[#allocation5 + $0x8b8] sm:$0xf] }
 0x17a   :  { %5054 = vmatpush.bf16.msrb.mxu2 %v8480_v8  ;;  %5016 = vmatmul.bf16.vlgmr.msra.gmra.mxu3 %v9387_v0  ;;  %v4770_v8 = vpop.f32.mrf.mxu0  ;;  %v7812_v13 = vor.u32 %v9051_v63, %v7809_v1  ;;  %v8236_v49 = vor.u32 %v9167_v41, %v8235_v40  ;;  %v6807_v1 = vld [vmem:[#allocation5 + $0x810] sm:$0xf] }
 0x17b   :  { %5060 = vmatpush.bf16.msrb.mxu3 %v6384_v14  ;;  %v9468_v14 = vpop.f32.mrf.mxu1 }
 0x17c   :  { %5041 = vmatpush.bf16.msrb.mxu1 %v7808_v19  ;;  %5029 = vmatmul.bf16.vlgmr.msrb.gmra.mxu0 %v9382_v50  ;;  %v8568_v19 = vld [vmem:[#allocation5 + $0xd4] sm:$0xf] }
 0x17d   :  { %5073 = vmatpush.bf16.msra.mxu0 %v7056_v23  ;;  %v8757_v23 = vld [vmem:[#allocation5 + $0x6bc] sm:$0xf] }
 0x17e   :  { %5099 = vmatpush.bf16.msra.mxu2 %v8400_v24  ;;  %v4757_v24 = vpop.f32.mrf.mxu3  ;;  %v6636_v32 = vor.u32 %v8757_v23, %v6633_v25  ;;  %v6303_v23 = vld [vmem:[#allocation5 + $0x420] sm:$0xf] }
 0x17f   :  { %5061 = vmatpush.bf16.msrb.mxu3 %v6300_v30  ;;  %5042 = vmatmul.bf16.vlgmr.msrb.gmra.mxu1 %v9384_v58  ;;  %v5877_v30 = vld [vmem:[#allocation5 + $0x124] sm:$0xf0] }
 0x180   :  { %5086 = vmatpush.bf16.msra.mxu1 %v7728_v31  ;;  %v4758_v31 = vadd.f32 %v4757_v24, %v4745_v15  ;;  %v5880_v42 = vor.u32 %v8568_v19, %v5877_v30  ;;  %v8883_v15 = vld [vmem:[#allocation5 + $0xaac] sm:$0xf]  ;;  %v8684_v24 = vld [vmem:[#allocation5 + $0x470] sm:$0xf0] }
 0x181   :  { %5074 = vmatpush.bf16.msra.mxu0 %v6972_v34  ;;  %v8925_v34 = vld [vmem:[#allocation5 + $0xbfc] sm:$0xf]  ;;  %v6304_v30 = vor.u32 %v8684_v24, %v6303_v23  ;;  %v8936_v23 = vld [vmem:[#allocation5 + $0xc50] sm:$0xf0]  ;;  %v7983_v24 = vld [vmem:[#allocation5 + $0x1140] sm:$0xf] }
 0x182   :  { %5100 = vmatpush.bf16.msra.mxu2 %v8316_v35  ;;  %v7305_v35 = vld [vmem:[#allocation5 + $0xc4c] sm:$0xf0]  ;;  %v4772_v37 = vpop.f32.mrf.mxu0 }
 0x183   :  { %5062 = vmatpush.bf16.msrb.mxu3 %v6216_v43  ;;  %v4746_v43 = vpop.f32.mrf.mxu2  ;;  %v7308_v47 = vor.u32 %v8925_v34, %v7305_v35  ;;  %v6219_v35 = vld [vmem:[#allocation5 + $0x378] sm:$0xf] }
 0x184   :  { %5087 = vmatpush.bf16.msra.mxu1 %v7644_v45  ;;  %v4785_v45 = vpop.f32.mrf.mxu1  ;;  %v7563_v37 = vld [vmem:[#allocation5 + $0xdf8] sm:$0xf]  ;;  %v6220_v43 = vor.u32 %v8663_v36, %v6219_v35  ;;  %v8915_v36 = vld [vmem:[#allocation5 + $0xba8] sm:$0xf0] }
 0x185   :  { %5075 = vmatpush.bf16.msra.mxu0 %v6888_v51  ;;  %v4771_v51 = vadd.f32 %v4770_v8, %v4758_v31  ;;  %v8484_v8 = vor.u32 %v9219_v59, %v8481_v60  ;;  %v6975_v31 = vld [vmem:[#allocation5 + $0x960] sm:$0xf]  ;;  %v8831_v45 = vld [vmem:[#allocation5 + $0x908] sm:$0xf0]  ;;  %v9146_v59 = vld [vmem:[#allocation5 + $0x12e0] sm:$0xf0] }
 0x186   :  { %5101 = vmatpush.bf16.msra.mxu2 %v8232_v52  ;;  %v8904_v52 = vld [vmem:[#allocation5 + $0xb54] sm:$0xf]  ;;  %v6892_v60 = vor.u32 %v8831_v45, %v6891_v44  ;;  %v7227_v35 = vld [vmem:[#allocation5 + $0xb58] sm:$0xf] }
 0x187   :  { %5063 = vmatpush.bf16.msrb.mxu3 %v6132_v61  ;;  %v4759_v61 = vpop.f32.mrf.mxu3  ;;  %v7224_v6 = vor.u32 %v8904_v52, %v7221_v54  ;;  %v4784_v7 = vadd.f32 %v9468_v14, %v4771_v51  ;;  %v7647_v14 = vld [vmem:[#allocation5 + $0xea0] sm:$0xf]  ;;  %v6135_v51 = vld [vmem:[#allocation5 + $0x2d0] sm:$0xf]  ;;  %v8642_v52 = vld [vmem:[#allocation5 + $0x320] sm:$0xf0] }
 0x188   :  { %5088 = vmatpush.bf16.msra.mxu1 %v7560_v62  ;;  %v6465_v62 = vld [vmem:[#allocation5 + $0x5bc] sm:$0xf0]  ;;  %v7479_v54 = vld [vmem:[#allocation5 + $0xd50] sm:$0xf]  ;;  %v6136_v63 = vor.u32 %v8642_v52, %v6135_v51  ;;  %v6555_v45 = vld [vmem:[#allocation5 + $0x618] sm:$0xf]  ;;  %v7228_v51 = vor.u32 %v8915_v36, %v7227_v35 }
 0x189   :  { %5076 = vmatpush.bf16.msra.mxu0 %v6804_v3  ;;  %8531 = vmatmul.msk.bf16.vlgmr.msrb.gmra.mxu2 %vm4341_vm0, %v9392_v38  ;;  %v6387_v3 = vld [vmem:[#allocation5 + $0x4c8] sm:$0xf]  ;;  %v7565_v35 = vld [vmem:[#allocation5 + $0xe4c] sm:$0xf0] }
 0x18a   :  { %5102 = vmatpush.bf16.msra.mxu2 %v8148_v4  ;;  %v8705_v4 = vld [vmem:[#allocation5 + $0x518] sm:$0xf0] }
 0x18b   :  { %5064 = vmatpush.bf16.msrb.mxu3 %v6048_v12  ;;  %v6468_v12 = vor.u32 %v8715_v57, %v6465_v62  ;;  %v6388_v17 = vor.u32 %v8705_v4, %v6387_v3  ;;  %v4796_v22 = vpop.f32.mrf.mxu2  ;;  %v8151_v57 = vld [vmem:[#allocation5 + $0x1290] sm:$0xf]  ;;  %v808_v62 = vperm.slane %v9451_v53, 7 }
 0x18c   :  { %5089 = vmatpush.bf16.msra.mxu1 %v7476_v16  ;;  %v7137_v16 = vld [vmem:[#allocation5 + $0xafc] sm:$0xf0]  ;;  %v4797_v25 = vadd.f32 %v4796_v22, %v4784_v7  ;;  %v8152_v4 = vor.u32 %v9146_v59, %v8151_v57  ;;  %v7395_v7 = vld [vmem:[#allocation5 + $0xca8] sm:$0xf]  ;;  %v7815_v57 = vld [vmem:[#allocation5 + $0xff0] sm:$0xf] }
 0x18d   :  { %5077 = vmatpush.bf16.msra.mxu0 %v6720_v20  ;;  %v8873_v20 = vld [vmem:[#allocation5 + $0xa58] sm:$0xf0]  ;;  %v7140_v26 = vor.u32 %v8883_v15, %v7137_v16  ;;  %v6723_v16 = vld [vmem:[#allocation5 + $0x768] sm:$0xf]  ;;  %v7311_v22 = vld [vmem:[#allocation5 + $0xc00] sm:$0xf] }
 0x18e   :  { %5103 = vmatpush.bf16.msra.mxu2 %v8064_v48  ;;  %v7732_v48 = vor.u32 %v9041_v9, %v7731_v5  ;;  %v7060_v19 = vor.u32 %v8873_v20, %v7059_v18  ;;  %5716 = vst [vmem:[#allocation8 + $0x30] sm:$0x3f] %v4797_v25  ;;  %v6051_v5 = vld [vmem:[#allocation5 + $0x228] sm:$0xf]  ;;  %v9062_v59 = vld [vmem:[#allocation5 + $0x1040] sm:$0xf0] }
 0x18f   :  { %5065 = vmatpush.bf16.msrb.mxu3 %v5964_v28  ;;  %v8319_v28 = vld [vmem:[#allocation5 + $0x13e0] sm:$0xf]  ;;  %v8067_v9 = vld [vmem:[#allocation5 + $0x11e8] sm:$0xf] }
 0x190   :  { %5090 = vmatpush.bf16.msra.mxu1 %v7392_v29  ;;  %v9188_v29 = vld [vmem:[#allocation5 + $0x1430] sm:$0xf0]  ;;  %v8068_v20 = vor.u32 %v9125_v10, %v8067_v9  ;;  %v8487_v9 = vld [vmem:[#allocation5 + $0x1530] sm:$0xf]  ;;  %v9230_v10 = vld [vmem:[#allocation5 + $0x1580] sm:$0xf0] }
 0x191   :  { %5078 = vmatpush.bf16.msra.mxu0 %v6636_v32  ;;  %v8852_v32 = vld [vmem:[#allocation5 + $0x9b0] sm:$0xf0]  ;;  %v8320_v34 = vor.u32 %v9188_v29, %v8319_v28 }
 0x192   :  { %5104 = vmatpush.bf16.msra.mxu2 %v7980_v33  ;;  %v7648_v33 = vor.u32 %v9020_v27, %v7647_v14  ;;  %v9104_v14 = vld [vmem:[#allocation5 + $0x1190] sm:$0xf0] }
 0x193   :  { %5066 = vmatpush.bf16.msrb.mxu3 %v5880_v42  ;;  %v6976_v42 = vor.u32 %v8852_v32, %v6975_v31  ;;  %v7312_v31 = vor.u32 %v8936_v23, %v7311_v22  ;;  %v7984_v32 = vor.u32 %v9104_v14, %v7983_v24  ;;  %v8488_v22 = vor.u32 %v9230_v10, %v8487_v9  ;;  %v9010_v23 = vld [vmem:[#allocation5 + $0xea4] sm:$0xf]  ;;  %v7649_v24 = vld [vmem:[#allocation5 + $0xef4] sm:$0xf0]  ;;  %v8611_v10 = vld [vmem:[#allocation5 + $0x22c] sm:$0xf] }
 0x194   :  { %5091 = vmatpush.bf16.msra.mxu1 %v7308_v47  ;;  %v7564_v47 = vor.u32 %v8999_v39, %v7563_v37  ;;  %v7899_v37 = vld [vmem:[#allocation5 + $0x1098] sm:$0xf]  ;;  %v9083_v39 = vld [vmem:[#allocation5 + $0x10e8] sm:$0xf0] }
 0x195   :  { %5079 = vmatpush.bf16.msra.mxu0 %v6552_v55  ;;  %v4798_v55 = vpop.f32.mrf.mxu2  ;;  %v4822_v61 = vpop.f32.mrf.mxu0  ;;  %v7900_v52 = vor.u32 %v9083_v39, %v7899_v37  ;;  %v8653_v39 = vld [vmem:[#allocation5 + $0x37c] sm:$0xf] }
 0x196   :  { %5105 = vmatpush.bf16.msra.mxu2 %v7896_v56  ;;  %v8978_v56 = vld [vmem:[#allocation5 + $0xda0] sm:$0xf0]  ;;  %v7143_v55 = vld [vmem:[#allocation5 + $0xab0] sm:$0xf] }
 0x197   :  { %5067 = vmatpush.bf16.msrb.mxu3 %v5796_v2  ;;  %v8810_v2 = vld [vmem:[#allocation5 + $0x860] sm:$0xf0]  ;;  %v7480_v3 = vor.u32 %v8978_v56, %v7479_v54 }
 0x198   :  { %5092 = vmatpush.bf16.msra.mxu1 %v7224_v6  ;;  %v8621_v6 = vld [vmem:[#allocation5 + $0x278] sm:$0xf0]  ;;  %v8558_v54 = vld [vmem:[#allocation5 + $0x80] sm:$0xf0] }
 0x199   :  { %5080 = vmatpush.bf16.msra.mxu0 %v6468_v12  ;;  %v4809_v11 = vpop.f32.mrf.mxu3  ;;  %v6808_v12 = vor.u32 %v8810_v2, %v6807_v1  ;;  %v6052_v53 = vor.u32 %v8621_v6, %v6051_v5  ;;  %v8894_v56 = vld [vmem:[#allocation5 + $0xb00] sm:$0xf0]  ;;  %v9031_v1 = vld [vmem:[#allocation5 + $0xf4c] sm:$0xf]  ;;  %v7733_v2 = vld [vmem:[#allocation5 + $0xf9c] sm:$0xf0] }
 0x19a   :  { %5106 = vmatpush.bf16.msra.mxu2 %v7812_v13  ;;  %5068 = vmatmul.bf16.vlgmr.msrb.gmra.mxu3 %v9380_v46  ;;  %v4835_v13 = vpop.f32.mrf.mxu1  ;;  %v4810_v15 = vadd.f32 %v4809_v11, %v808_v62  ;;  %v6471_v5 = vld [vmem:[#allocation5 + $0x570] sm:$0xf]  ;;  %v8726_v6 = vld [vmem:[#allocation5 + $0x5c0] sm:$0xf0]  ;;  %v8695_v11 = vld [vmem:[#allocation5 + $0x4cc] sm:$0xf] }
 0x19b   :  { %5119 = vmatpush.bf16.msra.mxu3 %v8484_v8  ;;  %v8957_v8 = vld [vmem:[#allocation5 + $0xcf8] sm:$0xf0] }
 0x19c   :  { %5093 = vmatpush.bf16.msra.mxu1 %v7140_v26  ;;  %5081 = vmatmul.bf16.vlgmr.msra.gmra.mxu0 %v9387_v0  ;;  %v7396_v18 = vor.u32 %v8957_v8, %v7395_v7  ;;  %v4823_v28 = vadd.f32 %v4822_v61, %v4810_v15  ;;  %v7144_v7 = vor.u32 %v8894_v56, %v7143_v55  ;;  %v6389_v15 = vld [vmem:[#allocation5 + $0x51c] sm:$0xf0]  ;;  %v7481_v55 = vld [vmem:[#allocation5 + $0xda4] sm:$0xf0] }
 0x19d   :  { %5125 = vmatpush.bf16.msrb.mxu0 %v6388_v17  ;;  %5107 = vmatmul.bf16.vlgmr.msra.gmra.mxu2 %v9384_v58  ;;  %v8789_v17 = vld [vmem:[#allocation5 + $0x7b8] sm:$0xf0]  ;;  %v4848_v25 = vpop.f32.mrf.mxu2  ;;  %v4824_v27 = vpop.f32.mrf.mxu0  ;;  %v7816_v8 = vor.u32 %v9062_v59, %v7815_v57  ;;  %v6392_v14 = vor.u32 %v8695_v11, %v6389_v15  ;;  %v8632_v59 = vld [vmem:[#allocation5 + $0x2d4] sm:$0xf]  ;;  %v8069_v15 = vld [vmem:[#allocation5 + $0x123c] sm:$0xf0] }
 0x19e   :  { %5151 = vmatpush.bf16.msrb.mxu2 %v7732_v48  ;;  %v5967_v48 = vld [vmem:[#allocation5 + $0x180] sm:$0xf]  ;;  %v6724_v26 = vor.u32 %v8789_v17, %v6723_v16  ;;  %v6305_v27 = vld [vmem:[#allocation5 + $0x474] sm:$0xf0] }
 0x19f   :  { %5164 = vmatpush.bf16.msrb.mxu3 %v8404_v21  ;;  %5094 = vmatmul.bf16.vlgmr.msra.gmra.mxu1 %v9382_v50  ;;  %v8600_v21 = vld [vmem:[#allocation5 + $0x1d0] sm:$0xf0]  ;;  %v8405_v16 = vld [vmem:[#allocation5 + $0x14dc] sm:$0xf0] }
 0x1a0   :  { %5138 = vmatpush.bf16.msrb.mxu1 %v7060_v19  ;;  %v5968_v29 = vor.u32 %v8600_v21, %v5967_v48  ;;  %v6639_v19 = vld [vmem:[#allocation5 + $0x6c0] sm:$0xf]  ;;  %v6977_v48 = vld [vmem:[#allocation5 + $0x9b4] sm:$0xf0] }
 0x1a1   :  { %5126 = vmatpush.bf16.msrb.mxu0 %v6304_v30  ;;  %v8768_v30 = vld [vmem:[#allocation5 + $0x710] sm:$0xf0]  ;;  %v4811_v40 = vpop.f32.mrf.mxu3 }
 0x1a2   :  { %5152 = vmatpush.bf16.msrb.mxu2 %v7648_v33  ;;  %v5883_v33 = vld [vmem:[#allocation5 + $0xd8] sm:$0xf]  ;;  %v6640_v41 = vor.u32 %v8768_v30, %v6639_v19  ;;  %v7652_v30 = vor.u32 %v9010_v23, %v7649_v24 }
 0x1a3   :  { %5165 = vmatpush.bf16.msrb.mxu3 %v8320_v34  ;;  %v8579_v34 = vld [vmem:[#allocation5 + $0x128] sm:$0xf0]  ;;  %v8321_v19 = vld [vmem:[#allocation5 + $0x1434] sm:$0xf0] }
 0x1a4   :  { %5139 = vmatpush.bf16.msrb.mxu1 %v6976_v42  ;;  %v4837_v42 = vpop.f32.mrf.mxu1  ;;  %v5884_v44 = vor.u32 %v8579_v34, %v5883_v33  ;;  %v9482_v33 = vld [vmem:[#allocation7 + $0x8] sm:$0xff]  ;;  %v8989_v34 = vld [vmem:[#allocation5 + $0xdfc] sm:$0xf] }
 0x1a5   :  { %5127 = vmatpush.bf16.msrb.mxu0 %v6220_v43  ;;  %v4836_v43 = vadd.f32 %v4835_v13, %v4823_v28  ;;  %v4850_v61 = vpop.f32.mrf.mxu2  ;;  %v7736_v13 = vor.u32 %v9031_v1, %v7733_v2  ;;  %v9157_v42 = vld [vmem:[#allocation5 + $0x133c] sm:$0xf] }
 0x1a6   :  { %5153 = vmatpush.bf16.msrb.mxu2 %v7564_v47  ;;  %v8747_v47 = vld [vmem:[#allocation5 + $0x668] sm:$0xf0]  ;;  %v6137_v61 = vld [vmem:[#allocation5 + $0x324] sm:$0xf0] }
 0x1a7   :  { %5166 = vmatpush.bf16.msrb.mxu3 %v8236_v49  ;;  %v5799_v49 = vld [vmem:[#allocation5 + $0x30] sm:$0xf]  ;;  %v6556_v62 = vor.u32 %v8747_v47, %v6555_v45  ;;  %v809_v45 = vperm.slane %v9482_v33, 0  ;;  %v7568_v47 = vor.u32 %v8989_v34, %v7565_v35  ;;  %v8905_v34 = vld [vmem:[#allocation5 + $0xb5c] sm:$0xf] }
 0x1a8   :  { %5140 = vmatpush.bf16.msrb.mxu1 %v6892_v60  ;;  %v8863_v60 = vld [vmem:[#allocation5 + $0xa0c] sm:$0xf]  ;;  %v7229_v35 = vld [vmem:[#allocation5 + $0xbac] sm:$0xf0] }
 0x1a9   :  { %5128 = vmatpush.bf16.msrb.mxu0 %v6136_v63  ;;  %v7061_v63 = vld [vmem:[#allocation5 + $0xa5c] sm:$0xf0]  ;;  %v4861_v17 = vpop.f32.mrf.mxu3 }
 0x1aa   :  { %5154 = vmatpush.bf16.msrb.mxu2 %v7480_v3  ;;  %8532 = vmatmul.msk.bf16.vlgmr.msra.gmra.mxu3 %vm4341_vm0, %v9392_v38  ;;  %v4849_v3 = vadd.f32 %v4848_v25, %v4836_v43  ;;  %v8237_v43 = vld [vmem:[#allocation5 + $0x138c] sm:$0xf0] }
 0x1ab   :  { %5167 = vmatpush.bf16.msrb.mxu3 %v8152_v4  ;;  %v5800_v4 = vor.u32 %v8558_v54, %v5799_v49  ;;  %v8800_v49 = vld [vmem:[#allocation5 + $0x814] sm:$0xf]  ;;  %v8240_v57 = vor.u32 %v9157_v42, %v8237_v43  ;;  %v9073_v42 = vld [vmem:[#allocation5 + $0x109c] sm:$0xf] }
 0x1ac   :  { %5141 = vmatpush.bf16.msrb.mxu1 %v6808_v12  ;;  %v7064_v12 = vor.u32 %v8863_v60, %v7061_v63  ;;  %v4862_v21 = vadd.f32 %v4861_v17, %v4849_v3  ;;  %v8968_v54 = vld [vmem:[#allocation5 + $0xd54] sm:$0xf]  ;;  %v8153_v63 = vld [vmem:[#allocation5 + $0x12e4] sm:$0xf0]  ;;  %v8779_v3 = vld [vmem:[#allocation5 + $0x76c] sm:$0xf] }
 0x1ad   :  { %5129 = vmatpush.bf16.msrb.mxu0 %v6052_v53  ;;  %v9199_v53 = vld [vmem:[#allocation5 + $0x148c] sm:$0xf]  ;;  %v7484_v2 = vor.u32 %v8968_v54, %v7481_v55  ;;  %v7145_v54 = vld [vmem:[#allocation5 + $0xb04] sm:$0xf0]  ;;  %v6395_v55 = vld [vmem:[#allocation5 + $0x4d0] sm:$0xf] }
 0x1ae   :  { %5155 = vmatpush.bf16.msrb.mxu2 %v7396_v18  ;;  %v6472_v18 = vor.u32 %v8726_v6, %v6471_v5  ;;  %v8408_v25 = vor.u32 %v9199_v53, %v8405_v16  ;;  %5717 = vst [vmem:[#allocation8 + $0x38] sm:$0x3f] %v4862_v21  ;;  %v8947_v6 = vld [vmem:[#allocation5 + $0xcac] sm:$0xf]  ;;  %v8926_v21 = vld [vmem:[#allocation5 + $0xc04] sm:$0xf] }
 0x1af   :  { %5168 = vmatpush.bf16.msrb.mxu3 %v8068_v20  ;;  %v8842_v20 = vld [vmem:[#allocation5 + $0x964] sm:$0xf] }
 0x1b0   :  { %5142 = vmatpush.bf16.msrb.mxu1 %v6724_v26  ;;  %v8674_v26 = vld [vmem:[#allocation5 + $0x424] sm:$0xf]  ;;  %v6980_v28 = vor.u32 %v8842_v20, %v6977_v48  ;;  %v6641_v20 = vld [vmem:[#allocation5 + $0x714] sm:$0xf0] }
 0x1b1   :  { %5130 = vmatpush.bf16.msrb.mxu0 %v5968_v29  ;;  %v9178_v29 = vld [vmem:[#allocation5 + $0x13e4] sm:$0xf]  ;;  %v6308_v36 = vor.u32 %v8674_v26, %v6305_v27  ;;  %v5969_v27 = vld [vmem:[#allocation5 + $0x1d4] sm:$0xf0] }
 0x1b2   :  { %5156 = vmatpush.bf16.msrb.mxu2 %v7312_v31  ;;  %v8821_v31 = vld [vmem:[#allocation5 + $0x8bc] sm:$0xf]  ;;  %v8324_v37 = vor.u32 %v9178_v29, %v8321_v19  ;;  %v7985_v29 = vld [vmem:[#allocation5 + $0x1194] sm:$0xf0] }
 0x1b3   :  { %5169 = vmatpush.bf16.msrb.mxu3 %v7984_v32  ;;  %v6893_v32 = vld [vmem:[#allocation5 + $0x90c] sm:$0xf0] }
 0x1b4   :  { %5143 = vmatpush.bf16.msrb.mxu1 %v6640_v41  ;;  %v6896_v40 = vor.u32 %v8821_v31, %v6893_v32  ;;  %v6221_v41 = vld [vmem:[#allocation5 + $0x3cc] sm:$0xf0]  ;;  %v8737_v31 = vld [vmem:[#allocation5 + $0x61c] sm:$0xf] }
 0x1b5   :  { %5131 = vmatpush.bf16.msrb.mxu0 %v5884_v44  ;;  %v4863_v44 = vpop.f32.mrf.mxu3  ;;  %v6224_v56 = vor.u32 %v8653_v39, %v6221_v41  ;;  %v6557_v32 = vld [vmem:[#allocation5 + $0x66c] sm:$0xf0] }
 0x1b6   :  { %5157 = vmatpush.bf16.msrb.mxu2 %v7228_v51  ;;  %v6809_v51 = vld [vmem:[#allocation5 + $0x864] sm:$0xf0]  ;;  %v5885_v41 = vld [vmem:[#allocation5 + $0x12c] sm:$0xf0]  ;;  %v6560_v43 = vor.u32 %v8737_v31, %v6557_v32  ;;  %v6899_v31 = vld [vmem:[#allocation5 + $0x8c0] sm:$0xf] }
 0x1b7   :  { %5170 = vmatpush.bf16.msrb.mxu3 %v7900_v52  ;;  %v4874_v52 = vpop.f32.mrf.mxu0  ;;  %v6812_v60 = vor.u32 %v8800_v49, %v6809_v51  ;;  %v7901_v44 = vld [vmem:[#allocation5 + $0x10ec] sm:$0xf0]  ;;  %v7232_v51 = vor.u32 %v8905_v34, %v7229_v35  ;;  %v8832_v32 = vld [vmem:[#allocation5 + $0x910] sm:$0xf0]  ;;  %v8327_v35 = vld [vmem:[#allocation5 + $0x13e8] sm:$0xf] }
 0x1b8   :  { %5144 = vmatpush.bf16.msrb.mxu1 %v6556_v62  ;;  %v9136_v62 = vld [vmem:[#allocation5 + $0x1294] sm:$0xf]  ;;  %v4875_v1 = vadd.f32 %v4874_v52, %v809_v45  ;;  %v4887_v5 = vpop.f32.mrf.mxu1 }
 0x1b9   :  { %5132 = vmatpush.bf16.msrb.mxu0 %v5800_v4  ;;  %v6725_v4 = vld [vmem:[#allocation5 + $0x7bc] sm:$0xf0]  ;;  %v8156_v9 = vor.u32 %v9136_v62, %v8153_v63  ;;  %v8716_v45 = vld [vmem:[#allocation5 + $0x574] sm:$0xf] }
 0x1ba   :  { %5158 = vmatpush.bf16.msrb.mxu2 %v7144_v7  ;;  %v7397_v7 = vld [vmem:[#allocation5 + $0xcfc] sm:$0xf0]  ;;  %v6728_v11 = vor.u32 %v8779_v3, %v6725_v4  ;;  %v4888_v53 = vadd.f32 %v4887_v5, %v4875_v1  ;;  %v8884_v52 = vld [vmem:[#allocation5 + $0xab4] sm:$0xf]  ;;  %v7904_v1 = vor.u32 %v9073_v42, %v7901_v44  ;;  %v5801_v3 = vld [vmem:[#allocation5 + $0x84] sm:$0xf0] }
 0x1bb   :  { %5171 = vmatpush.bf16.msrb.mxu3 %v7816_v8  ;;  %v6140_v8 = vor.u32 %v8632_v59, %v6137_v61  ;;  %v7400_v17 = vor.u32 %v8947_v6, %v7397_v7  ;;  %v8706_v59 = vld [vmem:[#allocation5 + $0x520] sm:$0xf0]  ;;  %v9052_v4 = vld [vmem:[#allocation5 + $0xff4] sm:$0xf]  ;;  %v7817_v7 = vld [vmem:[#allocation5 + $0x1044] sm:$0xf0] }
 0x1bc   :  { %5145 = vmatpush.bf16.msrb.mxu1 %v6472_v18  ;;  %5133 = vmatmul.bf16.vlgmr.msrb.gmra.mxu0 %v9380_v46  ;;  %v4900_v16 = vpop.f32.mrf.mxu2  ;;  %v8758_v18 = vld [vmem:[#allocation5 + $0x6c4] sm:$0xf]  ;;  %v6143_v42 = vld [vmem:[#allocation5 + $0x2d8] sm:$0xf] }
 0x1bd   :  { %5159 = vmatmul.bf16.vlgmr.msrb.gmra.mxu2 %v9382_v50  ;;  %5184 = vmatpush.bf16.msra.mxu0 %v8488_v22  ;;  %v7313_v22 = vld [vmem:[#allocation5 + $0xc54] sm:$0xf0]  ;;  %v4913_v23 = vpop.f32.mrf.mxu3  ;;  %v6644_v26 = vor.u32 %v8758_v18, %v6641_v20  ;;  %v4901_v19 = vadd.f32 %v4900_v16, %v4888_v53  ;;  %v8874_v61 = vld [vmem:[#allocation5 + $0xa60] sm:$0xf0]  ;;  %v6311_v53 = vld [vmem:[#allocation5 + $0x428] sm:$0xf]  ;;  %v7820_v18 = vor.u32 %v9052_v4, %v7817_v7 }
 0x1be   :  { %5203 = vmatpush.bf16.msra.mxu2 %v7064_v12  ;;  %5172 = vmatmul.bf16.vlgmr.msrb.gmra.mxu3 %v9384_v58  ;;  %v6053_v12 = vld [vmem:[#allocation5 + $0x27c] sm:$0xf0]  ;;  %v8685_v16 = vld [vmem:[#allocation5 + $0x478] sm:$0xf0]  ;;  %v6983_v20 = vld [vmem:[#allocation5 + $0x968] sm:$0xf] }
 0x1bf   :  { %5216 = vmatpush.bf16.msra.mxu3 %v7736_v13  ;;  %5146 = vmatmul.bf16.vlgmr.msrb.gmra.mxu1 %v9387_v0  ;;  %v9115_v13 = vld [vmem:[#allocation5 + $0x11ec] sm:$0xf]  ;;  %v4876_v48 = vpop.f32.mrf.mxu0  ;;  %v6056_v24 = vor.u32 %v8611_v10, %v6053_v12  ;;  %v4914_v49 = vadd.f32 %v4913_v23, %v4901_v19  ;;  %v7148_v10 = vor.u32 %v8884_v52, %v7145_v54  ;;  %v9220_v12 = vld [vmem:[#allocation5 + $0x1534] sm:$0xf]  ;;  %v8411_v23 = vld [vmem:[#allocation5 + $0x1490] sm:$0xf] }
 0x1c0   :  { %5190 = vmatpush.bf16.msra.mxu1 %v6392_v14  ;;  %v8072_v14 = vor.u32 %v9115_v13, %v8069_v15  ;;  %v8489_v13 = vld [vmem:[#allocation5 + $0x1584] sm:$0xf0]  ;;  %v8853_v48 = vld [vmem:[#allocation5 + $0x9b8] sm:$0xf0]  ;;  %v9168_v52 = vld [vmem:[#allocation5 + $0x1390] sm:$0xf0] }
 0x1c1   :  { %5229 = vmatpush.bf16.msrb.mxu0 %v8408_v25  ;;  %v8590_v25 = vld [vmem:[#allocation5 + $0x184] sm:$0xf]  ;;  %v8159_v4 = vld [vmem:[#allocation5 + $0x1298] sm:$0xf]  ;;  %v7403_v7 = vld [vmem:[#allocation5 + $0xcb0] sm:$0xf] }
 0x1c2   :  { %5204 = vmatpush.bf16.msra.mxu2 %v6980_v28  ;;  %v9094_v28 = vld [vmem:[#allocation5 + $0x1144] sm:$0xf] }
 0x1c3   :  { %5217 = vmatpush.bf16.msra.mxu3 %v7652_v30  ;;  %v7316_v30 = vor.u32 %v8926_v21, %v7313_v22  ;;  %v7988_v39 = vor.u32 %v9094_v28, %v7985_v29  ;;  %v8492_v22 = vor.u32 %v9220_v12, %v8489_v13  ;;  %v6227_v28 = vld [vmem:[#allocation5 + $0x380] sm:$0xf]  ;;  %v8664_v29 = vld [vmem:[#allocation5 + $0x3d0] sm:$0xf0] }
 0x1c4   :  { %5191 = vmatpush.bf16.msra.mxu1 %v6308_v36  ;;  %v4889_v36 = vpop.f32.mrf.mxu1 }
 0x1c5   :  { %5230 = vmatpush.bf16.msrb.mxu0 %v8324_v37  ;;  %v5972_v37 = vor.u32 %v8590_v25, %v5969_v27  ;;  %v4915_v5 = vpop.f32.mrf.mxu3  ;;  %v7655_v25 = vld [vmem:[#allocation5 + $0xea8] sm:$0xf]  ;;  %v6984_v27 = vor.u32 %v8853_v48, %v6983_v20  ;;  %v9189_v36 = vld [vmem:[#allocation5 + $0x1438] sm:$0xf0]  ;;  %v9126_v20 = vld [vmem:[#allocation5 + $0x1240] sm:$0xf0] }
 0x1c6   :  { %5205 = vmatpush.bf16.msra.mxu2 %v6896_v40  ;;  %v8569_v40 = vld [vmem:[#allocation5 + $0xdc] sm:$0xf]  ;;  %v8328_v44 = vor.u32 %v9189_v36, %v8327_v35  ;;  %v9147_v5 = vld [vmem:[#allocation5 + $0x12e8] sm:$0xf0] }
 0x1c7   :  { %5218 = vmatpush.bf16.msra.mxu3 %v7568_v47  ;;  %v6473_v47 = vld [vmem:[#allocation5 + $0x5c4] sm:$0xf0]  ;;  %v5888_v63 = vor.u32 %v8569_v40, %v5885_v41  ;;  %v9000_v40 = vld [vmem:[#allocation5 + $0xe50] sm:$0xf0]  ;;  %v6900_v41 = vor.u32 %v8832_v32, %v6899_v31 }
 0x1c8   :  { %5192 = vmatpush.bf16.msra.mxu1 %v6224_v56  ;;  %v4902_v56 = vpop.f32.mrf.mxu2  ;;  %v6476_v6 = vor.u32 %v8716_v45, %v6473_v47  ;;  %v6815_v45 = vld [vmem:[#allocation5 + $0x818] sm:$0xf]  ;;  %v8811_v47 = vld [vmem:[#allocation5 + $0x868] sm:$0xf0]  ;;  %v7991_v32 = vld [vmem:[#allocation5 + $0x1148] sm:$0xf] }
 0x1c9   :  { %5231 = vmatpush.bf16.msrb.mxu0 %v8240_v57  ;;  %v4926_v57 = vpop.f32.mrf.mxu0  ;;  %v8979_v56 = vld [vmem:[#allocation5 + $0xda8] sm:$0xf0] }
 0x1ca   :  { %5206 = vmatpush.bf16.msra.mxu2 %v6812_v60  ;;  %v7067_v60 = vld [vmem:[#allocation5 + $0xa10] sm:$0xf]  ;;  %v4927_v62 = vadd.f32 %v4926_v57, %v4914_v49  ;;  %v6816_v57 = vor.u32 %v8811_v47, %v6815_v45 }
 0x1cb   :  { %5219 = vmatpush.bf16.msra.mxu3 %v7484_v2  ;;  %v8548_v2 = vld [vmem:[#allocation5 + $0x34] sm:$0xf]  ;;  %v7068_v15 = vor.u32 %v8874_v61, %v7067_v60  ;;  %v8622_v60 = vld [vmem:[#allocation5 + $0x280] sm:$0xf0] }
 0x1cc   :  { %5193 = vmatpush.bf16.msra.mxu1 %v6140_v8  ;;  %8533 = vmatmul.msk.bf16.vlgmr.msra.gmra.mxu0 %vm4341_vm0, %v9392_v38  ;;  %v7739_v8 = vld [vmem:[#allocation5 + $0xf50] sm:$0xf]  ;;  %5718 = vst [vmem:[#allocation8 + $0x40] sm:$0x3f] %v4927_v62  ;;  %v810_v62 = vperm.slane %v9482_v33, 1 }
 0x1cd   :  { %5232 = vmatpush.bf16.msrb.mxu0 %v8156_v9  ;;  %v9042_v9 = vld [vmem:[#allocation5 + $0xfa0] sm:$0xf0] }
 0x1ce   :  { %5207 = vmatpush.bf16.msra.mxu2 %v6728_v11  ;;  %v6396_v11 = vor.u32 %v8706_v59, %v6395_v55  ;;  %v7740_v21 = vor.u32 %v9042_v9, %v7739_v8  ;;  %v7487_v55 = vld [vmem:[#allocation5 + $0xd58] sm:$0xf]  ;;  %v6059_v59 = vld [vmem:[#allocation5 + $0x230] sm:$0xf]  ;;  %v8958_v8 = vld [vmem:[#allocation5 + $0xd00] sm:$0xf0] }
 0x1cf   :  { %5220 = vmatpush.bf16.msra.mxu3 %v7400_v17  ;;  %v5804_v17 = vor.u32 %v8548_v2, %v5801_v3  ;;  %v8790_v2 = vld [vmem:[#allocation5 + $0x7c0] sm:$0xf0]  ;;  %v7488_v3 = vor.u32 %v8979_v56, %v7487_v55  ;;  %v9084_v56 = vld [vmem:[#allocation5 + $0x10f0] sm:$0xf0] }
 0x1d0   :  { %5194 = vmatpush.bf16.msra.mxu1 %v6056_v24  ;;  %v9210_v24 = vld [vmem:[#allocation5 + $0x14e0] sm:$0xf0] }
 0x1d1   :  { %5233 = vmatpush.bf16.msrb.mxu0 %v8072_v14  ;;  %v6312_v14 = vor.u32 %v8685_v16, %v6311_v53  ;;  %v4928_v19 = vpop.f32.mrf.mxu0  ;;  %v6647_v53 = vld [vmem:[#allocation5 + $0x6c8] sm:$0xf]  ;;  %v8769_v16 = vld [vmem:[#allocation5 + $0x718] sm:$0xf0] }
 0x1d2   :  { %5208 = vmatpush.bf16.msra.mxu2 %v6644_v26  ;;  %v9021_v26 = vld [vmem:[#allocation5 + $0xef8] sm:$0xf0]  ;;  %v8748_v19 = vld [vmem:[#allocation5 + $0x670] sm:$0xf0] }
 0x1d3   :  { %5221 = vmatpush.bf16.msra.mxu3 %v7316_v30  ;;  %v8412_v30 = vor.u32 %v9210_v24, %v8411_v23  ;;  %v7656_v34 = vor.u32 %v9021_v26, %v7655_v25  ;;  %v8937_v23 = vld [vmem:[#allocation5 + $0xc58] sm:$0xf0]  ;;  %v6648_v24 = vor.u32 %v8769_v16, %v6647_v53  ;;  %v8580_v25 = vld [vmem:[#allocation5 + $0x130] sm:$0xf0]  ;;  %v8675_v53 = vld [vmem:[#allocation5 + $0x42c] sm:$0xf] }
 0x1d4   :  { %5195 = vmatpush.bf16.msra.mxu1 %v5972_v37  ;;  %v6228_v37 = vor.u32 %v8664_v29, %v6227_v28  ;;  %v6563_v29 = vld [vmem:[#allocation5 + $0x620] sm:$0xf] }
 0x1d5   :  { %5234 = vmatpush.bf16.msrb.mxu0 %v7988_v39  ;;  %v7571_v39 = vld [vmem:[#allocation5 + $0xe00] sm:$0xf] }
 0x1d6   :  { %5209 = vmatpush.bf16.msra.mxu2 %v6560_v43  ;;  %v8643_v43 = vld [vmem:[#allocation5 + $0x328] sm:$0xf0]  ;;  %v7572_v49 = vor.u32 %v9000_v40, %v7571_v39  ;;  %v8916_v39 = vld [vmem:[#allocation5 + $0xbb0] sm:$0xf0]  ;;  %v5807_v40 = vld [vmem:[#allocation5 + $0x38] sm:$0xf] }
 0x1d7   :  { %5222 = vmatpush.bf16.msra.mxu3 %v7232_v51  ;;  %v8243_v51 = vld [vmem:[#allocation5 + $0x1340] sm:$0xf]  ;;  %v6144_v54 = vor.u32 %v8643_v43, %v6143_v42  ;;  %v8559_v42 = vld [vmem:[#allocation5 + $0x88] sm:$0xf0]  ;;  %v6479_v43 = vld [vmem:[#allocation5 + $0x578] sm:$0xf] }
 0x1d8   :  { %5196 = vmatpush.bf16.msra.mxu1 %v5888_v63  ;;  %v8244_v61 = vor.u32 %v9168_v52, %v8243_v51  ;;  %v4939_v63 = vpop.f32.mrf.mxu1  ;;  %v8495_v51 = vld [vmem:[#allocation5 + $0x1538] sm:$0xf]  ;;  %v9231_v52 = vld [vmem:[#allocation5 + $0x1588] sm:$0xf0]  ;;  %v6313_v16 = vld [vmem:[#allocation5 + $0x47c] sm:$0xf0] }
 0x1d9   :  { %5235 = vmatpush.bf16.msrb.mxu0 %v7904_v1  ;;  %v6731_v1 = vld [vmem:[#allocation5 + $0x770] sm:$0xf]  ;;  %v4978_v12 = vpop.f32.mrf.mxu0  ;;  %v4940_v13 = vadd.f32 %v4939_v63, %v810_v62  ;;  %v7151_v62 = vld [vmem:[#allocation5 + $0xab8] sm:$0xf]  ;;  %v8895_v63 = vld [vmem:[#allocation5 + $0xb08] sm:$0xf0] }
 0x1da   :  { %5210 = vmatpush.bf16.msra.mxu2 %v6476_v6  ;;  %v6060_v6 = vor.u32 %v8622_v60, %v6059_v59  ;;  %v6732_v9 = vor.u32 %v8790_v2, %v6731_v1  ;;  %v6397_v59 = vld [vmem:[#allocation5 + $0x524] sm:$0xf0]  ;;  %v8864_v1 = vld [vmem:[#allocation5 + $0xa14] sm:$0xf] }
 0x1db   :  { %5223 = vmatpush.bf16.msra.mxu3 %v7148_v10  ;;  %v5975_v10 = vld [vmem:[#allocation5 + $0x188] sm:$0xf] }
 0x1dc   :  { %5197 = vmatpush.bf16.msra.mxu1 %v5804_v17  ;;  %v7404_v17 = vor.u32 %v8958_v8, %v7403_v7  ;;  %v4952_v26 = vpop.f32.mrf.mxu2 }
 0x1dd   :  { %5236 = vmatpush.bf16.msrb.mxu0 %v7820_v18  ;;  %5211 = vmatmul.bf16.vlgmr.msra.gmra.mxu2 %v9387_v0  ;;  %v8075_v18 = vld [vmem:[#allocation5 + $0x11f0] sm:$0xf]  ;;  %v4965_v48 = vpop.f32.mrf.mxu3 }
 0x1de   :  { %5255 = vmatpush.bf16.msrb.mxu2 %v6396_v11  ;;  %5224 = vmatmul.bf16.vlgmr.msra.gmra.mxu3 %v9382_v50  ;;  %v8601_v11 = vld [vmem:[#allocation5 + $0x1d8] sm:$0xf0] }
 0x1df   :  { %5268 = vmatpush.bf16.msrb.mxu3 %v7068_v15  ;;  %5198 = vmatmul.bf16.vlgmr.msra.gmra.mxu1 %v9380_v46  ;;  %v8160_v15 = vor.u32 %v9147_v5, %v8159_v4  ;;  %v7069_v4 = vld [vmem:[#allocation5 + $0xa64] sm:$0xf0]  ;;  %v9200_v5 = vld [vmem:[#allocation5 + $0x1494] sm:$0xf] }
 0x1e0   :  { %5249 = vmatpush.bf16.msrb.mxu1 %v8492_v22  ;;  %5237 = vmatmul.bf16.vlgmr.msrb.gmra.mxu0 %v9384_v58  ;;  %v7319_v22 = vld [vmem:[#allocation5 + $0xc08] sm:$0xf]  ;;  %v4941_v28 = vpop.f32.mrf.mxu1 }
 0x1e1   :  { %5281 = vmatpush.bf16.msra.mxu0 %v7740_v21  ;;  %v5976_v21 = vor.u32 %v8601_v11, %v5975_v10  ;;  %v7320_v31 = vor.u32 %v8937_v23, %v7319_v22  ;;  %v4980_v45 = vpop.f32.mrf.mxu0  ;;  %v7823_v11 = vld [vmem:[#allocation5 + $0xff8] sm:$0xf]  ;;  %v6985_v22 = vld [vmem:[#allocation5 + $0x9bc] sm:$0xf0]  ;;  %v9179_v23 = vld [vmem:[#allocation5 + $0x13ec] sm:$0xf] }
 0x1e2   :  { %5256 = vmatpush.bf16.msrb.mxu2 %v6312_v14  ;;  %v5891_v14 = vld [vmem:[#allocation5 + $0xe0] sm:$0xf]  ;;  %v6229_v28 = vld [vmem:[#allocation5 + $0x3d4] sm:$0xf0]  ;;  %v8990_v45 = vld [vmem:[#allocation5 + $0xe04] sm:$0xf] }
 0x1e3   :  { %5269 = vmatpush.bf16.msrb.mxu3 %v6984_v27  ;;  %v8076_v27 = vor.u32 %v9126_v20, %v8075_v18  ;;  %v5892_v35 = vor.u32 %v8580_v25, %v5891_v14  ;;  %v7072_v18 = vor.u32 %v8864_v1, %v7069_v4  ;;  %v6316_v25 = vor.u32 %v8675_v53, %v6313_v16  ;;  %v7489_v1 = vld [vmem:[#allocation5 + $0xdac] sm:$0xf0]  ;;  %v6733_v4 = vld [vmem:[#allocation5 + $0x7c4] sm:$0xf0]  ;;  %v8948_v16 = vld [vmem:[#allocation5 + $0xcb4] sm:$0xf] }
 0x1e4   :  { %5294 = vmatpush.bf16.msra.mxu1 %v8412_v30  ;;  %v4953_v30 = vadd.f32 %v4952_v26, %v4940_v13  ;;  %v4954_v7 = vpop.f32.mrf.mxu2 }
 0x1e5   :  { %5282 = vmatpush.bf16.msra.mxu0 %v7656_v34  ;;  %v9105_v34 = vld [vmem:[#allocation5 + $0x1198] sm:$0xf0]  ;;  %v4967_v60 = vpop.f32.mrf.mxu3 }
 0x1e6   :  { %5257 = vmatpush.bf16.msrb.mxu2 %v6228_v37  ;;  %v4966_v36 = vadd.f32 %v4965_v48, %v4953_v30  ;;  %v7235_v37 = vld [vmem:[#allocation5 + $0xb60] sm:$0xf]  ;;  %v7992_v47 = vor.u32 %v9105_v34, %v7991_v32  ;;  %v7741_v48 = vld [vmem:[#allocation5 + $0xfa4] sm:$0xf0]  ;;  %v9011_v30 = vld [vmem:[#allocation5 + $0xeac] sm:$0xf] }
 0x1e7   :  { %5270 = vmatpush.bf16.msrb.mxu3 %v6900_v41  ;;  %v6564_v41 = vor.u32 %v8748_v19, %v6563_v29  ;;  %v8822_v32 = vld [vmem:[#allocation5 + $0x8c4] sm:$0xf]  ;;  %v6901_v34 = vld [vmem:[#allocation5 + $0x914] sm:$0xf0]  ;;  %v811_v60 = vperm.slane %v9482_v33, 2 }
 0x1e8   :  { %5295 = vmatpush.bf16.msra.mxu1 %v8328_v44  ;;  %v8727_v44 = vld [vmem:[#allocation5 + $0x5c8] sm:$0xf0]  ;;  %v4979_v55 = vadd.f32 %v4978_v12, %v4966_v36  ;;  %v4991_v10 = vpop.f32.mrf.mxu1  ;;  %v8245_v36 = vld [vmem:[#allocation5 + $0x1394] sm:$0xf0] }
 0x1e9   :  { %5283 = vmatpush.bf16.msra.mxu0 %v7572_v49  ;;  %v7907_v49 = vld [vmem:[#allocation5 + $0x10a0] sm:$0xf]  ;;  %v6480_v2 = vor.u32 %v8727_v44, %v6479_v43  ;;  %v9063_v12 = vld [vmem:[#allocation5 + $0x1048] sm:$0xf0]  ;;  %v6904_v43 = vor.u32 %v8822_v32, %v6901_v34  ;;  %v6565_v32 = vld [vmem:[#allocation5 + $0x674] sm:$0xf0] }
 0x1ea   :  { %5258 = vmatpush.bf16.msrb.mxu2 %v6144_v54  ;;  %v7236_v54 = vor.u32 %v8916_v39, %v7235_v37  ;;  %v7908_v8 = vor.u32 %v9084_v56, %v7907_v49  ;;  %v4992_v13 = vadd.f32 %v4991_v10, %v4979_v55  ;;  %v7824_v14 = vor.u32 %v9063_v12, %v7823_v11  ;;  %v8801_v49 = vld [vmem:[#allocation5 + $0x81c] sm:$0xf]  ;;  %v8591_v12 = vld [vmem:[#allocation5 + $0x18c] sm:$0xf]  ;;  %v9074_v34 = vld [vmem:[#allocation5 + $0x10a4] sm:$0xf] }
 0x1eb   :  { %5271 = vmatpush.bf16.msrb.mxu3 %v6816_v57  ;;  %v8696_v57 = vld [vmem:[#allocation5 + $0x4d4] sm:$0xf] }
 0x1ec   :  { %5296 = vmatpush.bf16.msra.mxu1 %v8244_v61  ;;  %v5808_v61 = vor.u32 %v8559_v42, %v5807_v40  ;;  %5719 = vst [vmem:[#allocation8 + $0x48] sm:$0x3f] %v4992_v13  ;;  %v6145_v42 = vld [vmem:[#allocation5 + $0x32c] sm:$0xf0]  ;;  %v5977_v13 = vld [vmem:[#allocation5 + $0x1dc] sm:$0xf0] }
 0x1ed   :  { %5284 = vmatpush.bf16.msra.mxu0 %v7488_v3  ;;  %v8496_v3 = vor.u32 %v9231_v52, %v8495_v51  ;;  %v6817_v51 = vld [vmem:[#allocation5 + $0x86c] sm:$0xf0]  ;;  %v9137_v52 = vld [vmem:[#allocation5 + $0x129c] sm:$0xf] }
 0x1ee   :  { %5259 = vmatpush.bf16.msrb.mxu2 %v6060_v6  ;;  %v8413_v6 = vld [vmem:[#allocation5 + $0x14e4] sm:$0xf0] }
 0x1ef   :  { %5272 = vmatpush.bf16.msrb.mxu3 %v6732_v9  ;;  %8534 = vmatmul.msk.bf16.vlgmr.msrb.gmra.mxu1 %vm4341_vm0, %v9392_v38  ;;  %v6400_v9 = vor.u32 %v8696_v57, %v6397_v59  ;;  %v8416_v20 = vor.u32 %v9200_v5, %v8413_v6  ;;  %v8612_v57 = vld [vmem:[#allocation5 + $0x234] sm:$0xf]  ;;  %v6061_v59 = vld [vmem:[#allocation5 + $0x284] sm:$0xf0] }
 0x1f0   :  { %5297 = vmatpush.bf16.msra.mxu1 %v8160_v15  ;;  %v7152_v15 = vor.u32 %v8895_v63, %v7151_v62  ;;  %v4993_v39 = vpop.f32.mrf.mxu1  ;;  %v8969_v63 = vld [vmem:[#allocation5 + $0xd5c] sm:$0xf]  ;;  %v9116_v5 = vld [vmem:[#allocation5 + $0x11f4] sm:$0xf]  ;;  %v8077_v6 = vld [vmem:[#allocation5 + $0x1244] sm:$0xf0]  ;;  %v6064_v7 = vor.u32 %v8612_v57, %v6061_v59 }
 0x1f1   :  { %5285 = vmatpush.bf16.msra.mxu0 %v7404_v17  ;;  %v9032_v17 = vld [vmem:[#allocation5 + $0xf54] sm:$0xf]  ;;  %v7492_v11 = vor.u32 %v8969_v63, %v7489_v1  ;;  %v8080_v53 = vor.u32 %v9116_v5, %v8077_v6  ;;  %v8549_v39 = vld [vmem:[#allocation5 + $0x3c] sm:$0xf]  ;;  %v7825_v59 = vld [vmem:[#allocation5 + $0x104c] sm:$0xf0] }
 0x1f2   :  { %5260 = vmatpush.bf16.msrb.mxu2 %v5976_v21  ;;  %v8843_v21 = vld [vmem:[#allocation5 + $0x96c] sm:$0xf]  ;;  %v7744_v26 = vor.u32 %v9032_v17, %v7741_v48  ;;  %v7405_v17 = vld [vmem:[#allocation5 + $0xd04] sm:$0xf0]  ;;  %v6649_v48 = vld [vmem:[#allocation5 + $0x71c] sm:$0xf0] }
 0x1f3   :  { %5273 = vmatpush.bf16.msrb.mxu3 %v6648_v24  ;;  %v8329_v24 = vld [vmem:[#allocation5 + $0x143c] sm:$0xf0]  ;;  %v6988_v29 = vor.u32 %v8843_v21, %v6985_v22  ;;  %v9095_v21 = vld [vmem:[#allocation5 + $0x114c] sm:$0xf]  ;;  %v9053_v57 = vld [vmem:[#allocation5 + $0xffc] sm:$0xf] }
 0x1f4   :  { %5298 = vmatpush.bf16.msra.mxu1 %v8076_v27  ;;  %v8654_v27 = vld [vmem:[#allocation5 + $0x384] sm:$0xf]  ;;  %v8332_v19 = vor.u32 %v9179_v23, %v8329_v24  ;;  %v7993_v22 = vld [vmem:[#allocation5 + $0x119c] sm:$0xf0]  ;;  %v5980_v23 = vor.u32 %v8591_v12, %v5977_v13  ;;  %v7408_v24 = vor.u32 %v8948_v16, %v7405_v17  ;;  %v7747_v63 = vld [vmem:[#allocation5 + $0xf58] sm:$0xf] }
 0x1f5   :  { %5286 = vmatpush.bf16.msra.mxu0 %v7320_v31  ;;  %v7657_v31 = vld [vmem:[#allocation5 + $0xefc] sm:$0xf0]  ;;  %v6232_v37 = vor.u32 %v8654_v27, %v6229_v28  ;;  %v7996_v28 = vor.u32 %v9095_v21, %v7993_v22  ;;  %v8419_v5 = vld [vmem:[#allocation5 + $0x1498] sm:$0xf]  ;;  %v9211_v6 = vld [vmem:[#allocation5 + $0x14e8] sm:$0xf0] }
 0x1f6   :  { %5261 = vmatpush.bf16.msrb.mxu2 %v5892_v35  ;;  %v9158_v35 = vld [vmem:[#allocation5 + $0x1344] sm:$0xf]  ;;  %v7660_v40 = vor.u32 %v9011_v30, %v7657_v31  ;;  %v7075_v13 = vld [vmem:[#allocation5 + $0xa18] sm:$0xf]  ;;  %v8420_v16 = vor.u32 %v9211_v6, %v8419_v5  ;;  %v9127_v5 = vld [vmem:[#allocation5 + $0x1248] sm:$0xf0] }
 0x1f7   :  { %5274 = vmatpush.bf16.msrb.mxu3 %v6564_v41  ;;  %v8633_v41 = vld [vmem:[#allocation5 + $0x2dc] sm:$0xf]  ;;  %v8248_v44 = vor.u32 %v9158_v35, %v8245_v36  ;;  %v8738_v30 = vld [vmem:[#allocation5 + $0x624] sm:$0xf]  ;;  %v7909_v35 = vld [vmem:[#allocation5 + $0x10f4] sm:$0xf0] }
 0x1f8   :  { %5299 = vmatpush.bf16.msra.mxu1 %v7992_v47  ;;  %v7573_v47 = vld [vmem:[#allocation5 + $0xe54] sm:$0xf0]  ;;  %v6148_v55 = vor.u32 %v8633_v41, %v6145_v42  ;;  %v5809_v42 = vld [vmem:[#allocation5 + $0x8c] sm:$0xf0]  ;;  %v9022_v22 = vld [vmem:[#allocation5 + $0xf00] sm:$0xf0] }
 0x1f9   :  { %5287 = vmatpush.bf16.msra.mxu0 %v7236_v54  ;;  %v8161_v54 = vld [vmem:[#allocation5 + $0x12ec] sm:$0xf0]  ;;  %v7576_v56 = vor.u32 %v8990_v45, %v7573_v47  ;;  %v7237_v45 = vld [vmem:[#allocation5 + $0xbb4] sm:$0xf0]  ;;  %v6568_v47 = vor.u32 %v8738_v30, %v6565_v32  ;;  %v8665_v30 = vld [vmem:[#allocation5 + $0x3d8] sm:$0xf0] }
 0x1fa   :  { %5262 = vmatpush.bf16.msrb.mxu2 %v5808_v61  ;;  %v6820_v61 = vor.u32 %v8801_v49, %v6817_v51  ;;  %v8164_v62 = vor.u32 %v9137_v52, %v8161_v54  ;;  %v7912_v49 = vor.u32 %v9074_v34, %v7909_v35  ;;  %v8717_v51 = vld [vmem:[#allocation5 + $0x57c] sm:$0xf]  ;;  %v8497_v54 = vld [vmem:[#allocation5 + $0x158c] sm:$0xf0]  ;;  %v8251_v34 = vld [vmem:[#allocation5 + $0x1348] sm:$0xf] }
 0x1fb   :  { %5275 = vmatpush.bf16.msrb.mxu3 %v6480_v2  ;;  %v8780_v2 = vld [vmem:[#allocation5 + $0x774] sm:$0xf]  ;;  %v9221_v52 = vld [vmem:[#allocation5 + $0x153c] sm:$0xf] }
 0x1fc   :  { %5300 = vmatpush.bf16.msra.mxu1 %v7908_v8  ;;  %v5004_v8 = vpop.f32.mrf.mxu2  ;;  %v9001_v32 = vld [vmem:[#allocation5 + $0xe58] sm:$0xf0] }
 0x1fd   :  { %5288 = vmatpush.bf16.msra.mxu0 %v7152_v15  ;;  %5263 = vmatmul.bf16.vlgmr.msrb.gmra.mxu2 %v9380_v46  ;;  %v5005_v10 = vadd.f32 %v5004_v8, %v811_v60  ;;  %v6736_v15 = vor.u32 %v8780_v2, %v6733_v4  ;;  %v5812_v60 = vor.u32 %v8549_v39, %v5809_v42  ;;  %v9043_v4 = vld [vmem:[#allocation5 + $0xfa8] sm:$0xf0]  ;;  %v9169_v35 = vld [vmem:[#allocation5 + $0x1398] sm:$0xf0]  ;;  %v6907_v39 = vld [vmem:[#allocation5 + $0x8c8] sm:$0xf] }
 0x1fe   :  { %5314 = vmatpush.bf16.msra.mxu2 %v8496_v3  ;;  %5276 = vmatmul.bf16.vlgmr.msrb.gmra.mxu3 %v9387_v0  ;;  %v5030_v3 = vpop.f32.mrf.mxu0  ;;  %v7828_v8 = vor.u32 %v9053_v57, %v7825_v59  ;;  %v8252_v42 = vor.u32 %v9169_v35, %v8251_v34  ;;  %v6823_v59 = vld [vmem:[#allocation5 + $0x820] sm:$0xf] }
 0x1ff   :  { %5320 = vmatpush.bf16.msra.mxu3 %v6400_v9  ;;  %v9501_v9 = vpop.f32.mrf.mxu1 }
 0x200   :  { %5301 = vmatpush.bf16.msra.mxu1 %v7824_v14  ;;  %5289 = vmatmul.bf16.vlgmr.msra.gmra.mxu0 %v9382_v50  ;;  %v8570_v14 = vld [vmem:[#allocation5 + $0xe4] sm:$0xf] }
 0x201   :  { %5333 = vmatpush.bf16.msrb.mxu0 %v7072_v18  ;;  %v8759_v18 = vld [vmem:[#allocation5 + $0x6cc] sm:$0xf] }
 0x202   :  { %5359 = vmatpush.bf16.msrb.mxu2 %v8416_v20  ;;  %v5017_v20 = vpop.f32.mrf.mxu3  ;;  %v6652_v27 = vor.u32 %v8759_v18, %v6649_v48  ;;  %v6319_v18 = vld [vmem:[#allocation5 + $0x430] sm:$0xf] }
 0x203   :  { %5321 = vmatpush.bf16.msra.mxu3 %v6316_v25  ;;  %5302 = vmatmul.bf16.vlgmr.msra.gmra.mxu1 %v9384_v58  ;;  %v5893_v25 = vld [vmem:[#allocation5 + $0x134] sm:$0xf0] }
 0x204   :  { %5346 = vmatpush.bf16.msrb.mxu1 %v7744_v26  ;;  %v5018_v26 = vadd.f32 %v5017_v20, %v5005_v10  ;;  %v5896_v36 = vor.u32 %v8570_v14, %v5893_v25  ;;  %v8885_v10 = vld [vmem:[#allocation5 + $0xabc] sm:$0xf]  ;;  %v8686_v20 = vld [vmem:[#allocation5 + $0x480] sm:$0xf0] }
 0x205   :  { %5334 = vmatpush.bf16.msrb.mxu0 %v6988_v29  ;;  %v8927_v29 = vld [vmem:[#allocation5 + $0xc0c] sm:$0xf]  ;;  %v6320_v25 = vor.u32 %v8686_v20, %v6319_v18  ;;  %v8938_v18 = vld [vmem:[#allocation5 + $0xc60] sm:$0xf0]  ;;  %v7999_v20 = vld [vmem:[#allocation5 + $0x1150] sm:$0xf] }
 0x206   :  { %5360 = vmatpush.bf16.msrb.mxu2 %v8332_v19  ;;  %v7321_v19 = vld [vmem:[#allocation5 + $0xc5c] sm:$0xf0]  ;;  %v5032_v31 = vpop.f32.mrf.mxu0 }
 0x207   :  { %5322 = vmatpush.bf16.msra.mxu3 %v6232_v37  ;;  %v5006_v37 = vpop.f32.mrf.mxu2  ;;  %v7324_v41 = vor.u32 %v8927_v29, %v7321_v19  ;;  %v6235_v19 = vld [vmem:[#allocation5 + $0x388] sm:$0xf] }
 0x208   :  { %5347 = vmatpush.bf16.msrb.mxu1 %v7660_v40  ;;  %v5045_v40 = vpop.f32.mrf.mxu1  ;;  %v7579_v31 = vld [vmem:[#allocation5 + $0xe08] sm:$0xf]  ;;  %v6236_v37 = vor.u32 %v8665_v30, %v6235_v19  ;;  %v8917_v30 = vld [vmem:[#allocation5 + $0xbb8] sm:$0xf0] }
 0x209   :  { %5335 = vmatpush.bf16.msrb.mxu0 %v6904_v43  ;;  %v5031_v43 = vadd.f32 %v5030_v3, %v5018_v26  ;;  %v8500_v3 = vor.u32 %v9221_v52, %v8497_v54  ;;  %v6991_v26 = vld [vmem:[#allocation5 + $0x970] sm:$0xf]  ;;  %v8833_v40 = vld [vmem:[#allocation5 + $0x918] sm:$0xf0]  ;;  %v9148_v52 = vld [vmem:[#allocation5 + $0x12f0] sm:$0xf0] }
 0x20a   :  { %5361 = vmatpush.bf16.msrb.mxu2 %v8248_v44  ;;  %v8906_v44 = vld [vmem:[#allocation5 + $0xb64] sm:$0xf]  ;;  %v6908_v54 = vor.u32 %v8833_v40, %v6907_v39  ;;  %v7243_v19 = vld [vmem:[#allocation5 + $0xb68] sm:$0xf] }
 0x20b   :  { %5323 = vmatpush.bf16.msra.mxu3 %v6148_v55  ;;  %v5019_v55 = vpop.f32.mrf.mxu3  ;;  %v7240_v1 = vor.u32 %v8906_v44, %v7237_v45  ;;  %v5044_v2 = vadd.f32 %v9501_v9, %v5031_v43  ;;  %v7663_v9 = vld [vmem:[#allocation5 + $0xeb0] sm:$0xf]  ;;  %v6151_v43 = vld [vmem:[#allocation5 + $0x2e0] sm:$0xf]  ;;  %v8644_v44 = vld [vmem:[#allocation5 + $0x330] sm:$0xf0] }
 0x20c   :  { %5348 = vmatpush.bf16.msrb.mxu1 %v7576_v56  ;;  %v6481_v56 = vld [vmem:[#allocation5 + $0x5cc] sm:$0xf0]  ;;  %v7495_v45 = vld [vmem:[#allocation5 + $0xd60] sm:$0xf]  ;;  %v6152_v57 = vor.u32 %v8644_v44, %v6151_v43  ;;  %v6571_v40 = vld [vmem:[#allocation5 + $0x628] sm:$0xf]  ;;  %v7244_v43 = vor.u32 %v8917_v30, %v7243_v19 }
 0x20d   :  { %5336 = vmatpush.bf16.msrb.mxu0 %v6820_v61  ;;  %8535 = vmatmul.msk.bf16.vlgmr.msra.gmra.mxu2 %vm4341_vm0, %v9392_v38  ;;  %v6403_v61 = vld [vmem:[#allocation5 + $0x4d8] sm:$0xf] }
 0x20e   :  { %5362 = vmatpush.bf16.msrb.mxu2 %v8164_v62  ;;  %v8707_v62 = vld [vmem:[#allocation5 + $0x528] sm:$0xf0] }
 0x20f   :  { %5324 = vmatpush.bf16.msra.mxu3 %v6064_v7  ;;  %v6484_v7 = vor.u32 %v8717_v51, %v6481_v56  ;;  %v6404_v12 = vor.u32 %v8707_v62, %v6403_v61  ;;  %v5056_v17 = vpop.f32.mrf.mxu2  ;;  %v8167_v51 = vld [vmem:[#allocation5 + $0x12a0] sm:$0xf]  ;;  %v812_v56 = vperm.slane %v9482_v33, 3 }
 0x210   :  { %5349 = vmatpush.bf16.msrb.mxu1 %v7492_v11  ;;  %v7153_v11 = vld [vmem:[#allocation5 + $0xb0c] sm:$0xf0]  ;;  %v5057_v48 = vadd.f32 %v5056_v17, %v5044_v2  ;;  %v8168_v62 = vor.u32 %v9148_v52, %v8167_v51  ;;  %v7411_v2 = vld [vmem:[#allocation5 + $0xcb8] sm:$0xf]  ;;  %v7831_v51 = vld [vmem:[#allocation5 + $0x1000] sm:$0xf] }
 0x211   :  { %5337 = vmatpush.bf16.msrb.mxu0 %v6736_v15  ;;  %v8875_v15 = vld [vmem:[#allocation5 + $0xa68] sm:$0xf0]  ;;  %v7156_v21 = vor.u32 %v8885_v10, %v7153_v11  ;;  %v6739_v11 = vld [vmem:[#allocation5 + $0x778] sm:$0xf]  ;;  %v7327_v17 = vld [vmem:[#allocation5 + $0xc10] sm:$0xf] }
 0x212   :  { %5363 = vmatpush.bf16.msrb.mxu2 %v8080_v53  ;;  %v7748_v53 = vor.u32 %v9043_v4, %v7747_v63  ;;  %v7076_v14 = vor.u32 %v8875_v15, %v7075_v13  ;;  %5720 = vst [vmem:[#allocation8 + $0x50] sm:$0x3f] %v5057_v48  ;;  %v6067_v63 = vld [vmem:[#allocation5 + $0x238] sm:$0xf]  ;;  %v9064_v52 = vld [vmem:[#allocation5 + $0x1050] sm:$0xf0] }
 0x213   :  { %5325 = vmatpush.bf16.msra.mxu3 %v5980_v23  ;;  %v8335_v23 = vld [vmem:[#allocation5 + $0x13f0] sm:$0xf]  ;;  %v8083_v4 = vld [vmem:[#allocation5 + $0x11f8] sm:$0xf] }
 0x214   :  { %5350 = vmatpush.bf16.msrb.mxu1 %v7408_v24  ;;  %v9190_v24 = vld [vmem:[#allocation5 + $0x1440] sm:$0xf0]  ;;  %v8084_v15 = vor.u32 %v9127_v5, %v8083_v4  ;;  %v8503_v4 = vld [vmem:[#allocation5 + $0x1540] sm:$0xf]  ;;  %v9232_v5 = vld [vmem:[#allocation5 + $0x1590] sm:$0xf0] }
 0x215   :  { %5338 = vmatpush.bf16.msrb.mxu0 %v6652_v27  ;;  %v8854_v27 = vld [vmem:[#allocation5 + $0x9c0] sm:$0xf0]  ;;  %v8336_v29 = vor.u32 %v9190_v24, %v8335_v23 }
 0x216   :  { %5364 = vmatpush.bf16.msrb.mxu2 %v7996_v28  ;;  %v7664_v28 = vor.u32 %v9022_v22, %v7663_v9  ;;  %v9106_v9 = vld [vmem:[#allocation5 + $0x11a0] sm:$0xf0] }
 0x217   :  { %5326 = vmatpush.bf16.msra.mxu3 %v5896_v36  ;;  %v6992_v36 = vor.u32 %v8854_v27, %v6991_v26  ;;  %v7328_v26 = vor.u32 %v8938_v18, %v7327_v17  ;;  %v8000_v27 = vor.u32 %v9106_v9, %v7999_v20  ;;  %v8504_v17 = vor.u32 %v9232_v5, %v8503_v4  ;;  %v9012_v18 = vld [vmem:[#allocation5 + $0xeb4] sm:$0xf]  ;;  %v7665_v20 = vld [vmem:[#allocation5 + $0xf04] sm:$0xf0]  ;;  %v8613_v5 = vld [vmem:[#allocation5 + $0x23c] sm:$0xf] }
 0x218   :  { %5351 = vmatpush.bf16.msrb.mxu1 %v7324_v41  ;;  %v7580_v41 = vor.u32 %v9001_v32, %v7579_v31  ;;  %v7915_v31 = vld [vmem:[#allocation5 + $0x10a8] sm:$0xf]  ;;  %v9085_v32 = vld [vmem:[#allocation5 + $0x10f8] sm:$0xf0] }
 0x219   :  { %5339 = vmatpush.bf16.msrb.mxu0 %v6568_v47  ;;  %v5058_v47 = vpop.f32.mrf.mxu2  ;;  %v5082_v55 = vpop.f32.mrf.mxu0  ;;  %v7916_v44 = vor.u32 %v9085_v32, %v7915_v31  ;;  %v8655_v31 = vld [vmem:[#allocation5 + $0x38c] sm:$0xf] }
 0x21a   :  { %5365 = vmatpush.bf16.msrb.mxu2 %v7912_v49  ;;  %v8980_v49 = vld [vmem:[#allocation5 + $0xdb0] sm:$0xf0]  ;;  %v7159_v47 = vld [vmem:[#allocation5 + $0xac0] sm:$0xf] }
 0x21b   :  { %5327 = vmatpush.bf16.msra.mxu3 %v5812_v60  ;;  %v8812_v60 = vld [vmem:[#allocation5 + $0x870] sm:$0xf0]  ;;  %v7496_v61 = vor.u32 %v8980_v49, %v7495_v45 }
 0x21c   :  { %5352 = vmatpush.bf16.msrb.mxu1 %v7240_v1  ;;  %v8623_v1 = vld [vmem:[#allocation5 + $0x288] sm:$0xf0]  ;;  %v8560_v45 = vld [vmem:[#allocation5 + $0x90] sm:$0xf0] }
 0x21d   :  { %5340 = vmatpush.bf16.msrb.mxu0 %v6484_v7  ;;  %v5069_v6 = vpop.f32.mrf.mxu3  ;;  %v6824_v7 = vor.u32 %v8812_v60, %v6823_v59  ;;  %v6068_v33 = vor.u32 %v8623_v1, %v6067_v63  ;;  %v8896_v49 = vld [vmem:[#allocation5 + $0xb10] sm:$0xf0]  ;;  %v9033_v59 = vld [vmem:[#allocation5 + $0xf5c] sm:$0xf]  ;;  %v7749_v60 = vld [vmem:[#allocation5 + $0xfac] sm:$0xf0] }
 0x21e   :  { %5366 = vmatpush.bf16.msrb.mxu2 %v7828_v8  ;;  %5328 = vmatmul.bf16.vlgmr.msra.gmra.mxu3 %v9380_v46  ;;  %v5095_v8 = vpop.f32.mrf.mxu1  ;;  %v5070_v10 = vadd.f32 %v5069_v6, %v812_v56  ;;  %v6487_v63 = vld [vmem:[#allocation5 + $0x580] sm:$0xf]  ;;  %v8728_v1 = vld [vmem:[#allocation5 + $0x5d0] sm:$0xf0]  ;;  %v8697_v6 = vld [vmem:[#allocation5 + $0x4dc] sm:$0xf] }
 0x21f   :  { %5379 = vmatpush.bf16.msrb.mxu3 %v8500_v3  ;;  %v8959_v3 = vld [vmem:[#allocation5 + $0xd08] sm:$0xf0] }
 0x220   :  { %5353 = vmatpush.bf16.msrb.mxu1 %v7156_v21  ;;  %5341 = vmatmul.bf16.vlgmr.msrb.gmra.mxu0 %v9387_v0  ;;  %v7412_v13 = vor.u32 %v8959_v3, %v7411_v2  ;;  %v5083_v23 = vadd.f32 %v5082_v55, %v5070_v10  ;;  %v7160_v2 = vor.u32 %v8896_v49, %v7159_v47  ;;  %v6405_v10 = vld [vmem:[#allocation5 + $0x52c] sm:$0xf0]  ;;  %v7497_v47 = vld [vmem:[#allocation5 + $0xdb4] sm:$0xf0] }
 0x221   :  { %5385 = vmatpush.bf16.msra.mxu0 %v6404_v12  ;;  %5367 = vmatmul.bf16.vlgmr.msrb.gmra.mxu2 %v9384_v58  ;;  %v8791_v12 = vld [vmem:[#allocation5 + $0x7c8] sm:$0xf0]  ;;  %v5108_v48 = vpop.f32.mrf.mxu2  ;;  %v5084_v22 = vpop.f32.mrf.mxu0  ;;  %v7832_v3 = vor.u32 %v9064_v52, %v7831_v51  ;;  %v6408_v9 = vor.u32 %v8697_v6, %v6405_v10  ;;  %v8634_v52 = vld [vmem:[#allocation5 + $0x2e4] sm:$0xf]  ;;  %v8085_v10 = vld [vmem:[#allocation5 + $0x124c] sm:$0xf0] }
 0x222   :  { %5411 = vmatpush.bf16.msra.mxu2 %v7748_v53  ;;  %v5983_v53 = vld [vmem:[#allocation5 + $0x190] sm:$0xf]  ;;  %v6740_v21 = vor.u32 %v8791_v12, %v6739_v11  ;;  %v6321_v22 = vld [vmem:[#allocation5 + $0x484] sm:$0xf0] }
 0x223   :  { %5424 = vmatpush.bf16.msra.mxu3 %v8420_v16  ;;  %5354 = vmatmul.bf16.vlgmr.msrb.gmra.mxu1 %v9382_v50  ;;  %v8602_v16 = vld [vmem:[#allocation5 + $0x1e0] sm:$0xf0]  ;;  %v8421_v11 = vld [vmem:[#allocation5 + $0x14ec] sm:$0xf0] }
 0x224   :  { %5398 = vmatpush.bf16.msra.mxu1 %v7076_v14  ;;  %v5984_v24 = vor.u32 %v8602_v16, %v5983_v53  ;;  %v6655_v14 = vld [vmem:[#allocation5 + $0x6d0] sm:$0xf]  ;;  %v6993_v53 = vld [vmem:[#allocation5 + $0x9c4] sm:$0xf0] }
 0x225   :  { %5386 = vmatpush.bf16.msra.mxu0 %v6320_v25  ;;  %v8770_v25 = vld [vmem:[#allocation5 + $0x720] sm:$0xf0]  ;;  %v5071_v34 = vpop.f32.mrf.mxu3 }
 0x226   :  { %5412 = vmatpush.bf16.msra.mxu2 %v7664_v28  ;;  %v5899_v28 = vld [vmem:[#allocation5 + $0xe8] sm:$0xf]  ;;  %v6656_v35 = vor.u32 %v8770_v25, %v6655_v14  ;;  %v7668_v25 = vor.u32 %v9012_v18, %v7665_v20  ;;  %v6237_v34 = vld [vmem:[#allocation5 + $0x3dc] sm:$0xf0] }
 0x227   :  { %5425 = vmatpush.bf16.msra.mxu3 %v8336_v29  ;;  %v8581_v29 = vld [vmem:[#allocation5 + $0x138] sm:$0xf0]  ;;  %v8337_v14 = vld [vmem:[#allocation5 + $0x1444] sm:$0xf0]  ;;  %v6240_v49 = vor.u32 %v8655_v31, %v6237_v34  ;;  %v5901_v34 = vld [vmem:[#allocation5 + $0x13c] sm:$0xf0] }
 0x228   :  { %5399 = vmatpush.bf16.msra.mxu1 %v6992_v36  ;;  %v5097_v36 = vpop.f32.mrf.mxu1  ;;  %v5900_v39 = vor.u32 %v8581_v29, %v5899_v28  ;;  %v8991_v28 = vld [vmem:[#allocation5 + $0xe0c] sm:$0xf]  ;;  %v7581_v29 = vld [vmem:[#allocation5 + $0xe5c] sm:$0xf0] }
 0x229   :  { %5387 = vmatpush.bf16.msra.mxu0 %v6236_v37  ;;  %v5096_v37 = vadd.f32 %v5095_v8, %v5083_v23  ;;  %v5110_v55 = vpop.f32.mrf.mxu2  ;;  %v7752_v8 = vor.u32 %v9033_v59, %v7749_v60  ;;  %v8253_v36 = vld [vmem:[#allocation5 + $0x139c] sm:$0xf0] }
 0x22a   :  { %5413 = vmatpush.bf16.msra.mxu2 %v7580_v41  ;;  %v8749_v41 = vld [vmem:[#allocation5 + $0x678] sm:$0xf0]  ;;  %v6153_v55 = vld [vmem:[#allocation5 + $0x334] sm:$0xf0] }
 0x22b   :  { %5426 = vmatpush.bf16.msra.mxu3 %v8252_v42  ;;  %v5815_v42 = vld [vmem:[#allocation5 + $0x40] sm:$0xf]  ;;  %v6572_v56 = vor.u32 %v8749_v41, %v6571_v40  ;;  %v7584_v41 = vor.u32 %v8991_v28, %v7581_v29  ;;  %v8907_v28 = vld [vmem:[#allocation5 + $0xb6c] sm:$0xf] }
 0x22c   :  { %5400 = vmatpush.bf16.msra.mxu1 %v6908_v54  ;;  %v8865_v54 = vld [vmem:[#allocation5 + $0xa1c] sm:$0xf]  ;;  %v7245_v29 = vld [vmem:[#allocation5 + $0xbbc] sm:$0xf0] }
 0x22d   :  { %5388 = vmatpush.bf16.msra.mxu0 %v6152_v57  ;;  %v7077_v57 = vld [vmem:[#allocation5 + $0xa6c] sm:$0xf0]  ;;  %v5121_v12 = vpop.f32.mrf.mxu3 }
 0x22e   :  { %5414 = vmatpush.bf16.msra.mxu2 %v7496_v61  ;;  %8536 = vmatmul.msk.bf16.vlgmr.msrb.gmra.mxu3 %vm4341_vm0, %v9392_v38  ;;  %v5109_v61 = vadd.f32 %v5108_v48, %v5096_v37 }
 0x22f   :  { %5427 = vmatpush.bf16.msra.mxu3 %v8168_v62  ;;  %v5816_v62 = vor.u32 %v8560_v45, %v5815_v42  ;;  %v8802_v42 = vld [vmem:[#allocation5 + $0x824] sm:$0xf] }
 0x230   :  { %5401 = vmatpush.bf16.msra.mxu1 %v6824_v7  ;;  %v7080_v7 = vor.u32 %v8865_v54, %v7077_v57  ;;  %v5122_v16 = vadd.f32 %v5121_v12, %v5109_v61  ;;  %v8970_v45 = vld [vmem:[#allocation5 + $0xd64] sm:$0xf]  ;;  %v8169_v57 = vld [vmem:[#allocation5 + $0x12f4] sm:$0xf0]  ;;  %v8781_v61 = vld [vmem:[#allocation5 + $0x77c] sm:$0xf] }
 0x231   :  { %5389 = vmatpush.bf16.msra.mxu0 %v6068_v33  ;;  %v9201_v33 = vld [vmem:[#allocation5 + $0x149c] sm:$0xf]  ;;  %v7500_v60 = vor.u32 %v8970_v45, %v7497_v47  ;;  %v7161_v45 = vld [vmem:[#allocation5 + $0xb14] sm:$0xf0]  ;;  %v6411_v47 = vld [vmem:[#allocation5 + $0x4e0] sm:$0xf] }
 0x232   :  { %5415 = vmatpush.bf16.msra.mxu2 %v7412_v13  ;;  %v6488_v13 = vor.u32 %v8728_v1, %v6487_v63  ;;  %v8424_v48 = vor.u32 %v9201_v33, %v8421_v11  ;;  %5721 = vst [vmem:[#allocation8 + $0x58] sm:$0x3f] %v5122_v16  ;;  %v8949_v1 = vld [vmem:[#allocation5 + $0xcbc] sm:$0xf]  ;;  %v8928_v16 = vld [vmem:[#allocation5 + $0xc14] sm:$0xf] }
 0x233   :  { %5428 = vmatpush.bf16.msra.mxu3 %v8084_v15  ;;  %v8844_v15 = vld [vmem:[#allocation5 + $0x974] sm:$0xf] }
 0x234   :  { %5402 = vmatpush.bf16.msra.mxu1 %v6740_v21  ;;  %v8676_v21 = vld [vmem:[#allocation5 + $0x434] sm:$0xf]  ;;  %v6996_v23 = vor.u32 %v8844_v15, %v6993_v53  ;;  %v6657_v15 = vld [vmem:[#allocation5 + $0x724] sm:$0xf0] }
 0x235   :  { %5390 = vmatpush.bf16.msra.mxu0 %v5984_v24  ;;  %v9180_v24 = vld [vmem:[#allocation5 + $0x13f4] sm:$0xf]  ;;  %v6324_v19 = vor.u32 %v8676_v21, %v6321_v22  ;;  %v5123_v37 = vpop.f32.mrf.mxu3  ;;  %v5985_v22 = vld [vmem:[#allocation5 + $0x1e4] sm:$0xf0] }
 0x236   :  { %5416 = vmatpush.bf16.msra.mxu2 %v7328_v26  ;;  %v8823_v26 = vld [vmem:[#allocation5 + $0x8cc] sm:$0xf]  ;;  %v8340_v30 = vor.u32 %v9180_v24, %v8337_v14  ;;  %v8001_v24 = vld [vmem:[#allocation5 + $0x11a4] sm:$0xf0]  ;;  %v7917_v37 = vld [vmem:[#allocation5 + $0x10fc] sm:$0xf0] }
 0x237   :  { %5429 = vmatpush.bf16.msra.mxu3 %v8000_v27  ;;  %v6909_v27 = vld [vmem:[#allocation5 + $0x91c] sm:$0xf0] }
 0x238   :  { %5403 = vmatpush.bf16.msra.mxu1 %v6656_v35  ;;  %v6912_v32 = vor.u32 %v8823_v26, %v6909_v27  ;;  %v9159_v35 = vld [vmem:[#allocation5 + $0x134c] sm:$0xf]  ;;  %v6573_v27 = vld [vmem:[#allocation5 + $0x67c] sm:$0xf0] }
 0x239   :  { %5391 = vmatpush.bf16.msra.mxu0 %v5900_v39  ;;  %v9517_v39 = vld [vmem:[#allocation7 + $0x8] sm:$0xff]  ;;  %v8256_v51 = vor.u32 %v9159_v35, %v8253_v36  ;;  %v8739_v26 = vld [vmem:[#allocation5 + $0x62c] sm:$0xf] }
 0x23a   :  { %5417 = vmatpush.bf16.msra.mxu2 %v7244_v43  ;;  %v813_v40 = vperm.slane %v9517_v39, 4  ;;  %v6825_v43 = vld [vmem:[#allocation5 + $0x874] sm:$0xf0]  ;;  %v9075_v35 = vld [vmem:[#allocation5 + $0x10ac] sm:$0xf]  ;;  %v6576_v36 = vor.u32 %v8739_v26, %v6573_v27 }
 0x23b   :  { %5430 = vmatpush.bf16.msra.mxu3 %v7916_v44  ;;  %v5134_v44 = vpop.f32.mrf.mxu0  ;;  %v6828_v54 = vor.u32 %v8802_v42, %v6825_v43  ;;  %v7248_v43 = vor.u32 %v8907_v28, %v7245_v29  ;;  %v6915_v26 = vld [vmem:[#allocation5 + $0x8d0] sm:$0xf]  ;;  %v8834_v27 = vld [vmem:[#allocation5 + $0x920] sm:$0xf0]  ;;  %v8343_v29 = vld [vmem:[#allocation5 + $0x13f8] sm:$0xf] }
 0x23c   :  { %5404 = vmatpush.bf16.msra.mxu1 %v6572_v56  ;;  %v9138_v56 = vld [vmem:[#allocation5 + $0x12a4] sm:$0xf]  ;;  %v5135_v59 = vadd.f32 %v5134_v44, %v813_v40  ;;  %v5147_v63 = vpop.f32.mrf.mxu1 }
 0x23d   :  { %5392 = vmatpush.bf16.msra.mxu0 %v5816_v62  ;;  %v6741_v62 = vld [vmem:[#allocation5 + $0x7cc] sm:$0xf0]  ;;  %v8172_v4 = vor.u32 %v9138_v56, %v8169_v57  ;;  %v8718_v40 = vld [vmem:[#allocation5 + $0x584] sm:$0xf] }
 0x23e   :  { %5418 = vmatpush.bf16.msra.mxu2 %v7160_v2  ;;  %v7413_v2 = vld [vmem:[#allocation5 + $0xd0c] sm:$0xf0]  ;;  %v6744_v6 = vor.u32 %v8781_v61, %v6741_v62  ;;  %v5148_v33 = vadd.f32 %v5147_v63, %v5135_v59  ;;  %v8886_v44 = vld [vmem:[#allocation5 + $0xac4] sm:$0xf]  ;;  %v7920_v59 = vor.u32 %v9075_v35, %v7917_v37  ;;  %v5817_v61 = vld [vmem:[#allocation5 + $0x94] sm:$0xf0] }
 0x23f   :  { %5431 = vmatpush.bf16.msra.mxu3 %v7832_v3  ;;  %v6156_v3 = vor.u32 %v8634_v52, %v6153_v55  ;;  %v7416_v12 = vor.u32 %v8949_v1, %v7413_v2  ;;  %v8708_v52 = vld [vmem:[#allocation5 + $0x530] sm:$0xf0]  ;;  %v9054_v62 = vld [vmem:[#allocation5 + $0x1004] sm:$0xf]  ;;  %v7833_v2 = vld [vmem:[#allocation5 + $0x1054] sm:$0xf0] }
 0x240   :  { %5405 = vmatpush.bf16.msra.mxu1 %v6488_v13  ;;  %5393 = vmatmul.bf16.vlgmr.msra.gmra.mxu0 %v9380_v46  ;;  %v5160_v11 = vpop.f32.mrf.mxu2  ;;  %v8760_v13 = vld [vmem:[#allocation5 + $0x6d4] sm:$0xf]  ;;  %v6159_v35 = vld [vmem:[#allocation5 + $0x2e8] sm:$0xf] }
 0x241   :  { %5419 = vmatmul.bf16.vlgmr.msra.gmra.mxu2 %v9382_v50  ;;  %5444 = vmatpush.bf16.msrb.mxu0 %v8504_v17  ;;  %v7329_v17 = vld [vmem:[#allocation5 + $0xc64] sm:$0xf0]  ;;  %v5173_v18 = vpop.f32.mrf.mxu3  ;;  %v6660_v21 = vor.u32 %v8760_v13, %v6657_v15  ;;  %v5161_v14 = vadd.f32 %v5160_v11, %v5148_v33  ;;  %v8876_v55 = vld [vmem:[#allocation5 + $0xa70] sm:$0xf0]  ;;  %v6327_v33 = vld [vmem:[#allocation5 + $0x438] sm:$0xf]  ;;  %v7836_v13 = vor.u32 %v9054_v62, %v7833_v2 }
 0x242   :  { %5463 = vmatpush.bf16.msrb.mxu2 %v7080_v7  ;;  %5432 = vmatmul.bf16.vlgmr.msra.gmra.mxu3 %v9384_v58  ;;  %v6069_v7 = vld [vmem:[#allocation5 + $0x28c] sm:$0xf0]  ;;  %v8687_v11 = vld [vmem:[#allocation5 + $0x488] sm:$0xf0]  ;;  %v6999_v15 = vld [vmem:[#allocation5 + $0x978] sm:$0xf] }
 0x243   :  { %5476 = vmatpush.bf16.msrb.mxu3 %v7752_v8  ;;  %5406 = vmatmul.bf16.vlgmr.msra.gmra.mxu1 %v9387_v0  ;;  %v9117_v8 = vld [vmem:[#allocation5 + $0x11fc] sm:$0xf]  ;;  %v5136_v53 = vpop.f32.mrf.mxu0  ;;  %v6072_v20 = vor.u32 %v8613_v5, %v6069_v7  ;;  %v5174_v42 = vadd.f32 %v5173_v18, %v5161_v14  ;;  %v7164_v5 = vor.u32 %v8886_v44, %v7161_v45  ;;  %v9222_v7 = vld [vmem:[#allocation5 + $0x1544] sm:$0xf]  ;;  %v8427_v18 = vld [vmem:[#allocation5 + $0x14a0] sm:$0xf] }
 0x244   :  { %5450 = vmatpush.bf16.msrb.mxu1 %v6408_v9  ;;  %v8088_v9 = vor.u32 %v9117_v8, %v8085_v10  ;;  %v8505_v8 = vld [vmem:[#allocation5 + $0x1594] sm:$0xf0]  ;;  %v8855_v53 = vld [vmem:[#allocation5 + $0x9c8] sm:$0xf0]  ;;  %v9170_v44 = vld [vmem:[#allocation5 + $0x13a0] sm:$0xf0] }
 0x245   :  { %5489 = vmatpush.bf16.msra.mxu0 %v8424_v48  ;;  %v8592_v48 = vld [vmem:[#allocation5 + $0x194] sm:$0xf]  ;;  %v8175_v62 = vld [vmem:[#allocation5 + $0x12a8] sm:$0xf]  ;;  %v7419_v2 = vld [vmem:[#allocation5 + $0xcc0] sm:$0xf] }
 0x246   :  { %5464 = vmatpush.bf16.msrb.mxu2 %v6996_v23  ;;  %v9096_v23 = vld [vmem:[#allocation5 + $0x1154] sm:$0xf] }
 0x247   :  { %5477 = vmatpush.bf16.msrb.mxu3 %v7668_v25  ;;  %v7332_v25 = vor.u32 %v8928_v16, %v7329_v17  ;;  %v8004_v31 = vor.u32 %v9096_v23, %v8001_v24  ;;  %v8508_v17 = vor.u32 %v9222_v7, %v8505_v8  ;;  %v6243_v23 = vld [vmem:[#allocation5 + $0x390] sm:$0xf]  ;;  %v8666_v24 = vld [vmem:[#allocation5 + $0x3e0] sm:$0xf0] }
 0x248   :  { %5451 = vmatpush.bf16.msrb.mxu1 %v6324_v19  ;;  %v5149_v19 = vpop.f32.mrf.mxu1 }
 0x249   :  { %5490 = vmatpush.bf16.msra.mxu0 %v8340_v30  ;;  %v5988_v30 = vor.u32 %v8592_v48, %v5985_v22  ;;  %v5175_v63 = vpop.f32.mrf.mxu3  ;;  %v7671_v48 = vld [vmem:[#allocation5 + $0xeb8] sm:$0xf]  ;;  %v7000_v22 = vor.u32 %v8855_v53, %v6999_v15  ;;  %v9191_v19 = vld [vmem:[#allocation5 + $0x1448] sm:$0xf0]  ;;  %v9128_v15 = vld [vmem:[#allocation5 + $0x1250] sm:$0xf0] }
 0x24a   :  { %5465 = vmatpush.bf16.msrb.mxu2 %v6912_v32  ;;  %v8571_v32 = vld [vmem:[#allocation5 + $0xec] sm:$0xf]  ;;  %v8344_v37 = vor.u32 %v9191_v19, %v8343_v29  ;;  %v9149_v63 = vld [vmem:[#allocation5 + $0x12f8] sm:$0xf0] }
 0x24b   :  { %5478 = vmatpush.bf16.msrb.mxu3 %v7584_v41  ;;  %v6489_v41 = vld [vmem:[#allocation5 + $0x5d4] sm:$0xf0]  ;;  %v5904_v57 = vor.u32 %v8571_v32, %v5901_v34  ;;  %v9002_v32 = vld [vmem:[#allocation5 + $0xe60] sm:$0xf0]  ;;  %v6916_v34 = vor.u32 %v8834_v27, %v6915_v26 }
 0x24c   :  { %5452 = vmatpush.bf16.msrb.mxu1 %v6240_v49  ;;  %v5162_v49 = vpop.f32.mrf.mxu2  ;;  %v6492_v1 = vor.u32 %v8718_v40, %v6489_v41  ;;  %v6831_v40 = vld [vmem:[#allocation5 + $0x828] sm:$0xf]  ;;  %v8813_v41 = vld [vmem:[#allocation5 + $0x878] sm:$0xf0]  ;;  %v8007_v27 = vld [vmem:[#allocation5 + $0x1158] sm:$0xf] }
 0x24d   :  { %5491 = vmatpush.bf16.msra.mxu0 %v8256_v51  ;;  %v5186_v51 = vpop.f32.mrf.mxu0  ;;  %v8981_v49 = vld [vmem:[#allocation5 + $0xdb8] sm:$0xf0] }
 0x24e   :  { %5466 = vmatpush.bf16.msrb.mxu2 %v6828_v54  ;;  %v7083_v54 = vld [vmem:[#allocation5 + $0xa20] sm:$0xf]  ;;  %v5187_v56 = vadd.f32 %v5186_v51, %v5174_v42  ;;  %v6832_v51 = vor.u32 %v8813_v41, %v6831_v40 }
 0x24f   :  { %5479 = vmatpush.bf16.msrb.mxu3 %v7500_v60  ;;  %v8550_v60 = vld [vmem:[#allocation5 + $0x44] sm:$0xf]  ;;  %v7084_v10 = vor.u32 %v8876_v55, %v7083_v54  ;;  %v8624_v54 = vld [vmem:[#allocation5 + $0x290] sm:$0xf0] }
 0x250   :  { %5453 = vmatpush.bf16.msrb.mxu1 %v6156_v3  ;;  %8537 = vmatmul.msk.bf16.vlgmr.msrb.gmra.mxu0 %vm4341_vm0, %v9392_v38  ;;  %v7755_v3 = vld [vmem:[#allocation5 + $0xf60] sm:$0xf]  ;;  %5722 = vst [vmem:[#allocation8 + $0x60] sm:$0x3f] %v5187_v56  ;;  %v814_v56 = vperm.slane %v9517_v39, 5 }
 0x251   :  { %5492 = vmatpush.bf16.msra.mxu0 %v8172_v4  ;;  %v9044_v4 = vld [vmem:[#allocation5 + $0xfb0] sm:$0xf0] }
 0x252   :  { %5467 = vmatpush.bf16.msrb.mxu2 %v6744_v6  ;;  %v6412_v6 = vor.u32 %v8708_v52, %v6411_v47  ;;  %v7756_v16 = vor.u32 %v9044_v4, %v7755_v3  ;;  %v7503_v47 = vld [vmem:[#allocation5 + $0xd68] sm:$0xf]  ;;  %v6075_v52 = vld [vmem:[#allocation5 + $0x240] sm:$0xf]  ;;  %v8960_v3 = vld [vmem:[#allocation5 + $0xd10] sm:$0xf0] }
 0x253   :  { %5480 = vmatpush.bf16.msrb.mxu3 %v7416_v12  ;;  %v5820_v12 = vor.u32 %v8550_v60, %v5817_v61  ;;  %v8792_v60 = vld [vmem:[#allocation5 + $0x7d0] sm:$0xf0]  ;;  %v7504_v61 = vor.u32 %v8981_v49, %v7503_v47  ;;  %v9086_v49 = vld [vmem:[#allocation5 + $0x1100] sm:$0xf0] }
 0x254   :  { %5454 = vmatpush.bf16.msrb.mxu1 %v6072_v20  ;;  %v9212_v20 = vld [vmem:[#allocation5 + $0x14f0] sm:$0xf0] }
 0x255   :  { %5493 = vmatpush.bf16.msra.mxu0 %v8088_v9  ;;  %v6328_v9 = vor.u32 %v8687_v11, %v6327_v33  ;;  %v5188_v14 = vpop.f32.mrf.mxu0  ;;  %v6663_v33 = vld [vmem:[#allocation5 + $0x6d8] sm:$0xf]  ;;  %v8771_v11 = vld [vmem:[#allocation5 + $0x728] sm:$0xf0] }
 0x256   :  { %5468 = vmatpush.bf16.msrb.mxu2 %v6660_v21  ;;  %v9023_v21 = vld [vmem:[#allocation5 + $0xf08] sm:$0xf0]  ;;  %v8750_v14 = vld [vmem:[#allocation5 + $0x680] sm:$0xf0] }
 0x257   :  { %5481 = vmatpush.bf16.msrb.mxu3 %v7332_v25  ;;  %v8428_v25 = vor.u32 %v9212_v20, %v8427_v18  ;;  %v7672_v28 = vor.u32 %v9023_v21, %v7671_v48  ;;  %v8939_v18 = vld [vmem:[#allocation5 + $0xc68] sm:$0xf0]  ;;  %v6664_v20 = vor.u32 %v8771_v11, %v6663_v33  ;;  %v8582_v48 = vld [vmem:[#allocation5 + $0x140] sm:$0xf0]  ;;  %v8677_v33 = vld [vmem:[#allocation5 + $0x43c] sm:$0xf] }
 0x258   :  { %5455 = vmatpush.bf16.msrb.mxu1 %v5988_v30  ;;  %v6244_v30 = vor.u32 %v8666_v24, %v6243_v23  ;;  %v6579_v24 = vld [vmem:[#allocation5 + $0x630] sm:$0xf] }
 0x259   :  { %5494 = vmatpush.bf16.msra.mxu0 %v8004_v31  ;;  %v7587_v31 = vld [vmem:[#allocation5 + $0xe10] sm:$0xf] }
 0x25a   :  { %5469 = vmatpush.bf16.msrb.mxu2 %v6576_v36  ;;  %v8645_v36 = vld [vmem:[#allocation5 + $0x338] sm:$0xf0]  ;;  %v7588_v42 = vor.u32 %v9002_v32, %v7587_v31  ;;  %v8918_v31 = vld [vmem:[#allocation5 + $0xbc0] sm:$0xf0]  ;;  %v5823_v32 = vld [vmem:[#allocation5 + $0x48] sm:$0xf] }
 0x25b   :  { %5482 = vmatpush.bf16.msrb.mxu3 %v7248_v43  ;;  %v8259_v43 = vld [vmem:[#allocation5 + $0x1350] sm:$0xf]  ;;  %v6160_v45 = vor.u32 %v8645_v36, %v6159_v35  ;;  %v8561_v35 = vld [vmem:[#allocation5 + $0x98] sm:$0xf0]  ;;  %v6495_v36 = vld [vmem:[#allocation5 + $0x588] sm:$0xf] }
 0x25c   :  { %5456 = vmatpush.bf16.msrb.mxu1 %v5904_v57  ;;  %v8260_v55 = vor.u32 %v9170_v44, %v8259_v43  ;;  %v5199_v57 = vpop.f32.mrf.mxu1  ;;  %v8511_v43 = vld [vmem:[#allocation5 + $0x1548] sm:$0xf]  ;;  %v9233_v44 = vld [vmem:[#allocation5 + $0x1598] sm:$0xf0]  ;;  %v6329_v11 = vld [vmem:[#allocation5 + $0x48c] sm:$0xf0] }
 0x25d   :  { %5495 = vmatpush.bf16.msra.mxu0 %v7920_v59  ;;  %v6747_v59 = vld [vmem:[#allocation5 + $0x780] sm:$0xf]  ;;  %v5238_v7 = vpop.f32.mrf.mxu0  ;;  %v5200_v8 = vadd.f32 %v5199_v57, %v814_v56  ;;  %v7167_v56 = vld [vmem:[#allocation5 + $0xac8] sm:$0xf]  ;;  %v8897_v57 = vld [vmem:[#allocation5 + $0xb18] sm:$0xf0] }
 0x25e   :  { %5470 = vmatpush.bf16.msrb.mxu2 %v6492_v1  ;;  %v6076_v1 = vor.u32 %v8624_v54, %v6075_v52  ;;  %v6748_v4 = vor.u32 %v8792_v60, %v6747_v59  ;;  %v6413_v52 = vld [vmem:[#allocation5 + $0x534] sm:$0xf0]  ;;  %v8866_v59 = vld [vmem:[#allocation5 + $0xa24] sm:$0xf] }
 0x25f   :  { %5483 = vmatpush.bf16.msrb.mxu3 %v7164_v5  ;;  %v5991_v5 = vld [vmem:[#allocation5 + $0x198] sm:$0xf] }
 0x260   :  { %5457 = vmatpush.bf16.msrb.mxu1 %v5820_v12  ;;  %v7420_v12 = vor.u32 %v8960_v3, %v7419_v2  ;;  %v5212_v21 = vpop.f32.mrf.mxu2 }
 0x261   :  { %5496 = vmatpush.bf16.msra.mxu0 %v7836_v13  ;;  %5471 = vmatmul.bf16.vlgmr.msrb.gmra.mxu2 %v9387_v0  ;;  %v8091_v13 = vld [vmem:[#allocation5 + $0x1200] sm:$0xf]  ;;  %v5225_v53 = vpop.f32.mrf.mxu3 }
 0x262   :  { %5515 = vmatpush.bf16.msra.mxu2 %v6412_v6  ;;  %5484 = vmatmul.bf16.vlgmr.msrb.gmra.mxu3 %v9382_v50  ;;  %v8603_v6 = vld [vmem:[#allocation5 + $0x1e8] sm:$0xf0] }
 0x263   :  { %5528 = vmatpush.bf16.msra.mxu3 %v7084_v10  ;;  %5458 = vmatmul.bf16.vlgmr.msrb.gmra.mxu1 %v9380_v46  ;;  %v8176_v10 = vor.u32 %v9149_v63, %v8175_v62  ;;  %v7085_v62 = vld [vmem:[#allocation5 + $0xa74] sm:$0xf0]  ;;  %v9202_v63 = vld [vmem:[#allocation5 + $0x14a4] sm:$0xf] }
 0x264   :  { %5509 = vmatpush.bf16.msra.mxu1 %v8508_v17  ;;  %5497 = vmatmul.bf16.vlgmr.msra.gmra.mxu0 %v9384_v58  ;;  %v7335_v17 = vld [vmem:[#allocation5 + $0xc18] sm:$0xf]  ;;  %v5201_v23 = vpop.f32.mrf.mxu1 }
 0x265   :  { %5541 = vmatpush.bf16.msrb.mxu0 %v7756_v16  ;;  %v5992_v16 = vor.u32 %v8603_v6, %v5991_v5  ;;  %v7336_v26 = vor.u32 %v8939_v18, %v7335_v17  ;;  %v5240_v40 = vpop.f32.mrf.mxu0  ;;  %v7839_v6 = vld [vmem:[#allocation5 + $0x1008] sm:$0xf]  ;;  %v7001_v17 = vld [vmem:[#allocation5 + $0x9cc] sm:$0xf0]  ;;  %v9181_v18 = vld [vmem:[#allocation5 + $0x13fc] sm:$0xf] }
 0x266   :  { %5516 = vmatpush.bf16.msra.mxu2 %v6328_v9  ;;  %v5907_v9 = vld [vmem:[#allocation5 + $0xf0] sm:$0xf]  ;;  %v6245_v23 = vld [vmem:[#allocation5 + $0x3e4] sm:$0xf0]  ;;  %v8992_v40 = vld [vmem:[#allocation5 + $0xe14] sm:$0xf] }
 0x267   :  { %5529 = vmatpush.bf16.msra.mxu3 %v7000_v22  ;;  %v8092_v22 = vor.u32 %v9128_v15, %v8091_v13  ;;  %v5908_v29 = vor.u32 %v8582_v48, %v5907_v9  ;;  %v7088_v13 = vor.u32 %v8866_v59, %v7085_v62  ;;  %v6332_v48 = vor.u32 %v8677_v33, %v6329_v11  ;;  %v7505_v59 = vld [vmem:[#allocation5 + $0xdbc] sm:$0xf0]  ;;  %v6749_v62 = vld [vmem:[#allocation5 + $0x7d4] sm:$0xf0]  ;;  %v8950_v11 = vld [vmem:[#allocation5 + $0xcc4] sm:$0xf] }
 0x268   :  { %5554 = vmatpush.bf16.msrb.mxu1 %v8428_v25  ;;  %v5213_v25 = vadd.f32 %v5212_v21, %v5200_v8  ;;  %v5214_v2 = vpop.f32.mrf.mxu2 }
 0x269   :  { %5542 = vmatpush.bf16.msrb.mxu0 %v7672_v28  ;;  %v9107_v28 = vld [vmem:[#allocation5 + $0x11a8] sm:$0xf0]  ;;  %v5227_v54 = vpop.f32.mrf.mxu3 }
 0x26a   :  { %5517 = vmatpush.bf16.msra.mxu2 %v6244_v30  ;;  %v5226_v19 = vadd.f32 %v5225_v53, %v5213_v25  ;;  %v7251_v30 = vld [vmem:[#allocation5 + $0xb70] sm:$0xf]  ;;  %v8008_v41 = vor.u32 %v9107_v28, %v8007_v27  ;;  %v7757_v53 = vld [vmem:[#allocation5 + $0xfb4] sm:$0xf0]  ;;  %v9013_v25 = vld [vmem:[#allocation5 + $0xebc] sm:$0xf] }
 0x26b   :  { %5530 = vmatpush.bf16.msra.mxu3 %v6916_v34  ;;  %v6580_v34 = vor.u32 %v8750_v14, %v6579_v24  ;;  %v8824_v27 = vld [vmem:[#allocation5 + $0x8d4] sm:$0xf]  ;;  %v6917_v28 = vld [vmem:[#allocation5 + $0x924] sm:$0xf0]  ;;  %v815_v54 = vperm.slane %v9517_v39, 6 }
 0x26c   :  { %5555 = vmatpush.bf16.msrb.mxu1 %v8344_v37  ;;  %v8729_v37 = vld [vmem:[#allocation5 + $0x5d8] sm:$0xf0]  ;;  %v5239_v47 = vadd.f32 %v5238_v7, %v5226_v19  ;;  %v5251_v5 = vpop.f32.mrf.mxu1  ;;  %v8261_v19 = vld [vmem:[#allocation5 + $0x13a4] sm:$0xf0] }
 0x26d   :  { %5543 = vmatpush.bf16.msrb.mxu0 %v7588_v42  ;;  %v7923_v42 = vld [vmem:[#allocation5 + $0x10b0] sm:$0xf]  ;;  %v6496_v60 = vor.u32 %v8729_v37, %v6495_v36  ;;  %v9065_v7 = vld [vmem:[#allocation5 + $0x1058] sm:$0xf0]  ;;  %v6920_v36 = vor.u32 %v8824_v27, %v6917_v28  ;;  %v6581_v27 = vld [vmem:[#allocation5 + $0x684] sm:$0xf0] }
 0x26e   :  { %5518 = vmatpush.bf16.msra.mxu2 %v6160_v45  ;;  %v7252_v45 = vor.u32 %v8918_v31, %v7251_v30  ;;  %v7924_v3 = vor.u32 %v9086_v49, %v7923_v42  ;;  %v5252_v8 = vadd.f32 %v5251_v5, %v5239_v47  ;;  %v7840_v9 = vor.u32 %v9065_v7, %v7839_v6  ;;  %v8803_v42 = vld [vmem:[#allocation5 + $0x82c] sm:$0xf]  ;;  %v8593_v7 = vld [vmem:[#allocation5 + $0x19c] sm:$0xf]  ;;  %v9076_v28 = vld [vmem:[#allocation5 + $0x10b4] sm:$0xf] }
 0x26f   :  { %5531 = vmatpush.bf16.msra.mxu3 %v6832_v51  ;;  %v8698_v51 = vld [vmem:[#allocation5 + $0x4e4] sm:$0xf] }
 0x270   :  { %5556 = vmatpush.bf16.msrb.mxu1 %v8260_v55  ;;  %v5824_v55 = vor.u32 %v8561_v35, %v5823_v32  ;;  %5723 = vst [vmem:[#allocation8 + $0x68] sm:$0x3f] %v5252_v8  ;;  %v6161_v35 = vld [vmem:[#allocation5 + $0x33c] sm:$0xf0]  ;;  %v5993_v8 = vld [vmem:[#allocation5 + $0x1ec] sm:$0xf0] }
 0x271   :  { %5544 = vmatpush.bf16.msrb.mxu0 %v7504_v61  ;;  %v8512_v61 = vor.u32 %v9233_v44, %v8511_v43  ;;  %v6833_v43 = vld [vmem:[#allocation5 + $0x87c] sm:$0xf0]  ;;  %v9139_v44 = vld [vmem:[#allocation5 + $0x12ac] sm:$0xf] }
 0x272   :  { %5519 = vmatpush.bf16.msra.mxu2 %v6076_v1  ;;  %v8429_v1 = vld [vmem:[#allocation5 + $0x14f4] sm:$0xf0] }
 0x273   :  { %5532 = vmatpush.bf16.msra.mxu3 %v6748_v4  ;;  %8538 = vmatmul.msk.bf16.vlgmr.msra.gmra.mxu1 %vm4341_vm0, %v9392_v38  ;;  %v6416_v4 = vor.u32 %v8698_v51, %v6413_v52  ;;  %v8432_v15 = vor.u32 %v9202_v63, %v8429_v1  ;;  %v8614_v51 = vld [vmem:[#allocation5 + $0x244] sm:$0xf]  ;;  %v6077_v52 = vld [vmem:[#allocation5 + $0x294] sm:$0xf0] }
 0x274   :  { %5557 = vmatpush.bf16.msrb.mxu1 %v8176_v10  ;;  %v7168_v10 = vor.u32 %v8897_v57, %v7167_v56  ;;  %v5253_v31 = vpop.f32.mrf.mxu1  ;;  %v8971_v57 = vld [vmem:[#allocation5 + $0xd6c] sm:$0xf]  ;;  %v9118_v63 = vld [vmem:[#allocation5 + $0x1204] sm:$0xf]  ;;  %v8093_v1 = vld [vmem:[#allocation5 + $0x1254] sm:$0xf0]  ;;  %v6080_v2 = vor.u32 %v8614_v51, %v6077_v52 }
 0x275   :  { %5545 = vmatpush.bf16.msrb.mxu0 %v7420_v12  ;;  %v9034_v12 = vld [vmem:[#allocation5 + $0xf64] sm:$0xf]  ;;  %v7508_v6 = vor.u32 %v8971_v57, %v7505_v59  ;;  %v8096_v33 = vor.u32 %v9118_v63, %v8093_v1  ;;  %v8551_v31 = vld [vmem:[#allocation5 + $0x4c] sm:$0xf]  ;;  %v7841_v52 = vld [vmem:[#allocation5 + $0x105c] sm:$0xf0] }
 0x276   :  { %5520 = vmatpush.bf16.msra.mxu2 %v5992_v16  ;;  %v8845_v16 = vld [vmem:[#allocation5 + $0x97c] sm:$0xf]  ;;  %v7760_v21 = vor.u32 %v9034_v12, %v7757_v53  ;;  %v7421_v12 = vld [vmem:[#allocation5 + $0xd14] sm:$0xf0]  ;;  %v6665_v53 = vld [vmem:[#allocation5 + $0x72c] sm:$0xf0] }
 0x277   :  { %5533 = vmatpush.bf16.msra.mxu3 %v6664_v20  ;;  %v8345_v20 = vld [vmem:[#allocation5 + $0x144c] sm:$0xf0]  ;;  %v7004_v24 = vor.u32 %v8845_v16, %v7001_v17  ;;  %v9097_v16 = vld [vmem:[#allocation5 + $0x115c] sm:$0xf]  ;;  %v9055_v51 = vld [vmem:[#allocation5 + $0x100c] sm:$0xf] }
 0x278   :  { %5558 = vmatpush.bf16.msrb.mxu1 %v8092_v22  ;;  %v8656_v22 = vld [vmem:[#allocation5 + $0x394] sm:$0xf]  ;;  %v8348_v14 = vor.u32 %v9181_v18, %v8345_v20  ;;  %v8009_v17 = vld [vmem:[#allocation5 + $0x11ac] sm:$0xf0]  ;;  %v5996_v18 = vor.u32 %v8593_v7, %v5993_v8  ;;  %v7424_v20 = vor.u32 %v8950_v11, %v7421_v12  ;;  %v7763_v57 = vld [vmem:[#allocation5 + $0xf68] sm:$0xf] }
 0x279   :  { %5546 = vmatpush.bf16.msrb.mxu0 %v7336_v26  ;;  %v7673_v26 = vld [vmem:[#allocation5 + $0xf0c] sm:$0xf0]  ;;  %v6248_v30 = vor.u32 %v8656_v22, %v6245_v23  ;;  %v8012_v23 = vor.u32 %v9097_v16, %v8009_v17  ;;  %v8435_v63 = vld [vmem:[#allocation5 + $0x14a8] sm:$0xf]  ;;  %v9213_v1 = vld [vmem:[#allocation5 + $0x14f8] sm:$0xf0] }
 0x27a   :  { %5521 = vmatpush.bf16.msra.mxu2 %v5908_v29  ;;  %v9160_v29 = vld [vmem:[#allocation5 + $0x1354] sm:$0xf]  ;;  %v7676_v32 = vor.u32 %v9013_v25, %v7673_v26  ;;  %v7091_v8 = vld [vmem:[#allocation5 + $0xa28] sm:$0xf]  ;;  %v8436_v12 = vor.u32 %v9213_v1, %v8435_v63  ;;  %v9129_v63 = vld [vmem:[#allocation5 + $0x1258] sm:$0xf0] }
 0x27b   :  { %5534 = vmatpush.bf16.msra.mxu3 %v6580_v34  ;;  %v8635_v34 = vld [vmem:[#allocation5 + $0x2ec] sm:$0xf]  ;;  %v8264_v37 = vor.u32 %v9160_v29, %v8261_v19  ;;  %v8740_v25 = vld [vmem:[#allocation5 + $0x634] sm:$0xf]  ;;  %v7925_v29 = vld [vmem:[#allocation5 + $0x1104] sm:$0xf0] }
 0x27c   :  { %5559 = vmatpush.bf16.msrb.mxu1 %v8008_v41  ;;  %v7589_v41 = vld [vmem:[#allocation5 + $0xe64] sm:$0xf0]  ;;  %v6164_v47 = vor.u32 %v8635_v34, %v6161_v35  ;;  %v5825_v35 = vld [vmem:[#allocation5 + $0x9c] sm:$0xf0]  ;;  %v9024_v17 = vld [vmem:[#allocation5 + $0xf10] sm:$0xf0] }
 0x27d   :  { %5547 = vmatpush.bf16.msrb.mxu0 %v7252_v45  ;;  %v8177_v45 = vld [vmem:[#allocation5 + $0x12fc] sm:$0xf0]  ;;  %v7592_v49 = vor.u32 %v8992_v40, %v7589_v41  ;;  %v7253_v40 = vld [vmem:[#allocation5 + $0xbc4] sm:$0xf0]  ;;  %v6584_v41 = vor.u32 %v8740_v25, %v6581_v27  ;;  %v8667_v25 = vld [vmem:[#allocation5 + $0x3e8] sm:$0xf0] }
 0x27e   :  { %5522 = vmatpush.bf16.msra.mxu2 %v5824_v55  ;;  %v6836_v55 = vor.u32 %v8803_v42, %v6833_v43  ;;  %v8180_v56 = vor.u32 %v9139_v44, %v8177_v45  ;;  %v7928_v42 = vor.u32 %v9076_v28, %v7925_v29  ;;  %v8719_v43 = vld [vmem:[#allocation5 + $0x58c] sm:$0xf]  ;;  %v8513_v45 = vld [vmem:[#allocation5 + $0x159c] sm:$0xf0]  ;;  %v8267_v28 = vld [vmem:[#allocation5 + $0x1358] sm:$0xf] }
 0x27f   :  { %5535 = vmatpush.bf16.msra.mxu3 %v6496_v60  ;;  %v8782_v60 = vld [vmem:[#allocation5 + $0x784] sm:$0xf]  ;;  %v9223_v44 = vld [vmem:[#allocation5 + $0x154c] sm:$0xf] }
 0x280   :  { %5560 = vmatpush.bf16.msrb.mxu1 %v7924_v3  ;;  %v5264_v3 = vpop.f32.mrf.mxu2  ;;  %v9003_v27 = vld [vmem:[#allocation5 + $0xe68] sm:$0xf0] }
 0x281   :  { %5548 = vmatpush.bf16.msrb.mxu0 %v7168_v10  ;;  %5523 = vmatmul.bf16.vlgmr.msra.gmra.mxu2 %v9380_v46  ;;  %v5265_v5 = vadd.f32 %v5264_v3, %v815_v54  ;;  %v6752_v10 = vor.u32 %v8782_v60, %v6749_v62  ;;  %v5828_v54 = vor.u32 %v8551_v31, %v5825_v35  ;;  %v9171_v29 = vld [vmem:[#allocation5 + $0x13a8] sm:$0xf0]  ;;  %v6923_v31 = vld [vmem:[#allocation5 + $0x8d8] sm:$0xf] }
 0x282   :  { %5574 = vmatpush.bf16.msrb.mxu2 %v8512_v61  ;;  %5536 = vmatmul.bf16.vlgmr.msra.gmra.mxu3 %v9387_v0  ;;  %v5290_v61 = vpop.f32.mrf.mxu0  ;;  %v8516_v62 = vor.u32 %v9223_v44, %v8513_v45  ;;  %v7844_v3 = vor.u32 %v9055_v51, %v7841_v52  ;;  %v8268_v35 = vor.u32 %v9171_v29, %v8267_v28  ;;  %v9150_v44 = vld [vmem:[#allocation5 + $0x1300] sm:$0xf0]  ;;  %v6839_v52 = vld [vmem:[#allocation5 + $0x830] sm:$0xf] }
 0x283   :  { %5580 = vmatpush.bf16.msrb.mxu3 %v6416_v4  ;;  %v9534_v4 = vpop.f32.mrf.mxu1 }
 0x284   :  { %5561 = vmatpush.bf16.msrb.mxu1 %v7840_v9  ;;  %5549 = vmatmul.bf16.vlgmr.msrb.gmra.mxu0 %v9382_v50  ;;  %v8572_v9 = vld [vmem:[#allocation5 + $0xf4] sm:$0xf] }
 0x285   :  { %5593 = vmatpush.bf16.msra.mxu0 %v7088_v13  ;;  %v8761_v13 = vld [vmem:[#allocation5 + $0x6dc] sm:$0xf] }
 0x286   :  { %5619 = vmatpush.bf16.msra.mxu2 %v8432_v15  ;;  %v5277_v15 = vpop.f32.mrf.mxu3  ;;  %v6668_v22 = vor.u32 %v8761_v13, %v6665_v53  ;;  %v6335_v13 = vld [vmem:[#allocation5 + $0x440] sm:$0xf] }
 0x287   :  { %5581 = vmatpush.bf16.msrb.mxu3 %v6332_v48  ;;  %5562 = vmatmul.bf16.vlgmr.msrb.gmra.mxu1 %v9384_v58  ;;  %v5909_v48 = vld [vmem:[#allocation5 + $0x144] sm:$0xf0] }
 0x288   :  { %5606 = vmatpush.bf16.msra.mxu1 %v7760_v21  ;;  %v5278_v21 = vadd.f32 %v5277_v15, %v5265_v5  ;;  %v5912_v19 = vor.u32 %v8572_v9, %v5909_v48  ;;  %v8887_v5 = vld [vmem:[#allocation5 + $0xacc] sm:$0xf]  ;;  %v8688_v15 = vld [vmem:[#allocation5 + $0x490] sm:$0xf0] }
 0x289   :  { %5594 = vmatpush.bf16.msra.mxu0 %v7004_v24  ;;  %v8929_v24 = vld [vmem:[#allocation5 + $0xc1c] sm:$0xf]  ;;  %v6336_v48 = vor.u32 %v8688_v15, %v6335_v13  ;;  %v8940_v13 = vld [vmem:[#allocation5 + $0xc70] sm:$0xf0]  ;;  %v8015_v15 = vld [vmem:[#allocation5 + $0x1160] sm:$0xf] }
 0x28a   :  { %5620 = vmatpush.bf16.msra.mxu2 %v8348_v14  ;;  %v7337_v14 = vld [vmem:[#allocation5 + $0xc6c] sm:$0xf0]  ;;  %v5292_v26 = vpop.f32.mrf.mxu0 }
 0x28b   :  { %5582 = vmatpush.bf16.msrb.mxu3 %v6248_v30  ;;  %v5266_v30 = vpop.f32.mrf.mxu2  ;;  %v7340_v34 = vor.u32 %v8929_v24, %v7337_v14  ;;  %v6251_v14 = vld [vmem:[#allocation5 + $0x398] sm:$0xf] }
 0x28c   :  { %5607 = vmatpush.bf16.msra.mxu1 %v7676_v32  ;;  %v5305_v32 = vpop.f32.mrf.mxu1  ;;  %v7595_v26 = vld [vmem:[#allocation5 + $0xe18] sm:$0xf]  ;;  %v6252_v30 = vor.u32 %v8667_v25, %v6251_v14  ;;  %v8919_v25 = vld [vmem:[#allocation5 + $0xbc8] sm:$0xf0] }
 0x28d   :  { %5595 = vmatpush.bf16.msra.mxu0 %v6920_v36  ;;  %v5291_v36 = vadd.f32 %v5290_v61, %v5278_v21  ;;  %v9045_v61 = vld [vmem:[#allocation5 + $0xfb8] sm:$0xf0]  ;;  %v7007_v21 = vld [vmem:[#allocation5 + $0x980] sm:$0xf]  ;;  %v8835_v32 = vld [vmem:[#allocation5 + $0x928] sm:$0xf0] }
 0x28e   :  { %5621 = vmatpush.bf16.msra.mxu2 %v8264_v37  ;;  %v8908_v37 = vld [vmem:[#allocation5 + $0xb74] sm:$0xf]  ;;  %v6924_v45 = vor.u32 %v8835_v32, %v6923_v31  ;;  %v7259_v14 = vld [vmem:[#allocation5 + $0xb78] sm:$0xf] }
 0x28f   :  { %5583 = vmatpush.bf16.msrb.mxu3 %v6164_v47  ;;  %v5279_v47 = vpop.f32.mrf.mxu3  ;;  %v7256_v59 = vor.u32 %v8908_v37, %v7253_v40  ;;  %v5304_v60 = vadd.f32 %v9534_v4, %v5291_v36  ;;  %v7679_v4 = vld [vmem:[#allocation5 + $0xec0] sm:$0xf]  ;;  %v6167_v36 = vld [vmem:[#allocation5 + $0x2f0] sm:$0xf]  ;;  %v8646_v37 = vld [vmem:[#allocation5 + $0x340] sm:$0xf0] }
 0x290   :  { %5608 = vmatpush.bf16.msra.mxu1 %v7592_v49  ;;  %v6497_v49 = vld [vmem:[#allocation5 + $0x5dc] sm:$0xf0]  ;;  %v7511_v40 = vld [vmem:[#allocation5 + $0xd70] sm:$0xf]  ;;  %v6168_v51 = vor.u32 %v8646_v37, %v6167_v36  ;;  %v6587_v32 = vld [vmem:[#allocation5 + $0x638] sm:$0xf] }
 0x291   :  { %5596 = vmatpush.bf16.msra.mxu0 %v6836_v55  ;;  %8539 = vmatmul.msk.bf16.vlgmr.msrb.gmra.mxu2 %vm4341_vm0, %v9392_v38  ;;  %v6419_v55 = vld [vmem:[#allocation5 + $0x4e8] sm:$0xf]  ;;  %v5831_v37 = vld [vmem:[#allocation5 + $0x50] sm:$0xf] }
 0x292   :  { %5622 = vmatpush.bf16.msra.mxu2 %v8180_v56  ;;  %v8709_v56 = vld [vmem:[#allocation5 + $0x538] sm:$0xf0] }
 0x293   :  { %5584 = vmatpush.bf16.msrb.mxu3 %v6080_v2  ;;  %v6500_v2 = vor.u32 %v8719_v43, %v6497_v49  ;;  %v6420_v7 = vor.u32 %v8709_v56, %v6419_v55  ;;  %v5316_v11 = vpop.f32.mrf.mxu2  ;;  %v8183_v43 = vld [vmem:[#allocation5 + $0x12b0] sm:$0xf]  ;;  %v816_v49 = vperm.slane %v9517_v39, 7 }
 0x294   :  { %5609 = vmatpush.bf16.msra.mxu1 %v7508_v6  ;;  %v7169_v6 = vld [vmem:[#allocation5 + $0xb1c] sm:$0xf0]  ;;  %v5317_v53 = vadd.f32 %v5316_v11, %v5304_v60  ;;  %v8184_v56 = vor.u32 %v9150_v44, %v8183_v43  ;;  %v7427_v60 = vld [vmem:[#allocation5 + $0xcc8] sm:$0xf]  ;;  %v8604_v11 = vld [vmem:[#allocation5 + $0x1f0] sm:$0xf0] }
 0x295   :  { %5597 = vmatpush.bf16.msra.mxu0 %v6752_v10  ;;  %v8877_v10 = vld [vmem:[#allocation5 + $0xa78] sm:$0xf0]  ;;  %v7172_v16 = vor.u32 %v8887_v5, %v7169_v6  ;;  %v6755_v6 = vld [vmem:[#allocation5 + $0x788] sm:$0xf]  ;;  %v7847_v43 = vld [vmem:[#allocation5 + $0x1010] sm:$0xf] }
 0x296   :  { %5623 = vmatpush.bf16.msra.mxu2 %v8096_v33  ;;  %v7764_v33 = vor.u32 %v9045_v61, %v7763_v57  ;;  %v7092_v9 = vor.u32 %v8877_v10, %v7091_v8  ;;  %5724 = vst [vmem:[#allocation8 + $0x70] sm:$0x3f] %v5317_v53  ;;  %v6083_v57 = vld [vmem:[#allocation5 + $0x248] sm:$0xf]  ;;  %v8961_v61 = vld [vmem:[#allocation5 + $0xd18] sm:$0xf0] }
 0x297   :  { %5585 = vmatpush.bf16.msrb.mxu3 %v5996_v18  ;;  %v8351_v18 = vld [vmem:[#allocation5 + $0x1400] sm:$0xf]  ;;  %v7428_v8 = vor.u32 %v8961_v61, %v7427_v60  ;;  %v9066_v44 = vld [vmem:[#allocation5 + $0x1060] sm:$0xf0] }
 0x298   :  { %5610 = vmatpush.bf16.msra.mxu1 %v7424_v20  ;;  %v9192_v20 = vld [vmem:[#allocation5 + $0x1450] sm:$0xf0] }
 0x299   :  { %5598 = vmatpush.bf16.msra.mxu0 %v6668_v22  ;;  %v8856_v22 = vld [vmem:[#allocation5 + $0x9d0] sm:$0xf0]  ;;  %v8352_v24 = vor.u32 %v9192_v20, %v8351_v18 }
 0x29a   :  { %5624 = vmatpush.bf16.msra.mxu2 %v8012_v23  ;;  %v7680_v23 = vor.u32 %v9024_v17, %v7679_v4  ;;  %v9108_v4 = vld [vmem:[#allocation5 + $0x11b0] sm:$0xf0] }
 0x29b   :  { %5586 = vmatpush.bf16.msrb.mxu3 %v5912_v19  ;;  %v7008_v19 = vor.u32 %v8856_v22, %v7007_v21  ;;  %v8016_v22 = vor.u32 %v9108_v4, %v8015_v15 }
 0x29c   :  { %5611 = vmatpush.bf16.msra.mxu1 %v7340_v34  ;;  %v7596_v34 = vor.u32 %v9003_v27, %v7595_v26  ;;  %v7931_v26 = vld [vmem:[#allocation5 + $0x10b8] sm:$0xf]  ;;  %v9087_v27 = vld [vmem:[#allocation5 + $0x1108] sm:$0xf0] }
 0x29d   :  { %5599 = vmatpush.bf16.msra.mxu0 %v6584_v41  ;;  %v5318_v41 = vpop.f32.mrf.mxu2  ;;  %v5342_v47 = vpop.f32.mrf.mxu0  ;;  %v7932_v36 = vor.u32 %v9087_v27, %v7931_v26 }
 0x29e   :  { %5625 = vmatpush.bf16.msra.mxu2 %v7928_v42  ;;  %v8982_v42 = vld [vmem:[#allocation5 + $0xdc0] sm:$0xf0]  ;;  %v7175_v41 = vld [vmem:[#allocation5 + $0xad0] sm:$0xf] }
 0x29f   :  { %5587 = vmatpush.bf16.msrb.mxu3 %v5828_v54  ;;  %v8814_v54 = vld [vmem:[#allocation5 + $0x880] sm:$0xf0]  ;;  %v7512_v55 = vor.u32 %v8982_v42, %v7511_v40 }
 0x2a0   :  { %5612 = vmatpush.bf16.msra.mxu1 %v7256_v59  ;;  %v8625_v59 = vld [vmem:[#allocation5 + $0x298] sm:$0xf0]  ;;  %v8562_v40 = vld [vmem:[#allocation5 + $0xa0] sm:$0xf0] }
 0x2a1   :  { %5600 = vmatpush.bf16.msra.mxu0 %v6500_v2  ;;  %v5329_v1 = vpop.f32.mrf.mxu3  ;;  %v6840_v2 = vor.u32 %v8814_v54, %v6839_v52  ;;  %v6084_v39 = vor.u32 %v8625_v59, %v6083_v57  ;;  %v8898_v42 = vld [vmem:[#allocation5 + $0xb20] sm:$0xf0]  ;;  %v5832_v54 = vor.u32 %v8562_v40, %v5831_v37  ;;  %v7848_v59 = vor.u32 %v9066_v44, %v7847_v43 }
 0x2a2   :  { %5626 = vmatpush.bf16.msra.mxu2 %v7844_v3  ;;  %5588 = vmatmul.bf16.vlgmr.msrb.gmra.mxu3 %v9380_v46  ;;  %v5355_v3 = vpop.f32.mrf.mxu1  ;;  %v5330_v5 = vadd.f32 %v5329_v1, %v816_v49  ;;  %v8519_v49 = vld [vmem:[#allocation5 + $0x1550] sm:$0xf]  ;;  %v7176_v57 = vor.u32 %v8898_v42, %v7175_v41  ;;  %v9549_v1 = vld [vmem:[#allocation7 + $0x10] sm:$0x1f] }
 0x2a3   :  { %5639 = vmatpush.bf16.msra.mxu3 %v8516_v62  ;;  %v8099_v62 = vld [vmem:[#allocation5 + $0x1208] sm:$0xf]  ;;  %v818_v4 = vperm.slane %v9549_v1, 1  ;;  %v819_v27 = vperm.slane %v9549_v1, 2 }
 0x2a4   :  { %5613 = vmatpush.bf16.msra.mxu1 %v7172_v16  ;;  %5601 = vmatmul.bf16.vlgmr.msra.gmra.mxu0 %v9387_v0  ;;  %v8100_v10 = vor.u32 %v9129_v63, %v8099_v62  ;;  %v5343_v18 = vadd.f32 %v5342_v47, %v5330_v5 }
 0x2a5   :  { %5645 = vmatpush.bf16.msrb.mxu0 %v6420_v7  ;;  %5627 = vmatmul.bf16.vlgmr.msra.gmra.mxu2 %v9384_v58  ;;  %v8793_v7 = vld [vmem:[#allocation5 + $0x7d8] sm:$0xf0]  ;;  %v5368_v53 = vpop.f32.mrf.mxu2  ;;  %v5344_v17 = vpop.f32.mrf.mxu0 }
 0x2a6   :  { %5671 = vmatpush.bf16.msrb.mxu2 %v7764_v33  ;;  %v5999_v33 = vld [vmem:[#allocation5 + $0x1a0] sm:$0xf]  ;;  %v6756_v16 = vor.u32 %v8793_v7, %v6755_v6 }
 0x2a7   :  { %5684 = vmatpush.bf16.msrb.mxu3 %v8436_v12  ;;  %5614 = vmatmul.bf16.vlgmr.msra.gmra.mxu1 %v9382_v50  ;;  %v7343_v12 = vld [vmem:[#allocation5 + $0xc20] sm:$0xf]  ;;  %v6000_v20 = vor.u32 %v8604_v11, %v5999_v33 }
 0x2a8   :  { %5658 = vmatpush.bf16.msrb.mxu1 %v7092_v9  ;;  %v6671_v9 = vld [vmem:[#allocation5 + $0x6e0] sm:$0xf]  ;;  %v7344_v21 = vor.u32 %v8940_v13, %v7343_v12 }
 0x2a9   :  { %5646 = vmatpush.bf16.msrb.mxu0 %v6336_v48  ;;  %v8772_v48 = vld [vmem:[#allocation5 + $0x730] sm:$0xf0]  ;;  %v5331_v28 = vpop.f32.mrf.mxu3 }
 0x2aa   :  { %5672 = vmatpush.bf16.msrb.mxu2 %v7680_v23  ;;  %v5915_v23 = vld [vmem:[#allocation5 + $0xf8] sm:$0xf]  ;;  %v6672_v29 = vor.u32 %v8772_v48, %v6671_v9 }
 0x2ab   :  { %5685 = vmatpush.bf16.msrb.mxu3 %v8352_v24  ;;  %v8583_v24 = vld [vmem:[#allocation5 + $0x148] sm:$0xf0] }
 0x2ac   :  { %5659 = vmatpush.bf16.msrb.mxu1 %v7008_v19  ;;  %v5357_v19 = vpop.f32.mrf.mxu1  ;;  %v5916_v31 = vor.u32 %v8583_v24, %v5915_v23 }
 0x2ad   :  { %5647 = vmatpush.bf16.msrb.mxu0 %v6252_v30  ;;  %v5356_v30 = vadd.f32 %v5355_v3, %v5343_v18  ;;  %v817_v3 = vperm.slane %v9549_v1, 0 }
 0x2ae   :  { %5673 = vmatpush.bf16.msrb.mxu2 %v7596_v34  ;;  %v8751_v34 = vld [vmem:[#allocation5 + $0x688] sm:$0xf0] }
 0x2af   :  { %5686 = vmatpush.bf16.msrb.mxu3 %v8268_v35  ;;  %v7260_v35 = vor.u32 %v8919_v25, %v7259_v14  ;;  %v6588_v47 = vor.u32 %v8751_v34, %v6587_v32  ;;  %v5369_v52 = vadd.f32 %v5368_v53, %v5356_v30 }
 0x2b0   :  { %5660 = vmatpush.bf16.msrb.mxu1 %v6924_v45  ;;  %v5370_v45 = vpop.f32.mrf.mxu2 }
 0x2b1   :  { %5648 = vmatpush.bf16.msrb.mxu0 %v6168_v51  ;;  %v9234_v51 = vld [vmem:[#allocation5 + $0x15a0] sm:$0xf0]  ;;  %v5381_v61 = vpop.f32.mrf.mxu3 }
 0x2b2   :  { %5674 = vmatpush.bf16.msrb.mxu2 %v7512_v55  ;;  %8540 = vmatmul.msk.bf16.vlgmr.msra.gmra.mxu3 %vm4341_vm0, %v9392_v38  ;;  %v6503_v55 = vld [vmem:[#allocation5 + $0x590] sm:$0xf]  ;;  %v8520_v60 = vor.u32 %v9234_v51, %v8519_v49  ;;  %v5382_v63 = vadd.f32 %v5381_v61, %v5369_v52 }
 0x2b3   :  { %5687 = vmatpush.bf16.msrb.mxu3 %v8184_v56  ;;  %v8730_v56 = vld [vmem:[#allocation5 + $0x5e0] sm:$0xf0] }
 0x2b4   :  { %5661 = vmatpush.bf16.msrb.mxu1 %v6840_v2  ;;  %v6504_v62 = vor.u32 %v8730_v56, %v6503_v55  ;;  %5725 = vst [vmem:[#allocation8 + $0x78] sm:$0x3f] %v5382_v63 }
 0x2b5   :  { %5649 = vmatpush.bf16.msrb.mxu0 %v6084_v39 }
 0x2b6   :  { %5675 = vmatpush.bf16.msrb.mxu2 %v7428_v8 }
 0x2b7   :  { %5688 = vmatpush.bf16.msrb.mxu3 %v8100_v10 }
 0x2b8   :  { %5662 = vmatpush.bf16.msrb.mxu1 %v6756_v16 }
 0x2b9   :  { %5650 = vmatpush.bf16.msrb.mxu0 %v6000_v20  ;;  %v5383_v2 = vpop.f32.mrf.mxu3 }
 0x2ba   :  { %5676 = vmatpush.bf16.msrb.mxu2 %v7344_v21 }
 0x2bb   :  { %5689 = vmatpush.bf16.msrb.mxu3 %v8016_v22 }
 0x2bc   :  { %5663 = vmatpush.bf16.msrb.mxu1 %v6672_v29 }
 0x2bd   :  { %5651 = vmatpush.bf16.msrb.mxu0 %v5916_v31  ;;  %v5394_v5 = vpop.f32.mrf.mxu0 }
 0x2be   :  { %5677 = vmatpush.bf16.msrb.mxu2 %v7260_v35  ;;  %v5395_v39 = vadd.f32 %v5394_v5, %v817_v3 }
 0x2bf   :  { %5690 = vmatpush.bf16.msrb.mxu3 %v7932_v36 }
 0x2c0   :  { %5664 = vmatpush.bf16.msrb.mxu1 %v6588_v47  ;;  %v5407_v6 = vpop.f32.mrf.mxu1  ;;  %v820_v47 = vperm.slane %v9549_v1, 3 }
 0x2c1   :  { %5652 = vmatpush.bf16.msrb.mxu0 %v5832_v54  ;;  %v5408_v7 = vadd.f32 %v5407_v6, %v5395_v39  ;;  %v821_v39 = vperm.slane %v9549_v1, 4 }
 0x2c2   :  { %5678 = vmatpush.bf16.msrb.mxu2 %v7176_v57 }
 0x2c3   :  { %5691 = vmatpush.bf16.msrb.mxu3 %v7848_v59 }
 0x2c4   :  { %5665 = vmatpush.bf16.msrb.mxu1 %v6504_v62  ;;  %5653 = vmatmul.bf16.vlgmr.msrb.gmra.mxu0 %v9380_v46  ;;  %v5420_v8 = vpop.f32.mrf.mxu2 }
 0x2c5   :  { %5704 = vmatpush.bf16.msra.mxu0 %v8520_v60  ;;  %5679 = vmatmul.bf16.vlgmr.msrb.gmra.mxu2 %v9382_v50  ;;  %v5396_v10 = vpop.f32.mrf.mxu0  ;;  %v5433_v33 = vpop.f32.mrf.mxu3  ;;  %v5421_v11 = vadd.f32 %v5420_v8, %v5408_v7 }
 0x2c6   :  { %5692 = vmatmul.bf16.vlgmr.msrb.gmra.mxu3 %v9384_v58 }
 0x2c7   :  { %5666 = vmatmul.bf16.vlgmr.msrb.gmra.mxu1 %v9387_v0  ;;  %v5434_v50 = vadd.f32 %v5433_v33, %v5421_v11 }
 0x2c8   :  { %v5409_v46 = vpop.f32.mrf.mxu1 }
 0x2cc   :  { %v5422_v58 = vpop.f32.mrf.mxu2 }
 0x2cd   :  { %v5446_v12 = vpop.f32.mrf.mxu0  ;;  %v5435_v0 = vpop.f32.mrf.mxu3 }
 0x2ce   :  { %v5447_v13 = vadd.f32 %v5446_v12, %v5434_v50 }
 0x2d0   :  { %5726 = vst [vmem:[#allocation8 + $0x80] sm:$0x3f] %v5447_v13 }
 0x2d4   :  { %8541 = vmatmul.msk.bf16.vlgmr.msra.gmra.mxu0 %vm4341_vm0, %v9392_v38 }
 0x2d5   :  { %v5448_v15 = vpop.f32.mrf.mxu0 }
 0x2e0   :  { %v5459_v53 = vpop.f32.mrf.mxu1 }
 0x2e1   :  { %v5498_v16 = vpop.f32.mrf.mxu0  ;;  %v5460_v17 = vadd.f32 %v5459_v53, %v818_v4 }
 0x2e4   :  { %v5472_v20 = vpop.f32.mrf.mxu2 }
 0x2e5   :  { %v5485_v18 = vpop.f32.mrf.mxu3  ;;  %v5473_v48 = vadd.f32 %v5472_v20, %v5460_v17 }
 0x2e7   :  { %v5486_v21 = vadd.f32 %v5485_v18, %v5473_v48 }
 0x2e8   :  { %v5461_v9 = vpop.f32.mrf.mxu1 }
 0x2e9   :  { %v5500_v22 = vpop.f32.mrf.mxu0  ;;  %v5499_v38 = vadd.f32 %v5498_v16, %v5486_v21 }
 0x2ec   :  { %v5474_v24 = vpop.f32.mrf.mxu2 }
 0x2ed   :  { %v5487_v23 = vpop.f32.mrf.mxu3 }
 0x2f0   :  { %v5511_v14 = vpop.f32.mrf.mxu1 }
 0x2f1   :  { %v5512_v25 = vadd.f32 %v5511_v14, %v5499_v38 }
 0x2f3   :  { %5727 = vst [vmem:[#allocation8 + $0x88] sm:$0x3f] %v5512_v25 }
 0x2f8   :  { %v5513_v26 = vpop.f32.mrf.mxu1 }
 0x301   :  { %v5550_v28 = vpop.f32.mrf.mxu0 }
 0x304   :  { %v5524_v29 = vpop.f32.mrf.mxu2  ;;  %v5563_v19 = vpop.f32.mrf.mxu1 }
 0x305   :  { %v5525_v30 = vadd.f32 %v5524_v29, %v819_v27  ;;  %v5537_v31 = vpop.f32.mrf.mxu3 }
 0x307   :  { %v5538_v32 = vadd.f32 %v5537_v31, %v5525_v30 }
 0x309   :  { %v5552_v34 = vpop.f32.mrf.mxu0  ;;  %v5551_v37 = vadd.f32 %v5550_v28, %v5538_v32 }
 0x30b   :  { %v5564_v41 = vadd.f32 %v5563_v19, %v5551_v37 }
 0x30c   :  { %v5526_v35 = vpop.f32.mrf.mxu2  ;;  %v5565_v36 = vpop.f32.mrf.mxu1 }
 0x30d   :  { %v5539_v40 = vpop.f32.mrf.mxu3 }
 0x314   :  { %v5576_v42 = vpop.f32.mrf.mxu2 }
 0x315   :  { %v5577_v43 = vadd.f32 %v5576_v42, %v5564_v41 }
 0x317   :  { %5728 = vst [vmem:[#allocation8 + $0x90] sm:$0x3f] %v5577_v43 }
 0x31c   :  { %v5578_v44 = vpop.f32.mrf.mxu2 }
 0x321   :  { %v5602_v45 = vpop.f32.mrf.mxu0 }
 0x324   :  { %v5615_v51 = vpop.f32.mrf.mxu1 }
 0x325   :  { %v5589_v49 = vpop.f32.mrf.mxu3 }
 0x326   :  { %v5590_v52 = vadd.f32 %v5589_v49, %v820_v47 }
 0x328   :  { %v5628_v54 = vpop.f32.mrf.mxu2  ;;  %v5603_v56 = vadd.f32 %v5602_v45, %v5590_v52 }
 0x329   :  { %v5604_v55 = vpop.f32.mrf.mxu0 }
 0x32a   :  { %v5616_v60 = vadd.f32 %v5615_v51, %v5603_v56 }
 0x32c   :  { %v5617_v59 = vpop.f32.mrf.mxu1  ;;  %v5629_v62 = vadd.f32 %v5628_v54, %v5616_v60 }
 0x32d   :  { %v5591_v57 = vpop.f32.mrf.mxu3 }
 0x330   :  { %v5630_v61 = vpop.f32.mrf.mxu2 }
 0x335   :  { %v5641_v63 = vpop.f32.mrf.mxu3 }
 0x336   :  { %v5642_v2 = vadd.f32 %v5641_v63, %v5629_v62 }
 0x338   :  { %5729 = vst [vmem:[#allocation8 + $0x98] sm:$0x3f] %v5642_v2 }
 0x33d   :  { %v5643_v3 = vpop.f32.mrf.mxu3 }
 0x341   :  { %v5654_v5 = vpop.f32.mrf.mxu0 }
 0x342   :  { %v5655_v7 = vadd.f32 %v5654_v5, %v821_v39 }
 0x344   :  { %v5667_v6 = vpop.f32.mrf.mxu1 }
 0x345   :  { %v5668_v11 = vadd.f32 %v5667_v6, %v5655_v7 }
 0x348   :  { %v5680_v8 = vpop.f32.mrf.mxu2 }
 0x349   :  { %v5693_v10 = vpop.f32.mrf.mxu3  ;;  %v5656_v33 = vpop.f32.mrf.mxu0  ;;  %v5681_v46 = vadd.f32 %v5680_v8, %v5668_v11 }
 0x34b   :  { %v5694_v58 = vadd.f32 %v5693_v10, %v5681_v46 }
 0x34c   :  { %v5669_v50 = vpop.f32.mrf.mxu1 }
 0x350   :  { %v5682_v12 = vpop.f32.mrf.mxu2 }
 0x351   :  { %v5695_v13 = vpop.f32.mrf.mxu3  ;;  %v5706_v0 = vpop.f32.mrf.mxu0 }
 0x352   :  { %v5707_v15 = vadd.f32 %v5706_v0, %v5694_v58 }
 0x354   :  { %5730 = vst [vmem:[#allocation8 + $0xa0] sm:$0x3f] %v5707_v15 }
 0x355   :  { %5741 = dma.vmem_to_hbm [thread:$0]  %s5737_s2, 2688, %s5739_s30, [#allocation4]  }
 0x359   :  { %v5708_v1 = vpop.f32.mrf.mxu0 }
 0x35a   :  { %9343 = dma.done.wait [#allocation4], 2688  }
 0x35b   :  { %9344 = vsyncadd [#allocation4], 4294964608 }
 0x35c   :  { %5746 = vsyncpa [#allocation3], 1 }
 0x35d   :  { %5747 = vsyncpa [#allocation6], 1 }
 0x35e   :  { %5748 = vsyncpa [#allocation4], 1 }

</bundles_post_ra>
